<compile_context>
chip_gen: v7x
topology: tpu7x:2x2x1
jax: 0.10.0
libtpu: 0.0.40
codegen_flags: <defaults>
</compile_context>

<pallas_src>
import jax
import jax.numpy as jnp
import numpy as np
from jax.experimental import pallas as pl
from jax.experimental.pallas import tpu as pltpu


def _round_up(x, m):
    return ((x + m - 1) // m) * m


# ------------------------------ fused kernel --------------------------------
def fused_rnn_kernel(x_ref, wih_ref, whh_ref, b_ref, wf_ref, bf_ref,
                     o_ref, hN_ref, cN_ref,
                     xproj_sc, seq_sc):
    TBp, Hp = x_ref.shape                      # (T*Bp, Hp)
    L = wih_ref.shape[0]
    Bp = hN_ref.shape[1]
    T = TBp // Bp

    for l in range(L):                         # static unroll over layers
        # ---- hoisted input projection: all timesteps in one MXU matmul ----
        src = x_ref if l == 0 else seq_sc
        xproj_sc[...] = (
            jnp.dot(src[...], wih_ref[l], preferred_element_type=jnp.float32)
            + b_ref[l])                        # (T*Bp, 4*Hp), fused bias added once

        # ---- serial recurrence: only h @ W_hh per step ----
        h = jnp.zeros((Bp, Hp), jnp.float32)
        c = jnp.zeros((Bp, Hp), jnp.float32)
        for t in range(T):                     # static unroll, static slices
            row = t * Bp                       # Bp multiple of 8 -> tile-aligned
            gates = (xproj_sc[pl.ds(row, Bp), :]
                     + jnp.dot(h, whh_ref[l],
                               preferred_element_type=jnp.float32))
            # PyTorch gate order i, f, g, o; each slice is a 128-lane block.
            i_g = jax.nn.sigmoid(gates[:, 0 * Hp:1 * Hp])
            f_g = jax.nn.sigmoid(gates[:, 1 * Hp:2 * Hp])
            g_g = jnp.tanh(gates[:, 2 * Hp:3 * Hp])
            o_g = jax.nn.sigmoid(gates[:, 3 * Hp:4 * Hp])
            c = f_g * c + i_g * g_g
            h = o_g * jnp.tanh(c)
            seq_sc[pl.ds(row, Bp), :] = h      # tile-aligned full-vreg store
        hN_ref[l] = h
        cN_ref[l] = c

    # ---- output head: out2(out1(r_out)) folded into one vector ----
    # (T*Bp, Hp) * (1, Hp) broadcast -> VPU mul, lane reduce -> XLU (free slot)
    o_ref[...] = (jnp.sum(seq_sc[...] * wf_ref[...], axis=-1, keepdims=True)
                  + bf_ref[...])                             # (T*Bp, 1)


# --------------------------- parameter handling ------------------------------
def init_rnn_params(key, input_size, num_layers):
    hidden = input_size                  # module sets hidden_size = input_size
    H = 2 * hidden                       # LSTM hidden = hidden_size * 2
    params = {'lstm': [], 'input_size': input_size, 'hidden': hidden, 'H': H}
    for layer in range(num_layers):
        in_l = input_size if layer == 0 else H
        key, k1, k2, k3, k4 = jax.random.split(key, 5)
        scale = 1.0 / jnp.sqrt(H)
        params['lstm'].append({
            'w_ih': jax.random.uniform(k1, (4 * H, in_l), jnp.float32, -scale, scale),
            'w_hh': jax.random.uniform(k2, (4 * H, H), jnp.float32, -scale, scale),
            'b_ih': jax.random.uniform(k3, (4 * H,), jnp.float32, -scale, scale),
            'b_hh': jax.random.uniform(k4, (4 * H,), jnp.float32, -scale, scale),
        })
    key, k1, k2, k3, k4 = jax.random.split(key, 5)
    params['w1'] = jax.random.uniform(k1, (hidden, H), jnp.float32, -0.1, 0.1)
    params['b1'] = jax.random.uniform(k2, (hidden,), jnp.float32, -0.1, 0.1)
    params['w2'] = jax.random.uniform(k3, (1, hidden), jnp.float32, -0.1, 0.1)
    params['b2'] = jax.random.uniform(k4, (1,), jnp.float32, -0.1, 0.1)
    return params


def prepare_kernel_params(params):
    """One-time layout prep: transpose, pad gates to 128-lane blocks, stack layers,
    and fold the two output Linear layers (no activation between them) into a
    single vector + scalar bias.

    Zero padding keeps the padded hidden lanes at exactly 0 through the
    recurrence (sigmoid(0)=0.5 gates, tanh(0)=0 candidate -> h_pad, c_pad stay 0),
    so the true lanes are bit-for-bit the unpadded computation.
    """
    H, hidden = params['H'], params['hidden']
    Hp = _round_up(H, 128)

    wih_l, whh_l, b_l = [], [], []
    for lp in params['lstm']:
        in_l = lp['w_ih'].shape[1]
        wih_t = lp['w_ih'].T                     # (in_l, 4H)
        whh_t = lp['w_hh'].T                     # (H, 4H)
        bias = (lp['b_ih'] + lp['b_hh']).reshape(1, 4 * H)
        wih_p = jnp.zeros((Hp, 4 * Hp), jnp.float32)
        whh_p = jnp.zeros((Hp, 4 * Hp), jnp.float32)
        b_p = jnp.zeros((1, 4 * Hp), jnp.float32)
        for k in range(4):                       # scatter each gate to a 128-lane block
            wih_p = wih_p.at[:in_l, k * Hp:k * Hp + H].set(wih_t[:, k * H:(k + 1) * H])
            whh_p = whh_p.at[:H, k * Hp:k * Hp + H].set(whh_t[:, k * H:(k + 1) * H])
            b_p = b_p.at[:, k * Hp:k * Hp + H].set(bias[:, k * H:(k + 1) * H])
        wih_l.append(wih_p)
        whh_l.append(whh_p)
        b_l.append(b_p)

    # Fold out2(out1(x)) = x @ (W2 @ W1)^T + (W2 @ b1 + b2)   (no nonlinearity).
    w_fused = params['w2'] @ params['w1']                       # (1, H)
    b_fused = params['w2'] @ params['b1'] + params['b2']        # (1,)

    return {
        'wih': jnp.stack(wih_l),                 # (L, Hp, 4Hp)
        'whh': jnp.stack(whh_l),                 # (L, Hp, 4Hp)
        'b': jnp.stack(b_l),                     # (L, 1, 4Hp)
        'wf': jnp.zeros((1, Hp), jnp.float32).at[:, :H].set(w_fused),
        'bf': b_fused.reshape(1, 1),
        'Hp': Hp, 'H': H, 'L': len(params['lstm']),
    }


# ------------------------------ forward pass ---------------------------------
def rnn_forward(kp, x):
    """x: (B, T, input_size) float32, batch_first (PyTorch convention)."""
    B, T, I = x.shape
    Hp, H, L = kp['Hp'], kp['H'], kp['L']
    Bp = _round_up(B, 8)                                   # sublane-aligned batch

    xt = jnp.transpose(x, (1, 0, 2))                       # (T, B, I) time-major
    xt = jnp.pad(xt, ((0, 0), (0, Bp - B), (0, Hp - I)))   # zero-pad batch & features
    x_flat = xt.reshape(T * Bp, Hp)

    o_flat, hN_p, cN_p = pl.pallas_call(
        fused_rnn_kernel,
        grid=(1,),
        in_specs=[
            pl.BlockSpec((T * Bp, Hp), lambda i: (0, 0)),
            pl.BlockSpec((L, Hp, 4 * Hp), lambda i: (0, 0, 0)),
            pl.BlockSpec((L, Hp, 4 * Hp), lambda i: (0, 0, 0)),
            pl.BlockSpec((L, 1, 4 * Hp), lambda i: (0, 0, 0)),
            pl.BlockSpec((1, Hp), lambda i: (0, 0)),
            pl.BlockSpec((1, 1), lambda i: (0, 0)),
        ],
        out_specs=[
            pl.BlockSpec((T * Bp, 1), lambda i: (0, 0)),
            pl.BlockSpec((L, Bp, Hp), lambda i: (0, 0, 0)),
            pl.BlockSpec((L, Bp, Hp), lambda i: (0, 0, 0)),
        ],
        out_shape=(
            jax.ShapeDtypeStruct((T * Bp, 1), jnp.float32),
            jax.ShapeDtypeStruct((L, Bp, Hp), jnp.float32),
            jax.ShapeDtypeStruct((L, Bp, Hp), jnp.float32),
        ),
        scratch_shapes=[
            pltpu.VMEM((T * Bp, 4 * Hp), jnp.float32),     # hoisted x-projection
            pltpu.VMEM((T * Bp, Hp), jnp.float32),         # layer output sequence
        ],
        compiler_params=pltpu.CompilerParams(
            dimension_semantics=("arbitrary",)),
    )(x_flat, kp['wih'], kp['whh'], kp['b'], kp['wf'], kp['bf'])

    outs = o_flat.reshape(T, Bp)[:, :B].T                  # (B, T) == outs.view(-1, T)
    h_n = hN_p[:, :B, :H]                                  # (L, B, 2*hidden)
    c_n = cN_p[:, :B, :H]
    return outs, (h_n, c_n)


# --------------------------- pure-JAX reference -------------------------------
def rnn_forward_ref(params, x):
    B, T, _ = x.shape
    H = params['H']
    with jax.default_matmul_precision("highest"):
        inp = x
        h_ns, c_ns = [], []
        for lp in params['lstm']:
            h = jnp.zeros((B, H), jnp.float32)
            c = jnp.zeros((B, H), jnp.float32)
            bias = lp['b_ih'] + lp['b_hh']
            outs = []
            for t in range(T):
                g = inp[:, t, :] @ lp['w_ih'].T + h @ lp['w_hh'].T + bias
                i_g = jax.nn.sigmoid(g[:, 0 * H:1 * H])
                f_g = jax.nn.sigmoid(g[:, 1 * H:2 * H])
                g_g = jnp.tanh(g[:, 2 * H:3 * H])
                o_g = jax.nn.sigmoid(g[:, 3 * H:4 * H])
                c = f_g * c + i_g * g_g
                h = o_g * jnp.tanh(c)
                outs.append(h)
            inp = jnp.stack(outs, axis=1)
            h_ns.append(h)
            c_ns.append(c)
        o1 = inp @ params['w1'].T + params['b1']
        o2 = o1 @ params['w2'].T + params['b2']
    return o2.reshape(B, T), (jnp.stack(h_ns), jnp.stack(c_ns))


if __name__ == "__main__":
    key = jax.random.PRNGKey(0)
    k_param, k_x = jax.random.split(key)

    batch, seq, input_size, num_layers = 2, 8, 8, 2
    params = init_rnn_params(k_param, input_size, num_layers)
    kparams = prepare_kernel_params(params)
    x = jax.random.normal(k_x, (batch, seq, input_size), dtype=jnp.float32)

    outs, (h_n, c_n) = rnn_forward(kparams, x)
    jax.block_until_ready((outs, h_n, c_n))

    assert outs.shape == (batch, seq)
    assert h_n.shape == (num_layers, batch, 2 * input_size)
    assert c_n.shape == (num_layers, batch, 2 * input_size)

    # numerical sanity check against a pure-JAX reference
    outs_r, (h_r, c_r) = rnn_forward_ref(params, x)
    np.testing.assert_allclose(np.asarray(outs), np.asarray(outs_r), rtol=2e-2, atol=2e-2)
    np.testing.assert_allclose(np.asarray(h_n), np.asarray(h_r), rtol=2e-2, atol=2e-2)
    np.testing.assert_allclose(np.asarray(c_n), np.asarray(c_r), rtol=2e-2, atol=2e-2)

    print("KERNEL_OK")
</pallas_src>

<mosaic_0001>
module attributes {stable_mosaic.version = 11 : i64} {
  func.func @fused_rnn_kernel(%arg0: i32, %arg1: memref<64x128xf32, #tpu.memory_space<vmem>>, %arg2: memref<2x128x512xf32, #tpu.memory_space<vmem>>, %arg3: memref<2x128x512xf32, #tpu.memory_space<vmem>>, %arg4: memref<2x1x512xf32, #tpu.memory_space<vmem>>, %arg5: memref<1x128xf32, #tpu.memory_space<vmem>>, %arg6: memref<1x1xf32, #tpu.memory_space<vmem>>, %arg7: memref<64x1xf32, #tpu.memory_space<vmem>>, %arg8: memref<2x8x128xf32, #tpu.memory_space<vmem>>, %arg9: memref<2x8x128xf32, #tpu.memory_space<vmem>>, %arg10: memref<64x512xf32, #tpu.memory_space<vmem>>, %arg11: memref<64x128xf32, #tpu.memory_space<vmem>>) attributes {dimension_semantics = [#tpu.dimension_semantics<arbitrary>], iteration_bounds = array<i64: 1>, scalar_prefetch = 0 : i64, scratch_operands = 2 : i64, tpu.core_type = #tpu.core_type<tc>, window_params = [{pipeline_mode = #tpu.pipeline_mode<synchronous>, transform_indices = @transform_0, window_bounds = array<i64: 64, 128>}, {pipeline_mode = #tpu.pipeline_mode<synchronous>, transform_indices = @transform_1, window_bounds = array<i64: 2, 128, 512>}, {pipeline_mode = #tpu.pipeline_mode<synchronous>, transform_indices = @transform_2, window_bounds = array<i64: 2, 128, 512>}, {pipeline_mode = #tpu.pipeline_mode<synchronous>, transform_indices = @transform_3, window_bounds = array<i64: 2, 1, 512>}, {pipeline_mode = #tpu.pipeline_mode<synchronous>, transform_indices = @transform_4, window_bounds = array<i64: 1, 128>}, {pipeline_mode = #tpu.pipeline_mode<synchronous>, transform_indices = @transform_5, window_bounds = array<i64: 1, 1>}, {pipeline_mode = #tpu.pipeline_mode<synchronous>, transform_indices = @transform_6, window_bounds = array<i64: 64, 1>}, {pipeline_mode = #tpu.pipeline_mode<synchronous>, transform_indices = @transform_7, window_bounds = array<i64: 2, 8, 128>}, {pipeline_mode = #tpu.pipeline_mode<synchronous>, transform_indices = @transform_8, window_bounds = array<i64: 2, 8, 128>}]} {
    %c0 = arith.constant 0 : index
    %c0_0 = arith.constant 0 : index
    %0 = vector.load %arg1[%c0, %c0_0] : memref<64x128xf32, #tpu.memory_space<vmem>>, vector<64x128xf32>
    %c0_1 = arith.constant 0 : index
    %c0_2 = arith.constant 0 : index
    %c0_3 = arith.constant 0 : index
    %1 = vector.load %arg2[%c0_1, %c0_2, %c0_3] : memref<2x128x512xf32, #tpu.memory_space<vmem>>, vector<1x128x512xf32>
    %2 = vector.shape_cast %1 : vector<1x128x512xf32> to vector<128x512xf32>
    %cst = arith.constant dense<0.000000e+00> : vector<64x512xf32>
    %3 = tpu.matmul %0, %2, %cst {dimension_numbers = #tpu.dot_dimension_numbers<[1], [0], [0], [1], [0, 0, 1, 1], [], []>} : vector<64x128xf32>, vector<128x512xf32>, vector<64x512xf32> -> vector<64x512xf32>
    %c0_4 = arith.constant 0 : index
    %c0_5 = arith.constant 0 : index
    %c0_6 = arith.constant 0 : index
    %4 = vector.load %arg4[%c0_4, %c0_5, %c0_6] : memref<2x1x512xf32, #tpu.memory_space<vmem>>, vector<1x1x512xf32>
    %5 = vector.shape_cast %4 : vector<1x1x512xf32> to vector<1x512xf32>
    %6 = vector.broadcast %5 : vector<1x512xf32> to vector<64x512xf32>
    %7 = arith.addf %3, %6 : vector<64x512xf32>
    %c0_7 = arith.constant 0 : index
    %c0_8 = arith.constant 0 : index
    %8 = vector.load %arg10[%c0_7, %c0_8] : memref<64x512xf32, #tpu.memory_space<vmem>>, vector<64x512xf32>
    tpu.vector_store %arg10[%c0_7, %c0_8], %7 {strides = array<i32>} : memref<64x512xf32, #tpu.memory_space<vmem>>, vector<64x512xf32>,
    %cst_9 = arith.constant 0.000000e+00 : f32
    %9 = vector.broadcast %cst_9 : f32 to vector<8x128xf32>
    %cst_10 = arith.constant 0.000000e+00 : f32
    %10 = vector.broadcast %cst_10 : f32 to vector<8x128xf32>
    %c0_11 = arith.constant 0 : index
    %c0_12 = arith.constant 0 : index
    %11 = vector.load %arg10[%c0_11, %c0_12] : memref<64x512xf32, #tpu.memory_space<vmem>>, vector<8x512xf32>
    %c0_13 = arith.constant 0 : index
    %c0_14 = arith.constant 0 : index
    %c0_15 = arith.constant 0 : index
    %12 = vector.load %arg3[%c0_13, %c0_14, %c0_15] : memref<2x128x512xf32, #tpu.memory_space<vmem>>, vector<1x128x512xf32>
    %13 = vector.shape_cast %12 : vector<1x128x512xf32> to vector<128x512xf32>
    %cst_16 = arith.constant dense<0.000000e+00> : vector<8x512xf32>
    %14 = tpu.matmul %9, %13, %cst_16 {dimension_numbers = #tpu.dot_dimension_numbers<[1], [0], [0], [1], [0, 0, 1, 1], [], []>} : vector<8x128xf32>, vector<128x512xf32>, vector<8x512xf32> -> vector<8x512xf32>
    %15 = arith.addf %11, %14 : vector<8x512xf32>
    %16 = vector.extract_strided_slice %15 {offsets = [0, 0], sizes = [8, 128], strides = [1, 1]} : vector<8x512xf32> to vector<8x128xf32>
    %17 = arith.negf %16 : vector<8x128xf32>
    %18 = math.exp %17 : vector<8x128xf32>
    %cst_17 = arith.constant 1.000000e+00 : f32
    %19 = vector.broadcast %cst_17 : f32 to vector<8x128xf32>
    %20 = arith.addf %19, %18 : vector<8x128xf32>
    %21 = arith.divf %19, %20 : vector<8x128xf32>
    %22 = vector.extract_strided_slice %15 {offsets = [0, 128], sizes = [8, 128], strides = [1, 1]} : vector<8x512xf32> to vector<8x128xf32>
    %23 = arith.negf %22 : vector<8x128xf32>
    %24 = math.exp %23 : vector<8x128xf32>
    %cst_18 = arith.constant 1.000000e+00 : f32
    %25 = vector.broadcast %cst_18 : f32 to vector<8x128xf32>
    %26 = arith.addf %25, %24 : vector<8x128xf32>
    %27 = arith.divf %25, %26 : vector<8x128xf32>
    %28 = vector.extract_strided_slice %15 {offsets = [0, 256], sizes = [8, 128], strides = [1, 1]} : vector<8x512xf32> to vector<8x128xf32>
    %29 = math.tanh %28 : vector<8x128xf32>
    %30 = vector.extract_strided_slice %15 {offsets = [0, 384], sizes = [8, 128], strides = [1, 1]} : vector<8x512xf32> to vector<8x128xf32>
    %31 = arith.negf %30 : vector<8x128xf32>
    %32 = math.exp %31 : vector<8x128xf32>
    %cst_19 = arith.constant 1.000000e+00 : f32
    %33 = vector.broadcast %cst_19 : f32 to vector<8x128xf32>
    %34 = arith.addf %33, %32 : vector<8x128xf32>
    %35 = arith.divf %33, %34 : vector<8x128xf32>
    %36 = arith.mulf %27, %10 : vector<8x128xf32>
    %37 = arith.mulf %21, %29 : vector<8x128xf32>
    %38 = arith.addf %36, %37 : vector<8x128xf32>
    %39 = math.tanh %38 : vector<8x128xf32>
    %40 = arith.mulf %35, %39 : vector<8x128xf32>
    %c0_20 = arith.constant 0 : index
    %c0_21 = arith.constant 0 : index
    %41 = vector.load %arg11[%c0_20, %c0_21] : memref<64x128xf32, #tpu.memory_space<vmem>>, vector<8x128xf32>
    tpu.vector_store %arg11[%c0_20, %c0_21], %40 {strides = array<i32>} : memref<64x128xf32, #tpu.memory_space<vmem>>, vector<8x128xf32>,
    %c8 = arith.constant 8 : index
    %c0_22 = arith.constant 0 : index
    %42 = vector.load %arg10[%c8, %c0_22] : memref<64x512xf32, #tpu.memory_space<vmem>>, vector<8x512xf32>
    %c0_23 = arith.constant 0 : index
    %c0_24 = arith.constant 0 : index
    %c0_25 = arith.constant 0 : index
    %43 = vector.load %arg3[%c0_23, %c0_24, %c0_25] : memref<2x128x512xf32, #tpu.memory_space<vmem>>, vector<1x128x512xf32>
    %44 = vector.shape_cast %43 : vector<1x128x512xf32> to vector<128x512xf32>
    %cst_26 = arith.constant dense<0.000000e+00> : vector<8x512xf32>
    %45 = tpu.matmul %40, %44, %cst_26 {dimension_numbers = #tpu.dot_dimension_numbers<[1], [0], [0], [1], [0, 0, 1, 1], [], []>} : vector<8x128xf32>, vector<128x512xf32>, vector<8x512xf32> -> vector<8x512xf32>
    %46 = arith.addf %42, %45 : vector<8x512xf32>
    %47 = vector.extract_strided_slice %46 {offsets = [0, 0], sizes = [8, 128], strides = [1, 1]} : vector<8x512xf32> to vector<8x128xf32>
    %48 = arith.negf %47 : vector<8x128xf32>
    %49 = math.exp %48 : vector<8x128xf32>
    %cst_27 = arith.constant 1.000000e+00 : f32
    %50 = vector.broadcast %cst_27 : f32 to vector<8x128xf32>
    %51 = arith.addf %50, %49 : vector<8x128xf32>
    %52 = arith.divf %50, %51 : vector<8x128xf32>
    %53 = vector.extract_strided_slice %46 {offsets = [0, 128], sizes = [8, 128], strides = [1, 1]} : vector<8x512xf32> to vector<8x128xf32>
    %54 = arith.negf %53 : vector<8x128xf32>
    %55 = math.exp %54 : vector<8x128xf32>
    %cst_28 = arith.constant 1.000000e+00 : f32
    %56 = vector.broadcast %cst_28 : f32 to vector<8x128xf32>
    %57 = arith.addf %56, %55 : vector<8x128xf32>
    %58 = arith.divf %56, %57 : vector<8x128xf32>
    %59 = vector.extract_strided_slice %46 {offsets = [0, 256], sizes = [8, 128], strides = [1, 1]} : vector<8x512xf32> to vector<8x128xf32>
    %60 = math.tanh %59 : vector<8x128xf32>
    %61 = vector.extract_strided_slice %46 {offsets = [0, 384], sizes = [8, 128], strides = [1, 1]} : vector<8x512xf32> to vector<8x128xf32>
    %62 = arith.negf %61 : vector<8x128xf32>
    %63 = math.exp %62 : vector<8x128xf32>
    %cst_29 = arith.constant 1.000000e+00 : f32
    %64 = vector.broadcast %cst_29 : f32 to vector<8x128xf32>
    %65 = arith.addf %64, %63 : vector<8x128xf32>
    %66 = arith.divf %64, %65 : vector<8x128xf32>
    %67 = arith.mulf %58, %38 : vector<8x128xf32>
    %68 = arith.mulf %52, %60 : vector<8x128xf32>
    %69 = arith.addf %67, %68 : vector<8x128xf32>
    %70 = math.tanh %69 : vector<8x128xf32>
    %71 = arith.mulf %66, %70 : vector<8x128xf32>
    %c8_30 = arith.constant 8 : index
    %c0_31 = arith.constant 0 : index
    %72 = vector.load %arg11[%c8_30, %c0_31] : memref<64x128xf32, #tpu.memory_space<vmem>>, vector<8x128xf32>
    tpu.vector_store %arg11[%c8_30, %c0_31], %71 {strides = array<i32>} : memref<64x128xf32, #tpu.memory_space<vmem>>, vector<8x128xf32>,
    %c16 = arith.constant 16 : index
    %c0_32 = arith.constant 0 : index
    %73 = vector.load %arg10[%c16, %c0_32] : memref<64x512xf32, #tpu.memory_space<vmem>>, vector<8x512xf32>
    %c0_33 = arith.constant 0 : index
    %c0_34 = arith.constant 0 : index
    %c0_35 = arith.constant 0 : index
    %74 = vector.load %arg3[%c0_33, %c0_34, %c0_35] : memref<2x128x512xf32, #tpu.memory_space<vmem>>, vector<1x128x512xf32>
    %75 = vector.shape_cast %74 : vector<1x128x512xf32> to vector<128x512xf32>
    %cst_36 = arith.constant dense<0.000000e+00> : vector<8x512xf32>
    %76 = tpu.matmul %71, %75, %cst_36 {dimension_numbers = #tpu.dot_dimension_numbers<[1], [0], [0], [1], [0, 0, 1, 1], [], []>} : vector<8x128xf32>, vector<128x512xf32>, vector<8x512xf32> -> vector<8x512xf32>
    %77 = arith.addf %73, %76 : vector<8x512xf32>
    %78 = vector.extract_strided_slice %77 {offsets = [0, 0], sizes = [8, 128], strides = [1, 1]} : vector<8x512xf32> to vector<8x128xf32>
    %79 = arith.negf %78 : vector<8x128xf32>
    %80 = math.exp %79 : vector<8x128xf32>
    %cst_37 = arith.constant 1.000000e+00 : f32
    %81 = vector.broadcast %cst_37 : f32 to vector<8x128xf32>
    %82 = arith.addf %81, %80 : vector<8x128xf32>
    %83 = arith.divf %81, %82 : vector<8x128xf32>
    %84 = vector.extract_strided_slice %77 {offsets = [0, 128], sizes = [8, 128], strides = [1, 1]} : vector<8x512xf32> to vector<8x128xf32>
    %85 = arith.negf %84 : vector<8x128xf32>
    %86 = math.exp %85 : vector<8x128xf32>
    %cst_38 = arith.constant 1.000000e+00 : f32
    %87 = vector.broadcast %cst_38 : f32 to vector<8x128xf32>
    %88 = arith.addf %87, %86 : vector<8x128xf32>
    %89 = arith.divf %87, %88 : vector<8x128xf32>
    %90 = vector.extract_strided_slice %77 {offsets = [0, 256], sizes = [8, 128], strides = [1, 1]} : vector<8x512xf32> to vector<8x128xf32>
    %91 = math.tanh %90 : vector<8x128xf32>
    %92 = vector.extract_strided_slice %77 {offsets = [0, 384], sizes = [8, 128], strides = [1, 1]} : vector<8x512xf32> to vector<8x128xf32>
    %93 = arith.negf %92 : vector<8x128xf32>
    %94 = math.exp %93 : vector<8x128xf32>
    %cst_39 = arith.constant 1.000000e+00 : f32
    %95 = vector.broadcast %cst_39 : f32 to vector<8x128xf32>
    %96 = arith.addf %95, %94 : vector<8x128xf32>
    %97 = arith.divf %95, %96 : vector<8x128xf32>
    %98 = arith.mulf %89, %69 : vector<8x128xf32>
    %99 = arith.mulf %83, %91 : vector<8x128xf32>
    %100 = arith.addf %98, %99 : vector<8x128xf32>
    %101 = math.tanh %100 : vector<8x128xf32>
    %102 = arith.mulf %97, %101 : vector<8x128xf32>
    %c16_40 = arith.constant 16 : index
    %c0_41 = arith.constant 0 : index
    %103 = vector.load %arg11[%c16_40, %c0_41] : memref<64x128xf32, #tpu.memory_space<vmem>>, vector<8x128xf32>
    tpu.vector_store %arg11[%c16_40, %c0_41], %102 {strides = array<i32>} : memref<64x128xf32, #tpu.memory_space<vmem>>, vector<8x128xf32>,
    %c24 = arith.constant 24 : index
    %c0_42 = arith.constant 0 : index
    %104 = vector.load %arg10[%c24, %c0_42] : memref<64x512xf32, #tpu.memory_space<vmem>>, vector<8x512xf32>
    %c0_43 = arith.constant 0 : index
    %c0_44 = arith.constant 0 : index
    %c0_45 = arith.constant 0 : index
    %105 = vector.load %arg3[%c0_43, %c0_44, %c0_45] : memref<2x128x512xf32, #tpu.memory_space<vmem>>, vector<1x128x512xf32>
    %106 = vector.shape_cast %105 : vector<1x128x512xf32> to vector<128x512xf32>
    %cst_46 = arith.constant dense<0.000000e+00> : vector<8x512xf32>
    %107 = tpu.matmul %102, %106, %cst_46 {dimension_numbers = #tpu.dot_dimension_numbers<[1], [0], [0], [1], [0, 0, 1, 1], [], []>} : vector<8x128xf32>, vector<128x512xf32>, vector<8x512xf32> -> vector<8x512xf32>
    %108 = arith.addf %104, %107 : vector<8x512xf32>
    %109 = vector.extract_strided_slice %108 {offsets = [0, 0], sizes = [8, 128], strides = [1, 1]} : vector<8x512xf32> to vector<8x128xf32>
    %110 = arith.negf %109 : vector<8x128xf32>
    %111 = math.exp %110 : vector<8x128xf32>
    %cst_47 = arith.constant 1.000000e+00 : f32
    %112 = vector.broadcast %cst_47 : f32 to vector<8x128xf32>
    %113 = arith.addf %112, %111 : vector<8x128xf32>
    %114 = arith.divf %112, %113 : vector<8x128xf32>
    %115 = vector.extract_strided_slice %108 {offsets = [0, 128], sizes = [8, 128], strides = [1, 1]} : vector<8x512xf32> to vector<8x128xf32>
    %116 = arith.negf %115 : vector<8x128xf32>
    %117 = math.exp %116 : vector<8x128xf32>
    %cst_48 = arith.constant 1.000000e+00 : f32
    %118 = vector.broadcast %cst_48 : f32 to vector<8x128xf32>
    %119 = arith.addf %118, %117 : vector<8x128xf32>
    %120 = arith.divf %118, %119 : vector<8x128xf32>
    %121 = vector.extract_strided_slice %108 {offsets = [0, 256], sizes = [8, 128], strides = [1, 1]} : vector<8x512xf32> to vector<8x128xf32>
    %122 = math.tanh %121 : vector<8x128xf32>
    %123 = vector.extract_strided_slice %108 {offsets = [0, 384], sizes = [8, 128], strides = [1, 1]} : vector<8x512xf32> to vector<8x128xf32>
    %124 = arith.negf %123 : vector<8x128xf32>
    %125 = math.exp %124 : vector<8x128xf32>
    %cst_49 = arith.constant 1.000000e+00 : f32
    %126 = vector.broadcast %cst_49 : f32 to vector<8x128xf32>
    %127 = arith.addf %126, %125 : vector<8x128xf32>
    %128 = arith.divf %126, %127 : vector<8x128xf32>
    %129 = arith.mulf %120, %100 : vector<8x128xf32>
    %130 = arith.mulf %114, %122 : vector<8x128xf32>
    %131 = arith.addf %129, %130 : vector<8x128xf32>
    %132 = math.tanh %131 : vector<8x128xf32>
    %133 = arith.mulf %128, %132 : vector<8x128xf32>
    %c24_50 = arith.constant 24 : index
    %c0_51 = arith.constant 0 : index
    %134 = vector.load %arg11[%c24_50, %c0_51] : memref<64x128xf32, #tpu.memory_space<vmem>>, vector<8x128xf32>
    tpu.vector_store %arg11[%c24_50, %c0_51], %133 {strides = array<i32>} : memref<64x128xf32, #tpu.memory_space<vmem>>, vector<8x128xf32>,
    %c32 = arith.constant 32 : index
    %c0_52 = arith.constant 0 : index
    %135 = vector.load %arg10[%c32, %c0_52] : memref<64x512xf32, #tpu.memory_space<vmem>>, vector<8x512xf32>
    %c0_53 = arith.constant 0 : index
    %c0_54 = arith.constant 0 : index
    %c0_55 = arith.constant 0 : index
    %136 = vector.load %arg3[%c0_53, %c0_54, %c0_55] : memref<2x128x512xf32, #tpu.memory_space<vmem>>, vector<1x128x512xf32>
    %137 = vector.shape_cast %136 : vector<1x128x512xf32> to vector<128x512xf32>
    %cst_56 = arith.constant dense<0.000000e+00> : vector<8x512xf32>
    %138 = tpu.matmul %133, %137, %cst_56 {dimension_numbers = #tpu.dot_dimension_numbers<[1], [0], [0], [1], [0, 0, 1, 1], [], []>} : vector<8x128xf32>, vector<128x512xf32>, vector<8x512xf32> -> vector<8x512xf32>
    %139 = arith.addf %135, %138 : vector<8x512xf32>
    %140 = vector.extract_strided_slice %139 {offsets = [0, 0], sizes = [8, 128], strides = [1, 1]} : vector<8x512xf32> to vector<8x128xf32>
    %141 = arith.negf %140 : vector<8x128xf32>
    %142 = math.exp %141 : vector<8x128xf32>
    %cst_57 = arith.constant 1.000000e+00 : f32
    %143 = vector.broadcast %cst_57 : f32 to vector<8x128xf32>
    %144 = arith.addf %143, %142 : vector<8x128xf32>
    %145 = arith.divf %143, %144 : vector<8x128xf32>
    %146 = vector.extract_strided_slice %139 {offsets = [0, 128], sizes = [8, 128], strides = [1, 1]} : vector<8x512xf32> to vector<8x128xf32>
    %147 = arith.negf %146 : vector<8x128xf32>
    %148 = math.exp %147 : vector<8x128xf32>
    %cst_58 = arith.constant 1.000000e+00 : f32
    %149 = vector.broadcast %cst_58 : f32 to vector<8x128xf32>
    %150 = arith.addf %149, %148 : vector<8x128xf32>
    %151 = arith.divf %149, %150 : vector<8x128xf32>
    %152 = vector.extract_strided_slice %139 {offsets = [0, 256], sizes = [8, 128], strides = [1, 1]} : vector<8x512xf32> to vector<8x128xf32>
    %153 = math.tanh %152 : vector<8x128xf32>
    %154 = vector.extract_strided_slice %139 {offsets = [0, 384], sizes = [8, 128], strides = [1, 1]} : vector<8x512xf32> to vector<8x128xf32>
    %155 = arith.negf %154 : vector<8x128xf32>
    %156 = math.exp %155 : vector<8x128xf32>
    %cst_59 = arith.constant 1.000000e+00 : f32
    %157 = vector.broadcast %cst_59 : f32 to vector<8x128xf32>
    %158 = arith.addf %157, %156 : vector<8x128xf32>
    %159 = arith.divf %157, %158 : vector<8x128xf32>
    %160 = arith.mulf %151, %131 : vector<8x128xf32>
    %161 = arith.mulf %145, %153 : vector<8x128xf32>
    %162 = arith.addf %160, %161 : vector<8x128xf32>
    %163 = math.tanh %162 : vector<8x128xf32>
    %164 = arith.mulf %159, %163 : vector<8x128xf32>
    %c32_60 = arith.constant 32 : index
    %c0_61 = arith.constant 0 : index
    %165 = vector.load %arg11[%c32_60, %c0_61] : memref<64x128xf32, #tpu.memory_space<vmem>>, vector<8x128xf32>
    tpu.vector_store %arg11[%c32_60, %c0_61], %164 {strides = array<i32>} : memref<64x128xf32, #tpu.memory_space<vmem>>, vector<8x128xf32>,
    %c40 = arith.constant 40 : index
    %c0_62 = arith.constant 0 : index
    %166 = vector.load %arg10[%c40, %c0_62] : memref<64x512xf32, #tpu.memory_space<vmem>>, vector<8x512xf32>
    %c0_63 = arith.constant 0 : index
    %c0_64 = arith.constant 0 : index
    %c0_65 = arith.constant 0 : index
    %167 = vector.load %arg3[%c0_63, %c0_64, %c0_65] : memref<2x128x512xf32, #tpu.memory_space<vmem>>, vector<1x128x512xf32>
    %168 = vector.shape_cast %167 : vector<1x128x512xf32> to vector<128x512xf32>
    %cst_66 = arith.constant dense<0.000000e+00> : vector<8x512xf32>
    %169 = tpu.matmul %164, %168, %cst_66 {dimension_numbers = #tpu.dot_dimension_numbers<[1], [0], [0], [1], [0, 0, 1, 1], [], []>} : vector<8x128xf32>, vector<128x512xf32>, vector<8x512xf32> -> vector<8x512xf32>
    %170 = arith.addf %166, %169 : vector<8x512xf32>
    %171 = vector.extract_strided_slice %170 {offsets = [0, 0], sizes = [8, 128], strides = [1, 1]} : vector<8x512xf32> to vector<8x128xf32>
    %172 = arith.negf %171 : vector<8x128xf32>
    %173 = math.exp %172 : vector<8x128xf32>
    %cst_67 = arith.constant 1.000000e+00 : f32
    %174 = vector.broadcast %cst_67 : f32 to vector<8x128xf32>
    %175 = arith.addf %174, %173 : vector<8x128xf32>
    %176 = arith.divf %174, %175 : vector<8x128xf32>
    %177 = vector.extract_strided_slice %170 {offsets = [0, 128], sizes = [8, 128], strides = [1, 1]} : vector<8x512xf32> to vector<8x128xf32>
    %178 = arith.negf %177 : vector<8x128xf32>
    %179 = math.exp %178 : vector<8x128xf32>
    %cst_68 = arith.constant 1.000000e+00 : f32
    %180 = vector.broadcast %cst_68 : f32 to vector<8x128xf32>
    %181 = arith.addf %180, %179 : vector<8x128xf32>
    %182 = arith.divf %180, %181 : vector<8x128xf32>
    %183 = vector.extract_strided_slice %170 {offsets = [0, 256], sizes = [8, 128], strides = [1, 1]} : vector<8x512xf32> to vector<8x128xf32>
    %184 = math.tanh %183 : vector<8x128xf32>
    %185 = vector.extract_strided_slice %170 {offsets = [0, 384], sizes = [8, 128], strides = [1, 1]} : vector<8x512xf32> to vector<8x128xf32>
    %186 = arith.negf %185 : vector<8x128xf32>
    %187 = math.exp %186 : vector<8x128xf32>
    %cst_69 = arith.constant 1.000000e+00 : f32
    %188 = vector.broadcast %cst_69 : f32 to vector<8x128xf32>
    %189 = arith.addf %188, %187 : vector<8x128xf32>
    %190 = arith.divf %188, %189 : vector<8x128xf32>
    %191 = arith.mulf %182, %162 : vector<8x128xf32>
    %192 = arith.mulf %176, %184 : vector<8x128xf32>
    %193 = arith.addf %191, %192 : vector<8x128xf32>
    %194 = math.tanh %193 : vector<8x128xf32>
    %195 = arith.mulf %190, %194 : vector<8x128xf32>
    %c40_70 = arith.constant 40 : index
    %c0_71 = arith.constant 0 : index
    %196 = vector.load %arg11[%c40_70, %c0_71] : memref<64x128xf32, #tpu.memory_space<vmem>>, vector<8x128xf32>
    tpu.vector_store %arg11[%c40_70, %c0_71], %195 {strides = array<i32>} : memref<64x128xf32, #tpu.memory_space<vmem>>, vector<8x128xf32>,
    %c48 = arith.constant 48 : index
    %c0_72 = arith.constant 0 : index
    %197 = vector.load %arg10[%c48, %c0_72] : memref<64x512xf32, #tpu.memory_space<vmem>>, vector<8x512xf32>
    %c0_73 = arith.constant 0 : index
    %c0_74 = arith.constant 0 : index
    %c0_75 = arith.constant 0 : index
    %198 = vector.load %arg3[%c0_73, %c0_74, %c0_75] : memref<2x128x512xf32, #tpu.memory_space<vmem>>, vector<1x128x512xf32>
    %199 = vector.shape_cast %198 : vector<1x128x512xf32> to vector<128x512xf32>
    %cst_76 = arith.constant dense<0.000000e+00> : vector<8x512xf32>
    %200 = tpu.matmul %195, %199, %cst_76 {dimension_numbers = #tpu.dot_dimension_numbers<[1], [0], [0], [1], [0, 0, 1, 1], [], []>} : vector<8x128xf32>, vector<128x512xf32>, vector<8x512xf32> -> vector<8x512xf32>
    %201 = arith.addf %197, %200 : vector<8x512xf32>
    %202 = vector.extract_strided_slice %201 {offsets = [0, 0], sizes = [8, 128], strides = [1, 1]} : vector<8x512xf32> to vector<8x128xf32>
    %203 = arith.negf %202 : vector<8x128xf32>
    %204 = math.exp %203 : vector<8x128xf32>
    %cst_77 = arith.constant 1.000000e+00 : f32
    %205 = vector.broadcast %cst_77 : f32 to vector<8x128xf32>
    %206 = arith.addf %205, %204 : vector<8x128xf32>
    %207 = arith.divf %205, %206 : vector<8x128xf32>
    %208 = vector.extract_strided_slice %201 {offsets = [0, 128], sizes = [8, 128], strides = [1, 1]} : vector<8x512xf32> to vector<8x128xf32>
    %209 = arith.negf %208 : vector<8x128xf32>
    %210 = math.exp %209 : vector<8x128xf32>
    %cst_78 = arith.constant 1.000000e+00 : f32
    %211 = vector.broadcast %cst_78 : f32 to vector<8x128xf32>
    %212 = arith.addf %211, %210 : vector<8x128xf32>
    %213 = arith.divf %211, %212 : vector<8x128xf32>
    %214 = vector.extract_strided_slice %201 {offsets = [0, 256], sizes = [8, 128], strides = [1, 1]} : vector<8x512xf32> to vector<8x128xf32>
    %215 = math.tanh %214 : vector<8x128xf32>
    %216 = vector.extract_strided_slice %201 {offsets = [0, 384], sizes = [8, 128], strides = [1, 1]} : vector<8x512xf32> to vector<8x128xf32>
    %217 = arith.negf %216 : vector<8x128xf32>
    %218 = math.exp %217 : vector<8x128xf32>
    %cst_79 = arith.constant 1.000000e+00 : f32
    %219 = vector.broadcast %cst_79 : f32 to vector<8x128xf32>
    %220 = arith.addf %219, %218 : vector<8x128xf32>
    %221 = arith.divf %219, %220 : vector<8x128xf32>
    %222 = arith.mulf %213, %193 : vector<8x128xf32>
    %223 = arith.mulf %207, %215 : vector<8x128xf32>
    %224 = arith.addf %222, %223 : vector<8x128xf32>
    %225 = math.tanh %224 : vector<8x128xf32>
    %226 = arith.mulf %221, %225 : vector<8x128xf32>
    %c48_80 = arith.constant 48 : index
    %c0_81 = arith.constant 0 : index
    %227 = vector.load %arg11[%c48_80, %c0_81] : memref<64x128xf32, #tpu.memory_space<vmem>>, vector<8x128xf32>
    tpu.vector_store %arg11[%c48_80, %c0_81], %226 {strides = array<i32>} : memref<64x128xf32, #tpu.memory_space<vmem>>, vector<8x128xf32>,
    %c56 = arith.constant 56 : index
    %c0_82 = arith.constant 0 : index
    %228 = vector.load %arg10[%c56, %c0_82] : memref<64x512xf32, #tpu.memory_space<vmem>>, vector<8x512xf32>
    %c0_83 = arith.constant 0 : index
    %c0_84 = arith.constant 0 : index
    %c0_85 = arith.constant 0 : index
    %229 = vector.load %arg3[%c0_83, %c0_84, %c0_85] : memref<2x128x512xf32, #tpu.memory_space<vmem>>, vector<1x128x512xf32>
    %230 = vector.shape_cast %229 : vector<1x128x512xf32> to vector<128x512xf32>
    %cst_86 = arith.constant dense<0.000000e+00> : vector<8x512xf32>
    %231 = tpu.matmul %226, %230, %cst_86 {dimension_numbers = #tpu.dot_dimension_numbers<[1], [0], [0], [1], [0, 0, 1, 1], [], []>} : vector<8x128xf32>, vector<128x512xf32>, vector<8x512xf32> -> vector<8x512xf32>
    %232 = arith.addf %228, %231 : vector<8x512xf32>
    %233 = vector.extract_strided_slice %232 {offsets = [0, 0], sizes = [8, 128], strides = [1, 1]} : vector<8x512xf32> to vector<8x128xf32>
    %234 = arith.negf %233 : vector<8x128xf32>
    %235 = math.exp %234 : vector<8x128xf32>
    %cst_87 = arith.constant 1.000000e+00 : f32
    %236 = vector.broadcast %cst_87 : f32 to vector<8x128xf32>
    %237 = arith.addf %236, %235 : vector<8x128xf32>
    %238 = arith.divf %236, %237 : vector<8x128xf32>
    %239 = vector.extract_strided_slice %232 {offsets = [0, 128], sizes = [8, 128], strides = [1, 1]} : vector<8x512xf32> to vector<8x128xf32>
    %240 = arith.negf %239 : vector<8x128xf32>
    %241 = math.exp %240 : vector<8x128xf32>
    %cst_88 = arith.constant 1.000000e+00 : f32
    %242 = vector.broadcast %cst_88 : f32 to vector<8x128xf32>
    %243 = arith.addf %242, %241 : vector<8x128xf32>
    %244 = arith.divf %242, %243 : vector<8x128xf32>
    %245 = vector.extract_strided_slice %232 {offsets = [0, 256], sizes = [8, 128], strides = [1, 1]} : vector<8x512xf32> to vector<8x128xf32>
    %246 = math.tanh %245 : vector<8x128xf32>
    %247 = vector.extract_strided_slice %232 {offsets = [0, 384], sizes = [8, 128], strides = [1, 1]} : vector<8x512xf32> to vector<8x128xf32>
    %248 = arith.negf %247 : vector<8x128xf32>
    %249 = math.exp %248 : vector<8x128xf32>
    %cst_89 = arith.constant 1.000000e+00 : f32
    %250 = vector.broadcast %cst_89 : f32 to vector<8x128xf32>
    %251 = arith.addf %250, %249 : vector<8x128xf32>
    %252 = arith.divf %250, %251 : vector<8x128xf32>
    %253 = arith.mulf %244, %224 : vector<8x128xf32>
    %254 = arith.mulf %238, %246 : vector<8x128xf32>
    %255 = arith.addf %253, %254 : vector<8x128xf32>
    %256 = math.tanh %255 : vector<8x128xf32>
    %257 = arith.mulf %252, %256 : vector<8x128xf32>
    %c56_90 = arith.constant 56 : index
    %c0_91 = arith.constant 0 : index
    %258 = vector.load %arg11[%c56_90, %c0_91] : memref<64x128xf32, #tpu.memory_space<vmem>>, vector<8x128xf32>
    tpu.vector_store %arg11[%c56_90, %c0_91], %257 {strides = array<i32>} : memref<64x128xf32, #tpu.memory_space<vmem>>, vector<8x128xf32>,
    %c0_92 = arith.constant 0 : index
    %c0_93 = arith.constant 0 : index
    %c0_94 = arith.constant 0 : index
    %259 = vector.load %arg8[%c0_92, %c0_93, %c0_94] : memref<2x8x128xf32, #tpu.memory_space<vmem>>, vector<1x8x128xf32>
    %260 = vector.shape_cast %259 : vector<1x8x128xf32> to vector<8x128xf32>
    %261 = vector.shape_cast %257 : vector<8x128xf32> to vector<1x8x128xf32>
    tpu.vector_store %arg8[%c0_92, %c0_93, %c0_94], %261 {strides = array<i32>} : memref<2x8x128xf32, #tpu.memory_space<vmem>>, vector<1x8x128xf32>,
    %c0_95 = arith.constant 0 : index
    %c0_96 = arith.constant 0 : index
    %c0_97 = arith.constant 0 : index
    %262 = vector.load %arg9[%c0_95, %c0_96, %c0_97] : memref<2x8x128xf32, #tpu.memory_space<vmem>>, vector<1x8x128xf32>
    %263 = vector.shape_cast %262 : vector<1x8x128xf32> to vector<8x128xf32>
    %264 = vector.shape_cast %255 : vector<8x128xf32> to vector<1x8x128xf32>
    tpu.vector_store %arg9[%c0_95, %c0_96, %c0_97], %264 {strides = array<i32>} : memref<2x8x128xf32, #tpu.memory_space<vmem>>, vector<1x8x128xf32>,
    %c0_98 = arith.constant 0 : index
    %c0_99 = arith.constant 0 : index
    %265 = vector.load %arg11[%c0_98, %c0_99] : memref<64x128xf32, #tpu.memory_space<vmem>>, vector<64x128xf32>
    %c1 = arith.constant 1 : index
    %c0_100 = arith.constant 0 : index
    %c0_101 = arith.constant 0 : index
    %266 = vector.load %arg2[%c1, %c0_100, %c0_101] : memref<2x128x512xf32, #tpu.memory_space<vmem>>, vector<1x128x512xf32>
    %267 = vector.shape_cast %266 : vector<1x128x512xf32> to vector<128x512xf32>
    %cst_102 = arith.constant dense<0.000000e+00> : vector<64x512xf32>
    %268 = tpu.matmul %265, %267, %cst_102 {dimension_numbers = #tpu.dot_dimension_numbers<[1], [0], [0], [1], [0, 0, 1, 1], [], []>} : vector<64x128xf32>, vector<128x512xf32>, vector<64x512xf32> -> vector<64x512xf32>
    %c1_103 = arith.constant 1 : index
    %c0_104 = arith.constant 0 : index
    %c0_105 = arith.constant 0 : index
    %269 = vector.load %arg4[%c1_103, %c0_104, %c0_105] : memref<2x1x512xf32, #tpu.memory_space<vmem>>, vector<1x1x512xf32>
    %270 = vector.shape_cast %269 : vector<1x1x512xf32> to vector<1x512xf32>
    %271 = vector.broadcast %270 : vector<1x512xf32> to vector<64x512xf32>
    %272 = arith.addf %268, %271 : vector<64x512xf32>
    %c0_106 = arith.constant 0 : index
    %c0_107 = arith.constant 0 : index
    %273 = vector.load %arg10[%c0_106, %c0_107] : memref<64x512xf32, #tpu.memory_space<vmem>>, vector<64x512xf32>
    tpu.vector_store %arg10[%c0_106, %c0_107], %272 {strides = array<i32>} : memref<64x512xf32, #tpu.memory_space<vmem>>, vector<64x512xf32>,
    %cst_108 = arith.constant 0.000000e+00 : f32
    %274 = vector.broadcast %cst_108 : f32 to vector<8x128xf32>
    %cst_109 = arith.constant 0.000000e+00 : f32
    %275 = vector.broadcast %cst_109 : f32 to vector<8x128xf32>
    %c0_110 = arith.constant 0 : index
    %c0_111 = arith.constant 0 : index
    %276 = vector.load %arg10[%c0_110, %c0_111] : memref<64x512xf32, #tpu.memory_space<vmem>>, vector<8x512xf32>
    %c1_112 = arith.constant 1 : index
    %c0_113 = arith.constant 0 : index
    %c0_114 = arith.constant 0 : index
    %277 = vector.load %arg3[%c1_112, %c0_113, %c0_114] : memref<2x128x512xf32, #tpu.memory_space<vmem>>, vector<1x128x512xf32>
    %278 = vector.shape_cast %277 : vector<1x128x512xf32> to vector<128x512xf32>
    %cst_115 = arith.constant dense<0.000000e+00> : vector<8x512xf32>
    %279 = tpu.matmul %274, %278, %cst_115 {dimension_numbers = #tpu.dot_dimension_numbers<[1], [0], [0], [1], [0, 0, 1, 1], [], []>} : vector<8x128xf32>, vector<128x512xf32>, vector<8x512xf32> -> vector<8x512xf32>
    %280 = arith.addf %276, %279 : vector<8x512xf32>
    %281 = vector.extract_strided_slice %280 {offsets = [0, 0], sizes = [8, 128], strides = [1, 1]} : vector<8x512xf32> to vector<8x128xf32>
    %282 = arith.negf %281 : vector<8x128xf32>
    %283 = math.exp %282 : vector<8x128xf32>
    %cst_116 = arith.constant 1.000000e+00 : f32
    %284 = vector.broadcast %cst_116 : f32 to vector<8x128xf32>
    %285 = arith.addf %284, %283 : vector<8x128xf32>
    %286 = arith.divf %284, %285 : vector<8x128xf32>
    %287 = vector.extract_strided_slice %280 {offsets = [0, 128], sizes = [8, 128], strides = [1, 1]} : vector<8x512xf32> to vector<8x128xf32>
    %288 = arith.negf %287 : vector<8x128xf32>
    %289 = math.exp %288 : vector<8x128xf32>
    %cst_117 = arith.constant 1.000000e+00 : f32
    %290 = vector.broadcast %cst_117 : f32 to vector<8x128xf32>
    %291 = arith.addf %290, %289 : vector<8x128xf32>
    %292 = arith.divf %290, %291 : vector<8x128xf32>
    %293 = vector.extract_strided_slice %280 {offsets = [0, 256], sizes = [8, 128], strides = [1, 1]} : vector<8x512xf32> to vector<8x128xf32>
    %294 = math.tanh %293 : vector<8x128xf32>
    %295 = vector.extract_strided_slice %280 {offsets = [0, 384], sizes = [8, 128], strides = [1, 1]} : vector<8x512xf32> to vector<8x128xf32>
    %296 = arith.negf %295 : vector<8x128xf32>
    %297 = math.exp %296 : vector<8x128xf32>
    %cst_118 = arith.constant 1.000000e+00 : f32
    %298 = vector.broadcast %cst_118 : f32 to vector<8x128xf32>
    %299 = arith.addf %298, %297 : vector<8x128xf32>
    %300 = arith.divf %298, %299 : vector<8x128xf32>
    %301 = arith.mulf %292, %275 : vector<8x128xf32>
    %302 = arith.mulf %286, %294 : vector<8x128xf32>
    %303 = arith.addf %301, %302 : vector<8x128xf32>
    %304 = math.tanh %303 : vector<8x128xf32>
    %305 = arith.mulf %300, %304 : vector<8x128xf32>
    %c0_119 = arith.constant 0 : index
    %c0_120 = arith.constant 0 : index
    %306 = vector.load %arg11[%c0_119, %c0_120] : memref<64x128xf32, #tpu.memory_space<vmem>>, vector<8x128xf32>
    tpu.vector_store %arg11[%c0_119, %c0_120], %305 {strides = array<i32>} : memref<64x128xf32, #tpu.memory_space<vmem>>, vector<8x128xf32>,
    %c8_121 = arith.constant 8 : index
    %c0_122 = arith.constant 0 : index
    %307 = vector.load %arg10[%c8_121, %c0_122] : memref<64x512xf32, #tpu.memory_space<vmem>>, vector<8x512xf32>
    %c1_123 = arith.constant 1 : index
    %c0_124 = arith.constant 0 : index
    %c0_125 = arith.constant 0 : index
    %308 = vector.load %arg3[%c1_123, %c0_124, %c0_125] : memref<2x128x512xf32, #tpu.memory_space<vmem>>, vector<1x128x512xf32>
    %309 = vector.shape_cast %308 : vector<1x128x512xf32> to vector<128x512xf32>
    %cst_126 = arith.constant dense<0.000000e+00> : vector<8x512xf32>
    %310 = tpu.matmul %305, %309, %cst_126 {dimension_numbers = #tpu.dot_dimension_numbers<[1], [0], [0], [1], [0, 0, 1, 1], [], []>} : vector<8x128xf32>, vector<128x512xf32>, vector<8x512xf32> -> vector<8x512xf32>
    %311 = arith.addf %307, %310 : vector<8x512xf32>
    %312 = vector.extract_strided_slice %311 {offsets = [0, 0], sizes = [8, 128], strides = [1, 1]} : vector<8x512xf32> to vector<8x128xf32>
    %313 = arith.negf %312 : vector<8x128xf32>
    %314 = math.exp %313 : vector<8x128xf32>
    %cst_127 = arith.constant 1.000000e+00 : f32
    %315 = vector.broadcast %cst_127 : f32 to vector<8x128xf32>
    %316 = arith.addf %315, %314 : vector<8x128xf32>
    %317 = arith.divf %315, %316 : vector<8x128xf32>
    %318 = vector.extract_strided_slice %311 {offsets = [0, 128], sizes = [8, 128], strides = [1, 1]} : vector<8x512xf32> to vector<8x128xf32>
    %319 = arith.negf %318 : vector<8x128xf32>
    %320 = math.exp %319 : vector<8x128xf32>
    %cst_128 = arith.constant 1.000000e+00 : f32
    %321 = vector.broadcast %cst_128 : f32 to vector<8x128xf32>
    %322 = arith.addf %321, %320 : vector<8x128xf32>
    %323 = arith.divf %321, %322 : vector<8x128xf32>
    %324 = vector.extract_strided_slice %311 {offsets = [0, 256], sizes = [8, 128], strides = [1, 1]} : vector<8x512xf32> to vector<8x128xf32>
    %325 = math.tanh %324 : vector<8x128xf32>
    %326 = vector.extract_strided_slice %311 {offsets = [0, 384], sizes = [8, 128], strides = [1, 1]} : vector<8x512xf32> to vector<8x128xf32>
    %327 = arith.negf %326 : vector<8x128xf32>
    %328 = math.exp %327 : vector<8x128xf32>
    %cst_129 = arith.constant 1.000000e+00 : f32
    %329 = vector.broadcast %cst_129 : f32 to vector<8x128xf32>
    %330 = arith.addf %329, %328 : vector<8x128xf32>
    %331 = arith.divf %329, %330 : vector<8x128xf32>
    %332 = arith.mulf %323, %303 : vector<8x128xf32>
    %333 = arith.mulf %317, %325 : vector<8x128xf32>
    %334 = arith.addf %332, %333 : vector<8x128xf32>
    %335 = math.tanh %334 : vector<8x128xf32>
    %336 = arith.mulf %331, %335 : vector<8x128xf32>
    %c8_130 = arith.constant 8 : index
    %c0_131 = arith.constant 0 : index
    %337 = vector.load %arg11[%c8_130, %c0_131] : memref<64x128xf32, #tpu.memory_space<vmem>>, vector<8x128xf32>
    tpu.vector_store %arg11[%c8_130, %c0_131], %336 {strides = array<i32>} : memref<64x128xf32, #tpu.memory_space<vmem>>, vector<8x128xf32>,
    %c16_132 = arith.constant 16 : index
    %c0_133 = arith.constant 0 : index
    %338 = vector.load %arg10[%c16_132, %c0_133] : memref<64x512xf32, #tpu.memory_space<vmem>>, vector<8x512xf32>
    %c1_134 = arith.constant 1 : index
    %c0_135 = arith.constant 0 : index
    %c0_136 = arith.constant 0 : index
    %339 = vector.load %arg3[%c1_134, %c0_135, %c0_136] : memref<2x128x512xf32, #tpu.memory_space<vmem>>, vector<1x128x512xf32>
    %340 = vector.shape_cast %339 : vector<1x128x512xf32> to vector<128x512xf32>
    %cst_137 = arith.constant dense<0.000000e+00> : vector<8x512xf32>
    %341 = tpu.matmul %336, %340, %cst_137 {dimension_numbers = #tpu.dot_dimension_numbers<[1], [0], [0], [1], [0, 0, 1, 1], [], []>} : vector<8x128xf32>, vector<128x512xf32>, vector<8x512xf32> -> vector<8x512xf32>
    %342 = arith.addf %338, %341 : vector<8x512xf32>
    %343 = vector.extract_strided_slice %342 {offsets = [0, 0], sizes = [8, 128], strides = [1, 1]} : vector<8x512xf32> to vector<8x128xf32>
    %344 = arith.negf %343 : vector<8x128xf32>
    %345 = math.exp %344 : vector<8x128xf32>
    %cst_138 = arith.constant 1.000000e+00 : f32
    %346 = vector.broadcast %cst_138 : f32 to vector<8x128xf32>
    %347 = arith.addf %346, %345 : vector<8x128xf32>
    %348 = arith.divf %346, %347 : vector<8x128xf32>
    %349 = vector.extract_strided_slice %342 {offsets = [0, 128], sizes = [8, 128], strides = [1, 1]} : vector<8x512xf32> to vector<8x128xf32>
    %350 = arith.negf %349 : vector<8x128xf32>
    %351 = math.exp %350 : vector<8x128xf32>
    %cst_139 = arith.constant 1.000000e+00 : f32
    %352 = vector.broadcast %cst_139 : f32 to vector<8x128xf32>
    %353 = arith.addf %352, %351 : vector<8x128xf32>
    %354 = arith.divf %352, %353 : vector<8x128xf32>
    %355 = vector.extract_strided_slice %342 {offsets = [0, 256], sizes = [8, 128], strides = [1, 1]} : vector<8x512xf32> to vector<8x128xf32>
    %356 = math.tanh %355 : vector<8x128xf32>
    %357 = vector.extract_strided_slice %342 {offsets = [0, 384], sizes = [8, 128], strides = [1, 1]} : vector<8x512xf32> to vector<8x128xf32>
    %358 = arith.negf %357 : vector<8x128xf32>
    %359 = math.exp %358 : vector<8x128xf32>
    %cst_140 = arith.constant 1.000000e+00 : f32
    %360 = vector.broadcast %cst_140 : f32 to vector<8x128xf32>
    %361 = arith.addf %360, %359 : vector<8x128xf32>
    %362 = arith.divf %360, %361 : vector<8x128xf32>
    %363 = arith.mulf %354, %334 : vector<8x128xf32>
    %364 = arith.mulf %348, %356 : vector<8x128xf32>
    %365 = arith.addf %363, %364 : vector<8x128xf32>
    %366 = math.tanh %365 : vector<8x128xf32>
    %367 = arith.mulf %362, %366 : vector<8x128xf32>
    %c16_141 = arith.constant 16 : index
    %c0_142 = arith.constant 0 : index
    %368 = vector.load %arg11[%c16_141, %c0_142] : memref<64x128xf32, #tpu.memory_space<vmem>>, vector<8x128xf32>
    tpu.vector_store %arg11[%c16_141, %c0_142], %367 {strides = array<i32>} : memref<64x128xf32, #tpu.memory_space<vmem>>, vector<8x128xf32>,
    %c24_143 = arith.constant 24 : index
    %c0_144 = arith.constant 0 : index
    %369 = vector.load %arg10[%c24_143, %c0_144] : memref<64x512xf32, #tpu.memory_space<vmem>>, vector<8x512xf32>
    %c1_145 = arith.constant 1 : index
    %c0_146 = arith.constant 0 : index
    %c0_147 = arith.constant 0 : index
    %370 = vector.load %arg3[%c1_145, %c0_146, %c0_147] : memref<2x128x512xf32, #tpu.memory_space<vmem>>, vector<1x128x512xf32>
    %371 = vector.shape_cast %370 : vector<1x128x512xf32> to vector<128x512xf32>
    %cst_148 = arith.constant dense<0.000000e+00> : vector<8x512xf32>
    %372 = tpu.matmul %367, %371, %cst_148 {dimension_numbers = #tpu.dot_dimension_numbers<[1], [0], [0], [1], [0, 0, 1, 1], [], []>} : vector<8x128xf32>, vector<128x512xf32>, vector<8x512xf32> -> vector<8x512xf32>
    %373 = arith.addf %369, %372 : vector<8x512xf32>
    %374 = vector.extract_strided_slice %373 {offsets = [0, 0], sizes = [8, 128], strides = [1, 1]} : vector<8x512xf32> to vector<8x128xf32>
    %375 = arith.negf %374 : vector<8x128xf32>
    %376 = math.exp %375 : vector<8x128xf32>
    %cst_149 = arith.constant 1.000000e+00 : f32
    %377 = vector.broadcast %cst_149 : f32 to vector<8x128xf32>
    %378 = arith.addf %377, %376 : vector<8x128xf32>
    %379 = arith.divf %377, %378 : vector<8x128xf32>
    %380 = vector.extract_strided_slice %373 {offsets = [0, 128], sizes = [8, 128], strides = [1, 1]} : vector<8x512xf32> to vector<8x128xf32>
    %381 = arith.negf %380 : vector<8x128xf32>
    %382 = math.exp %381 : vector<8x128xf32>
    %cst_150 = arith.constant 1.000000e+00 : f32
    %383 = vector.broadcast %cst_150 : f32 to vector<8x128xf32>
    %384 = arith.addf %383, %382 : vector<8x128xf32>
    %385 = arith.divf %383, %384 : vector<8x128xf32>
    %386 = vector.extract_strided_slice %373 {offsets = [0, 256], sizes = [8, 128], strides = [1, 1]} : vector<8x512xf32> to vector<8x128xf32>
    %387 = math.tanh %386 : vector<8x128xf32>
    %388 = vector.extract_strided_slice %373 {offsets = [0, 384], sizes = [8, 128], strides = [1, 1]} : vector<8x512xf32> to vector<8x128xf32>
    %389 = arith.negf %388 : vector<8x128xf32>
    %390 = math.exp %389 : vector<8x128xf32>
    %cst_151 = arith.constant 1.000000e+00 : f32
    %391 = vector.broadcast %cst_151 : f32 to vector<8x128xf32>
    %392 = arith.addf %391, %390 : vector<8x128xf32>
    %393 = arith.divf %391, %392 : vector<8x128xf32>
    %394 = arith.mulf %385, %365 : vector<8x128xf32>
    %395 = arith.mulf %379, %387 : vector<8x128xf32>
    %396 = arith.addf %394, %395 : vector<8x128xf32>
    %397 = math.tanh %396 : vector<8x128xf32>
    %398 = arith.mulf %393, %397 : vector<8x128xf32>
    %c24_152 = arith.constant 24 : index
    %c0_153 = arith.constant 0 : index
    %399 = vector.load %arg11[%c24_152, %c0_153] : memref<64x128xf32, #tpu.memory_space<vmem>>, vector<8x128xf32>
    tpu.vector_store %arg11[%c24_152, %c0_153], %398 {strides = array<i32>} : memref<64x128xf32, #tpu.memory_space<vmem>>, vector<8x128xf32>,
    %c32_154 = arith.constant 32 : index
    %c0_155 = arith.constant 0 : index
    %400 = vector.load %arg10[%c32_154, %c0_155] : memref<64x512xf32, #tpu.memory_space<vmem>>, vector<8x512xf32>
    %c1_156 = arith.constant 1 : index
    %c0_157 = arith.constant 0 : index
    %c0_158 = arith.constant 0 : index
    %401 = vector.load %arg3[%c1_156, %c0_157, %c0_158] : memref<2x128x512xf32, #tpu.memory_space<vmem>>, vector<1x128x512xf32>
    %402 = vector.shape_cast %401 : vector<1x128x512xf32> to vector<128x512xf32>
    %cst_159 = arith.constant dense<0.000000e+00> : vector<8x512xf32>
    %403 = tpu.matmul %398, %402, %cst_159 {dimension_numbers = #tpu.dot_dimension_numbers<[1], [0], [0], [1], [0, 0, 1, 1], [], []>} : vector<8x128xf32>, vector<128x512xf32>, vector<8x512xf32> -> vector<8x512xf32>
    %404 = arith.addf %400, %403 : vector<8x512xf32>
    %405 = vector.extract_strided_slice %404 {offsets = [0, 0], sizes = [8, 128], strides = [1, 1]} : vector<8x512xf32> to vector<8x128xf32>
    %406 = arith.negf %405 : vector<8x128xf32>
    %407 = math.exp %406 : vector<8x128xf32>
    %cst_160 = arith.constant 1.000000e+00 : f32
    %408 = vector.broadcast %cst_160 : f32 to vector<8x128xf32>
    %409 = arith.addf %408, %407 : vector<8x128xf32>
    %410 = arith.divf %408, %409 : vector<8x128xf32>
    %411 = vector.extract_strided_slice %404 {offsets = [0, 128], sizes = [8, 128], strides = [1, 1]} : vector<8x512xf32> to vector<8x128xf32>
    %412 = arith.negf %411 : vector<8x128xf32>
    %413 = math.exp %412 : vector<8x128xf32>
    %cst_161 = arith.constant 1.000000e+00 : f32
    %414 = vector.broadcast %cst_161 : f32 to vector<8x128xf32>
    %415 = arith.addf %414, %413 : vector<8x128xf32>
    %416 = arith.divf %414, %415 : vector<8x128xf32>
    %417 = vector.extract_strided_slice %404 {offsets = [0, 256], sizes = [8, 128], strides = [1, 1]} : vector<8x512xf32> to vector<8x128xf32>
    %418 = math.tanh %417 : vector<8x128xf32>
    %419 = vector.extract_strided_slice %404 {offsets = [0, 384], sizes = [8, 128], strides = [1, 1]} : vector<8x512xf32> to vector<8x128xf32>
    %420 = arith.negf %419 : vector<8x128xf32>
    %421 = math.exp %420 : vector<8x128xf32>
    %cst_162 = arith.constant 1.000000e+00 : f32
    %422 = vector.broadcast %cst_162 : f32 to vector<8x128xf32>
    %423 = arith.addf %422, %421 : vector<8x128xf32>
    %424 = arith.divf %422, %423 : vector<8x128xf32>
    %425 = arith.mulf %416, %396 : vector<8x128xf32>
    %426 = arith.mulf %410, %418 : vector<8x128xf32>
    %427 = arith.addf %425, %426 : vector<8x128xf32>
    %428 = math.tanh %427 : vector<8x128xf32>
    %429 = arith.mulf %424, %428 : vector<8x128xf32>
    %c32_163 = arith.constant 32 : index
    %c0_164 = arith.constant 0 : index
    %430 = vector.load %arg11[%c32_163, %c0_164] : memref<64x128xf32, #tpu.memory_space<vmem>>, vector<8x128xf32>
    tpu.vector_store %arg11[%c32_163, %c0_164], %429 {strides = array<i32>} : memref<64x128xf32, #tpu.memory_space<vmem>>, vector<8x128xf32>,
    %c40_165 = arith.constant 40 : index
    %c0_166 = arith.constant 0 : index
    %431 = vector.load %arg10[%c40_165, %c0_166] : memref<64x512xf32, #tpu.memory_space<vmem>>, vector<8x512xf32>
    %c1_167 = arith.constant 1 : index
    %c0_168 = arith.constant 0 : index
    %c0_169 = arith.constant 0 : index
    %432 = vector.load %arg3[%c1_167, %c0_168, %c0_169] : memref<2x128x512xf32, #tpu.memory_space<vmem>>, vector<1x128x512xf32>
    %433 = vector.shape_cast %432 : vector<1x128x512xf32> to vector<128x512xf32>
    %cst_170 = arith.constant dense<0.000000e+00> : vector<8x512xf32>
    %434 = tpu.matmul %429, %433, %cst_170 {dimension_numbers = #tpu.dot_dimension_numbers<[1], [0], [0], [1], [0, 0, 1, 1], [], []>} : vector<8x128xf32>, vector<128x512xf32>, vector<8x512xf32> -> vector<8x512xf32>
    %435 = arith.addf %431, %434 : vector<8x512xf32>
    %436 = vector.extract_strided_slice %435 {offsets = [0, 0], sizes = [8, 128], strides = [1, 1]} : vector<8x512xf32> to vector<8x128xf32>
    %437 = arith.negf %436 : vector<8x128xf32>
    %438 = math.exp %437 : vector<8x128xf32>
    %cst_171 = arith.constant 1.000000e+00 : f32
    %439 = vector.broadcast %cst_171 : f32 to vector<8x128xf32>
    %440 = arith.addf %439, %438 : vector<8x128xf32>
    %441 = arith.divf %439, %440 : vector<8x128xf32>
    %442 = vector.extract_strided_slice %435 {offsets = [0, 128], sizes = [8, 128], strides = [1, 1]} : vector<8x512xf32> to vector<8x128xf32>
    %443 = arith.negf %442 : vector<8x128xf32>
    %444 = math.exp %443 : vector<8x128xf32>
    %cst_172 = arith.constant 1.000000e+00 : f32
    %445 = vector.broadcast %cst_172 : f32 to vector<8x128xf32>
    %446 = arith.addf %445, %444 : vector<8x128xf32>
    %447 = arith.divf %445, %446 : vector<8x128xf32>
    %448 = vector.extract_strided_slice %435 {offsets = [0, 256], sizes = [8, 128], strides = [1, 1]} : vector<8x512xf32> to vector<8x128xf32>
    %449 = math.tanh %448 : vector<8x128xf32>
    %450 = vector.extract_strided_slice %435 {offsets = [0, 384], sizes = [8, 128], strides = [1, 1]} : vector<8x512xf32> to vector<8x128xf32>
    %451 = arith.negf %450 : vector<8x128xf32>
    %452 = math.exp %451 : vector<8x128xf32>
    %cst_173 = arith.constant 1.000000e+00 : f32
    %453 = vector.broadcast %cst_173 : f32 to vector<8x128xf32>
    %454 = arith.addf %453, %452 : vector<8x128xf32>
    %455 = arith.divf %453, %454 : vector<8x128xf32>
    %456 = arith.mulf %447, %427 : vector<8x128xf32>
    %457 = arith.mulf %441, %449 : vector<8x128xf32>
    %458 = arith.addf %456, %457 : vector<8x128xf32>
    %459 = math.tanh %458 : vector<8x128xf32>
    %460 = arith.mulf %455, %459 : vector<8x128xf32>
    %c40_174 = arith.constant 40 : index
    %c0_175 = arith.constant 0 : index
    %461 = vector.load %arg11[%c40_174, %c0_175] : memref<64x128xf32, #tpu.memory_space<vmem>>, vector<8x128xf32>
    tpu.vector_store %arg11[%c40_174, %c0_175], %460 {strides = array<i32>} : memref<64x128xf32, #tpu.memory_space<vmem>>, vector<8x128xf32>,
    %c48_176 = arith.constant 48 : index
    %c0_177 = arith.constant 0 : index
    %462 = vector.load %arg10[%c48_176, %c0_177] : memref<64x512xf32, #tpu.memory_space<vmem>>, vector<8x512xf32>
    %c1_178 = arith.constant 1 : index
    %c0_179 = arith.constant 0 : index
    %c0_180 = arith.constant 0 : index
    %463 = vector.load %arg3[%c1_178, %c0_179, %c0_180] : memref<2x128x512xf32, #tpu.memory_space<vmem>>, vector<1x128x512xf32>
    %464 = vector.shape_cast %463 : vector<1x128x512xf32> to vector<128x512xf32>
    %cst_181 = arith.constant dense<0.000000e+00> : vector<8x512xf32>
    %465 = tpu.matmul %460, %464, %cst_181 {dimension_numbers = #tpu.dot_dimension_numbers<[1], [0], [0], [1], [0, 0, 1, 1], [], []>} : vector<8x128xf32>, vector<128x512xf32>, vector<8x512xf32> -> vector<8x512xf32>
    %466 = arith.addf %462, %465 : vector<8x512xf32>
    %467 = vector.extract_strided_slice %466 {offsets = [0, 0], sizes = [8, 128], strides = [1, 1]} : vector<8x512xf32> to vector<8x128xf32>
    %468 = arith.negf %467 : vector<8x128xf32>
    %469 = math.exp %468 : vector<8x128xf32>
    %cst_182 = arith.constant 1.000000e+00 : f32
    %470 = vector.broadcast %cst_182 : f32 to vector<8x128xf32>
    %471 = arith.addf %470, %469 : vector<8x128xf32>
    %472 = arith.divf %470, %471 : vector<8x128xf32>
    %473 = vector.extract_strided_slice %466 {offsets = [0, 128], sizes = [8, 128], strides = [1, 1]} : vector<8x512xf32> to vector<8x128xf32>
    %474 = arith.negf %473 : vector<8x128xf32>
    %475 = math.exp %474 : vector<8x128xf32>
    %cst_183 = arith.constant 1.000000e+00 : f32
    %476 = vector.broadcast %cst_183 : f32 to vector<8x128xf32>
    %477 = arith.addf %476, %475 : vector<8x128xf32>
    %478 = arith.divf %476, %477 : vector<8x128xf32>
    %479 = vector.extract_strided_slice %466 {offsets = [0, 256], sizes = [8, 128], strides = [1, 1]} : vector<8x512xf32> to vector<8x128xf32>
    %480 = math.tanh %479 : vector<8x128xf32>
    %481 = vector.extract_strided_slice %466 {offsets = [0, 384], sizes = [8, 128], strides = [1, 1]} : vector<8x512xf32> to vector<8x128xf32>
    %482 = arith.negf %481 : vector<8x128xf32>
    %483 = math.exp %482 : vector<8x128xf32>
    %cst_184 = arith.constant 1.000000e+00 : f32
    %484 = vector.broadcast %cst_184 : f32 to vector<8x128xf32>
    %485 = arith.addf %484, %483 : vector<8x128xf32>
    %486 = arith.divf %484, %485 : vector<8x128xf32>
    %487 = arith.mulf %478, %458 : vector<8x128xf32>
    %488 = arith.mulf %472, %480 : vector<8x128xf32>
    %489 = arith.addf %487, %488 : vector<8x128xf32>
    %490 = math.tanh %489 : vector<8x128xf32>
    %491 = arith.mulf %486, %490 : vector<8x128xf32>
    %c48_185 = arith.constant 48 : index
    %c0_186 = arith.constant 0 : index
    %492 = vector.load %arg11[%c48_185, %c0_186] : memref<64x128xf32, #tpu.memory_space<vmem>>, vector<8x128xf32>
    tpu.vector_store %arg11[%c48_185, %c0_186], %491 {strides = array<i32>} : memref<64x128xf32, #tpu.memory_space<vmem>>, vector<8x128xf32>,
    %c56_187 = arith.constant 56 : index
    %c0_188 = arith.constant 0 : index
    %493 = vector.load %arg10[%c56_187, %c0_188] : memref<64x512xf32, #tpu.memory_space<vmem>>, vector<8x512xf32>
    %c1_189 = arith.constant 1 : index
    %c0_190 = arith.constant 0 : index
    %c0_191 = arith.constant 0 : index
    %494 = vector.load %arg3[%c1_189, %c0_190, %c0_191] : memref<2x128x512xf32, #tpu.memory_space<vmem>>, vector<1x128x512xf32>
    %495 = vector.shape_cast %494 : vector<1x128x512xf32> to vector<128x512xf32>
    %cst_192 = arith.constant dense<0.000000e+00> : vector<8x512xf32>
    %496 = tpu.matmul %491, %495, %cst_192 {dimension_numbers = #tpu.dot_dimension_numbers<[1], [0], [0], [1], [0, 0, 1, 1], [], []>} : vector<8x128xf32>, vector<128x512xf32>, vector<8x512xf32> -> vector<8x512xf32>
    %497 = arith.addf %493, %496 : vector<8x512xf32>
    %498 = vector.extract_strided_slice %497 {offsets = [0, 0], sizes = [8, 128], strides = [1, 1]} : vector<8x512xf32> to vector<8x128xf32>
    %499 = arith.negf %498 : vector<8x128xf32>
    %500 = math.exp %499 : vector<8x128xf32>
    %cst_193 = arith.constant 1.000000e+00 : f32
    %501 = vector.broadcast %cst_193 : f32 to vector<8x128xf32>
    %502 = arith.addf %501, %500 : vector<8x128xf32>
    %503 = arith.divf %501, %502 : vector<8x128xf32>
    %504 = vector.extract_strided_slice %497 {offsets = [0, 128], sizes = [8, 128], strides = [1, 1]} : vector<8x512xf32> to vector<8x128xf32>
    %505 = arith.negf %504 : vector<8x128xf32>
    %506 = math.exp %505 : vector<8x128xf32>
    %cst_194 = arith.constant 1.000000e+00 : f32
    %507 = vector.broadcast %cst_194 : f32 to vector<8x128xf32>
    %508 = arith.addf %507, %506 : vector<8x128xf32>
    %509 = arith.divf %507, %508 : vector<8x128xf32>
    %510 = vector.extract_strided_slice %497 {offsets = [0, 256], sizes = [8, 128], strides = [1, 1]} : vector<8x512xf32> to vector<8x128xf32>
    %511 = math.tanh %510 : vector<8x128xf32>
    %512 = vector.extract_strided_slice %497 {offsets = [0, 384], sizes = [8, 128], strides = [1, 1]} : vector<8x512xf32> to vector<8x128xf32>
    %513 = arith.negf %512 : vector<8x128xf32>
    %514 = math.exp %513 : vector<8x128xf32>
    %cst_195 = arith.constant 1.000000e+00 : f32
    %515 = vector.broadcast %cst_195 : f32 to vector<8x128xf32>
    %516 = arith.addf %515, %514 : vector<8x128xf32>
    %517 = arith.divf %515, %516 : vector<8x128xf32>
    %518 = arith.mulf %509, %489 : vector<8x128xf32>
    %519 = arith.mulf %503, %511 : vector<8x128xf32>
    %520 = arith.addf %518, %519 : vector<8x128xf32>
    %521 = math.tanh %520 : vector<8x128xf32>
    %522 = arith.mulf %517, %521 : vector<8x128xf32>
    %c56_196 = arith.constant 56 : index
    %c0_197 = arith.constant 0 : index
    %523 = vector.load %arg11[%c56_196, %c0_197] : memref<64x128xf32, #tpu.memory_space<vmem>>, vector<8x128xf32>
    tpu.vector_store %arg11[%c56_196, %c0_197], %522 {strides = array<i32>} : memref<64x128xf32, #tpu.memory_space<vmem>>, vector<8x128xf32>,
    %c1_198 = arith.constant 1 : index
    %c0_199 = arith.constant 0 : index
    %c0_200 = arith.constant 0 : index
    %524 = vector.load %arg8[%c1_198, %c0_199, %c0_200] : memref<2x8x128xf32, #tpu.memory_space<vmem>>, vector<1x8x128xf32>
    %525 = vector.shape_cast %524 : vector<1x8x128xf32> to vector<8x128xf32>
    %526 = vector.shape_cast %522 : vector<8x128xf32> to vector<1x8x128xf32>
    tpu.vector_store %arg8[%c1_198, %c0_199, %c0_200], %526 {strides = array<i32>} : memref<2x8x128xf32, #tpu.memory_space<vmem>>, vector<1x8x128xf32>,
    %c1_201 = arith.constant 1 : index
    %c0_202 = arith.constant 0 : index
    %c0_203 = arith.constant 0 : index
    %527 = vector.load %arg9[%c1_201, %c0_202, %c0_203] : memref<2x8x128xf32, #tpu.memory_space<vmem>>, vector<1x8x128xf32>
    %528 = vector.shape_cast %527 : vector<1x8x128xf32> to vector<8x128xf32>
    %529 = vector.shape_cast %520 : vector<8x128xf32> to vector<1x8x128xf32>
    tpu.vector_store %arg9[%c1_201, %c0_202, %c0_203], %529 {strides = array<i32>} : memref<2x8x128xf32, #tpu.memory_space<vmem>>, vector<1x8x128xf32>,
    %c0_204 = arith.constant 0 : index
    %c0_205 = arith.constant 0 : index
    %530 = vector.load %arg11[%c0_204, %c0_205] : memref<64x128xf32, #tpu.memory_space<vmem>>, vector<64x128xf32>
    %c0_206 = arith.constant 0 : index
    %c0_207 = arith.constant 0 : index
    %531 = vector.load %arg5[%c0_206, %c0_207] : memref<1x128xf32, #tpu.memory_space<vmem>>, vector<1x128xf32>
    %532 = vector.broadcast %531 : vector<1x128xf32> to vector<64x128xf32>
    %533 = arith.mulf %530, %532 : vector<64x128xf32>
    %cst_208 = arith.constant dense<0.000000e+00> : vector<64xf32>
    %534 = vector.multi_reduction <add>, %533, %cst_208 [1] : vector<64x128xf32> to vector<64xf32>
    %535 = vector.shape_cast %534 : vector<64xf32> to vector<64x1xf32>
    %c0_209 = arith.constant 0 : index
    %c0_210 = arith.constant 0 : index
    %536 = vector.load %arg6[%c0_209, %c0_210] : memref<1x1xf32, #tpu.memory_space<vmem>>, vector<1x1xf32>
    %537 = vector.broadcast %536 : vector<1x1xf32> to vector<64x1xf32>
    %538 = arith.addf %535, %537 : vector<64x1xf32>
    %c0_211 = arith.constant 0 : index
    %c0_212 = arith.constant 0 : index
    %539 = vector.load %arg7[%c0_211, %c0_212] : memref<64x1xf32, #tpu.memory_space<vmem>>, vector<64x1xf32>
    tpu.vector_store %arg7[%c0_211, %c0_212], %538 {strides = array<i32>} : memref<64x1xf32, #tpu.memory_space<vmem>>, vector<64x1xf32>,
    return
  }
  func.func @transform_0(%arg0: i32) -> (i32, i32) {
    %c0_i32 = arith.constant 0 : i32
    %c0_i32_0 = arith.constant 0 : i32
    %c0_i32_1 = arith.constant 0 : i32
    return %c0_i32, %c0_i32_0 : i32, i32
  }
  func.func @transform_1(%arg0: i32) -> (i32, i32, i32) {
    %c0_i32 = arith.constant 0 : i32
    %c0_i32_0 = arith.constant 0 : i32
    %c0_i32_1 = arith.constant 0 : i32
    %c0_i32_2 = arith.constant 0 : i32
    return %c0_i32, %c0_i32_0, %c0_i32_1 : i32, i32, i32
  }
  func.func @transform_2(%arg0: i32) -> (i32, i32, i32) {
    %c0_i32 = arith.constant 0 : i32
    %c0_i32_0 = arith.constant 0 : i32
    %c0_i32_1 = arith.constant 0 : i32
    %c0_i32_2 = arith.constant 0 : i32
    return %c0_i32, %c0_i32_0, %c0_i32_1 : i32, i32, i32
  }
  func.func @transform_3(%arg0: i32) -> (i32, i32, i32) {
    %c0_i32 = arith.constant 0 : i32
    %c0_i32_0 = arith.constant 0 : i32
    %c0_i32_1 = arith.constant 0 : i32
    %c0_i32_2 = arith.constant 0 : i32
    return %c0_i32, %c0_i32_0, %c0_i32_1 : i32, i32, i32
  }
  func.func @transform_4(%arg0: i32) -> (i32, i32) {
    %c0_i32 = arith.constant 0 : i32
    %c0_i32_0 = arith.constant 0 : i32
    %c0_i32_1 = arith.constant 0 : i32
    return %c0_i32, %c0_i32_0 : i32, i32
  }
  func.func @transform_5(%arg0: i32) -> (i32, i32) {
    %c0_i32 = arith.constant 0 : i32
    %c0_i32_0 = arith.constant 0 : i32
    %c0_i32_1 = arith.constant 0 : i32
    return %c0_i32, %c0_i32_0 : i32, i32
  }
  func.func @transform_6(%arg0: i32) -> (i32, i32) {
    %c0_i32 = arith.constant 0 : i32
    %c0_i32_0 = arith.constant 0 : i32
    %c0_i32_1 = arith.constant 0 : i32
    return %c0_i32, %c0_i32_0 : i32, i32
  }
  func.func @transform_7(%arg0: i32) -> (i32, i32, i32) {
    %c0_i32 = arith.constant 0 : i32
    %c0_i32_0 = arith.constant 0 : i32
    %c0_i32_1 = arith.constant 0 : i32
    %c0_i32_2 = arith.constant 0 : i32
    return %c0_i32, %c0_i32_0, %c0_i32_1 : i32, i32, i32
  }
  func.func @transform_8(%arg0: i32) -> (i32, i32, i32) {
    %c0_i32 = arith.constant 0 : i32
    %c0_i32_0 = arith.constant 0 : i32
    %c0_i32_1 = arith.constant 0 : i32
    %c0_i32_2 = arith.constant 0 : i32
    return %c0_i32, %c0_i32_0, %c0_i32_1 : i32, i32, i32
  }
}

</mosaic_0001>

<bundles_post_ra>
// kernel: tpu_custom_call.1
= control target key start
LH: loop header
LB: loop body
LE: loop exit
PB: predicated region body
PF: predicated region fallthrough
CT: control target
= control target key end

     0   :  { %s7654_s0 = inlined_call_operand.hbm [shape: f32[64,128], index: 0, kind: input, shape index: {}]   ;;  %s7655_s1 = inlined_call_operand.hbm [shape: f32[2,128,512], index: 1, kind: input, shape index: {}]   ;;  %s7656_s2 = inlined_call_operand.hbm [shape: f32[2,128,512], index: 2, kind: input, shape index: {}]   ;;  %s7657_s3 = inlined_call_operand.vmem [shape: f32[2,1,512], index: 3, kind: input, shape index: {}]   ;;  %s7658_s4 = inlined_call_operand.vmem [shape: f32[1,128], index: 4, kind: input, shape index: {}]   ;;  %s7659_s5 = inlined_call_operand.<no memory space> [shape: f32[1,1], index: 5, kind: input, shape index: {}]   ;;  %s7660_s6 = inlined_call_operand.vmem [shape: f32[64,1], index: 6, kind: output, shape index: {0}]   ;;  %s7661_s7 = inlined_call_operand.hbm [shape: f32[2,8,128], index: 7, kind: output, shape index: {1}]   ;;  %s7662_s8 = inlined_call_operand.hbm [shape: f32[2,8,128], index: 8, kind: output, shape index: {2}]  }
   0x1   :  { %v14_v0 = vstv %s7659_s5 }
   0x2   :  { %15 = vst [vmem:[#allocation4] sm:$0x1] %v14_v0 }
   0x3   :  { %16 = vsyncpa [#allocation6], 0 }
   0x4   :  { %17 = vsyncpa [#allocation9], 0 }
   0x5   :  { %18 = vsyncpa [#allocation7], 0 }
   0x6   :  { %19 = vsyncpa [#allocation13], 0  ;;  %s6426_s29 = smov [#allocation8]   ;;  %s6308_s11 = scalar_lea.hbm %s7655_s1, 16384 }
   0x7   :  { %s37_s30 = sshll.u32 %s6426_s29, 4  ;;  %p6309_p0 = scmp.ne.s32.totalorder %s7655_s1, %s6308_s11  ;;  %s38_s30 = int_to_ptr.vmem [resolvable:$true] %s37_s30 }
   0x8   :  { %p6312_p1 = scmp.lt.u32.totalorder %s6308_s11, %s7655_s1 }
   0xa   :  { %p6314_p2 = pnand %p6312_p1, %p6309_p0 }
   0xc   :  { %6317 = shalt.err (!%p6314_p2)
}
   0xd   :  { %s6318_s5 = scalar_lea.vmem %s38_s30, 16384  ;;  %p6323_p4 = scmp.lt.s32.totalorder %s38_s30, %s38_s30 }
   0xe   :  { %p6319_p3 = scmp.ne.s32.totalorder %s38_s30, %s6318_s5  ;;  %p6324_p5 = scmp.lt.s32.totalorder %s6318_s5, %s6318_s5 }
  0x10   :  { %p6325_p6 = por %p6324_p5, %p6323_p4 }
  0x12   :  { %p6326_p7 = pnand %p6325_p6, %p6319_p3 }
  0x14   :  { %6329 = shalt.err (!%p6326_p7)
}
  0x15   :  { %s6427_s16 = smov 512   ;;  %s6428_s17 = smov 32  }
  0x16   :  { %43 = dma.hbm_to_vmem [thread:$0]  %s7655_s1, 16384, %s38_s30, [#allocation9], %s6427_s16, %s6427_s16, %s6428_s17  }
  0x17   :  { %s6429_s20 = smov [#allocation5]   ;;  %s6330_s24 = scalar_lea.hbm %s7654_s0, 1024 }
  0x18   :  { %s25_s21 = sshll.u32 %s6429_s20, 4  ;;  %p6331_p8 = scmp.ne.s32.totalorder %s7654_s0, %s6330_s24  ;;  %s26_s21 = int_to_ptr.vmem [resolvable:$true] %s25_s21 }
  0x19   :  { %p6334_p9 = scmp.lt.u32.totalorder %s6330_s24, %s7654_s0 }
  0x1b   :  { %p6336_p10 = pnand %p6334_p9, %p6331_p8 }
  0x1d   :  { %6339 = shalt.err (!%p6336_p10)
}
  0x1e   :  { %s6340_s29 = scalar_lea.vmem %s26_s21, 1024  ;;  %p6345_p12 = scmp.lt.s32.totalorder %s26_s21, %s26_s21 }
  0x1f   :  { %p6341_p11 = scmp.ne.s32.totalorder %s26_s21, %s6340_s29  ;;  %p6346_p13 = scmp.lt.s32.totalorder %s6340_s29, %s6340_s29 }
  0x21   :  { %p6347_p0 = por %p6346_p13, %p6345_p12 }
  0x23   :  { %p6348_p1 = pnand %p6347_p0, %p6341_p11 }
  0x25   :  { %6351 = shalt.err (!%p6348_p1)
}
  0x26   :  { %s6430_s1 = smov 128   ;;  %s6431_s30 = smov 8  }
  0x27   :  { %31 = dma.hbm_to_vmem [thread:$0]  %s7654_s0, 1024, %s26_s21, [#allocation6], %s6430_s1, %s6430_s1, %s6431_s30  }
  0x28   :  { %s6432_s11 = smov [#allocation10]   ;;  %s6352_s15 = scalar_lea.hbm %s7656_s2, 16384 }
  0x29   :  { %s49_s12 = sshll.u32 %s6432_s11, 4  ;;  %p6353_p2 = scmp.ne.s32.totalorder %s7656_s2, %s6352_s15  ;;  %s50_s12 = int_to_ptr.vmem [resolvable:$true] %s49_s12 }
  0x2a   :  { %p6356_p3 = scmp.lt.u32.totalorder %s6352_s15, %s7656_s2 }
  0x2c   :  { %p6358_p4 = pnand %p6356_p3, %p6353_p2 }
  0x2e   :  { %6361 = shalt.err (!%p6358_p4)
}
  0x2f   :  { %s6362_s22 = scalar_lea.vmem %s50_s12, 16384  ;;  %p6367_p6 = scmp.lt.s32.totalorder %s50_s12, %s50_s12 }
  0x30   :  { %p6363_p5 = scmp.ne.s32.totalorder %s50_s12, %s6362_s22  ;;  %p6368_p7 = scmp.lt.s32.totalorder %s6362_s22, %s6362_s22 }
  0x32   :  { %p6369_p8 = por %p6368_p7, %p6367_p6 }
  0x34   :  { %p6370_p9 = pnand %p6369_p8, %p6363_p5 }
  0x36   :  { %6373 = shalt.err (!%p6370_p9)
}
  0x37   :  { %55 = dma.hbm_to_vmem [thread:$0]  %s7656_s2, 16384, %s50_s12, [#allocation9], %s6427_s16, %s6427_s16, %s6428_s17  }
  0x38   :  { %6418 = dma.done.wait [#allocation6], 1024  }
  0x39   :  { %6419 = vsyncadd [#allocation6], 4294966272 }
  0x3a   :  { %6420 = dma.done.wait [#allocation9], 32768  }
  0x3b   :  { %6421 = vsyncadd [#allocation9], 4294934528  ;;  %v6433_v1 = vmov 0.0   ;;  %v80_v2 = vld [vmem:[#allocation8 + $0x8] sm:$0xff]  ;;  %v82_v4 = vld [vmem:[#allocation8 + $0x18] sm:$0xff]  ;;  %vm4662_vm0 = vcmask 7168  }
  0x3c   :  { %229 = vmatprep.mubr.f32.mxu0 %v6433_v1  ;;  %342 = vmatprep.mubr.f32.mxu1 %v6433_v1  ;;  %v84_v3 = vld [vmem:[#allocation8 + $0x28] sm:$0xff]  ;;  %v86_v6 = vld [vmem:[#allocation8 + $0x38] sm:$0xff]  ;;  %v79_v7 = vld [vmem:[#allocation8] sm:$0xff]  ;;  %s6435_s0 = smov [#allocation12]  }
  0x3d   :  { %v4760_v5 = vpack.c.bf16 %v84_v3, %v80_v2  ;;  %v83_v8 = vld [vmem:[#allocation8 + $0x20] sm:$0xff]  ;;  %v4792_v9 = vpack.c.bf16 %v86_v6, %v82_v4  ;;  %v81_v11 = vld [vmem:[#allocation8 + $0x10] sm:$0xff]  ;;  %v88_v13 = vld [vmem:[#allocation8 + $0x48] sm:$0xff]  ;;  %s4690_s21 = sshll.u32 %s6435_s0, 4  ;;  %s7612_s21 = int_to_ptr.vmem [resolvable:$true] %s4690_s21 }
  0x3e   :  { %v4762_v10 = vpack.c.bf16 %v83_v8, %v79_v7  ;;  %v85_v12 = vld [vmem:[#allocation8 + $0x30] sm:$0xff]  ;;  %v92_v15 = vld [vmem:[#allocation8 + $0x68] sm:$0xff]  ;;  %v90_v16 = vld [vmem:[#allocation8 + $0x58] sm:$0xff] }
  0x3f   :  { %4761 = vmatprep.subr.bf16.mxu0 %v4760_v5  ;;  %v4794_v14 = vpack.c.bf16 %v85_v12, %v81_v11  ;;  %v94_v17 = vld [vmem:[#allocation8 + $0x78] sm:$0xff]  ;;  %4793 = vmatprep.subr.bf16.mxu1 %v4792_v9  ;;  %v4764_v18 = vpack.c.bf16 %v92_v15, %v88_v13  ;;  %v87_v20 = vld [vmem:[#allocation8 + $0x40] sm:$0xff]  ;;  %v89_v22 = vld [vmem:[#allocation8 + $0x50] sm:$0xff] }
  0x40   :  { %4763 = vmatpush1.bf16.msra.mxu0 %v4762_v10  ;;  %v4796_v19 = vpack.c.bf16 %v94_v17, %v90_v16  ;;  %v91_v21 = vld [vmem:[#allocation8 + $0x60] sm:$0xff]  ;;  %v93_v24 = vld [vmem:[#allocation8 + $0x70] sm:$0xff]  ;;  %v96_v25 = vld [vmem:[#allocation8 + $0x88] sm:$0xff] }
  0x41   :  { %4795 = vmatpush1.bf16.msra.mxu1 %v4794_v14  ;;  %v4766_v23 = vpack.c.bf16 %v91_v21, %v87_v20  ;;  %v100_v26 = vld [vmem:[#allocation8 + $0xa8] sm:$0xff]  ;;  %4765 = vmatprep.subr.bf16.mxu0 %v4764_v18  ;;  %v4798_v27 = vpack.c.bf16 %v93_v24, %v89_v22  ;;  %v98_v29 = vld [vmem:[#allocation8 + $0x98] sm:$0xff]  ;;  %v95_v31 = vld [vmem:[#allocation8 + $0x80] sm:$0xff] }
  0x42   :  { %4797 = vmatprep.subr.bf16.mxu1 %v4796_v19  ;;  %v4768_v28 = vpack.c.bf16 %v100_v26, %v96_v25  ;;  %v102_v30 = vld [vmem:[#allocation8 + $0xb8] sm:$0xff]  ;;  %v99_v33 = vld [vmem:[#allocation8 + $0xa0] sm:$0xff]  ;;  %v97_v34 = vld [vmem:[#allocation8 + $0x90] sm:$0xff] }
  0x43   :  { %v4800_v32 = vpack.c.bf16 %v102_v30, %v98_v29  ;;  %v101_v35 = vld [vmem:[#allocation8 + $0xb0] sm:$0xff]  ;;  %v4770_v36 = vpack.c.bf16 %v99_v33, %v95_v31  ;;  %v104_v37 = vld [vmem:[#allocation8 + $0xc8] sm:$0xff]  ;;  %v106_v39 = vld [vmem:[#allocation8 + $0xd8] sm:$0xff] }
  0x44   :  { %4767 = vmatpush1.bf16.msra.mxu0 %v4766_v23  ;;  %v108_v38 = vld [vmem:[#allocation8 + $0xe8] sm:$0xff]  ;;  %v4802_v40 = vpack.c.bf16 %v101_v35, %v97_v34  ;;  %v110_v42 = vld [vmem:[#allocation8 + $0xf8] sm:$0xff]  ;;  %v103_v43 = vld [vmem:[#allocation8 + $0xc0] sm:$0xff] }
  0x45   :  { %4799 = vmatpush1.bf16.msra.mxu1 %v4798_v27  ;;  %4769 = vmatprep.subr.bf16.mxu0 %v4768_v28  ;;  %v4772_v41 = vpack.c.bf16 %v108_v38, %v104_v37  ;;  %v107_v44 = vld [vmem:[#allocation8 + $0xe0] sm:$0xff]  ;;  %v4804_v45 = vpack.c.bf16 %v110_v42, %v106_v39  ;;  %v105_v46 = vld [vmem:[#allocation8 + $0xd0] sm:$0xff]  ;;  %v112_v48 = vld [vmem:[#allocation8 + $0x108] sm:$0xff] }
  0x46   :  { %4801 = vmatprep.subr.bf16.mxu1 %v4800_v32  ;;  %v109_v47 = vld [vmem:[#allocation8 + $0xf0] sm:$0xff]  ;;  %v116_v49 = vld [vmem:[#allocation8 + $0x128] sm:$0xff]  ;;  %v114_v50 = vld [vmem:[#allocation8 + $0x118] sm:$0xff]  ;;  %v4774_v52 = vpack.c.bf16 %v107_v44, %v103_v43 }
  0x47   :  { %v118_v51 = vld [vmem:[#allocation8 + $0x138] sm:$0xff]  ;;  %v4806_v53 = vpack.c.bf16 %v109_v47, %v105_v46  ;;  %v4776_v54 = vpack.c.bf16 %v116_v49, %v112_v48  ;;  %v111_v55 = vld [vmem:[#allocation8 + $0x100] sm:$0xff]  ;;  %v113_v57 = vld [vmem:[#allocation8 + $0x110] sm:$0xff] }
  0x48   :  { %4771 = vmatpush1.bf16.msra.mxu0 %v4770_v36  ;;  %v115_v56 = vld [vmem:[#allocation8 + $0x120] sm:$0xff]  ;;  %v4808_v58 = vpack.c.bf16 %v118_v51, %v114_v50  ;;  %v117_v59 = vld [vmem:[#allocation8 + $0x130] sm:$0xff]  ;;  %v120_v60 = vld [vmem:[#allocation8 + $0x148] sm:$0xff] }
  0x49   :  { %4803 = vmatpush1.bf16.msra.mxu1 %v4802_v40  ;;  %4773 = vmatprep.subr.bf16.mxu0 %v4772_v41  ;;  %v124_v61 = vld [vmem:[#allocation8 + $0x168] sm:$0xff]  ;;  %v122_v62 = vld [vmem:[#allocation8 + $0x158] sm:$0xff]  ;;  %v4778_v0 = vpack.c.bf16 %v115_v56, %v111_v55  ;;  %v4810_v2 = vpack.c.bf16 %v117_v59, %v113_v57  ;;  %v119_v4 = vld [vmem:[#allocation8 + $0x140] sm:$0xff] }
  0x4a   :  { %4805 = vmatprep.subr.bf16.mxu1 %v4804_v45  ;;  %v126_v63 = vld [vmem:[#allocation8 + $0x178] sm:$0xff]  ;;  %v4780_v3 = vpack.c.bf16 %v124_v61, %v120_v60  ;;  %v123_v5 = vld [vmem:[#allocation8 + $0x160] sm:$0xff]  ;;  %v121_v6 = vld [vmem:[#allocation8 + $0x150] sm:$0xff] }
  0x4b   :  { %v4812_v7 = vpack.c.bf16 %v126_v63, %v122_v62  ;;  %v125_v8 = vld [vmem:[#allocation8 + $0x170] sm:$0xff]  ;;  %v128_v9 = vld [vmem:[#allocation8 + $0x188] sm:$0xff]  ;;  %v130_v11 = vld [vmem:[#allocation8 + $0x198] sm:$0xff]  ;;  %v4782_v13 = vpack.c.bf16 %v123_v5, %v119_v4 }
  0x4c   :  { %4775 = vmatpush1.bf16.msra.mxu0 %v4774_v52  ;;  %v132_v10 = vld [vmem:[#allocation8 + $0x1a8] sm:$0xff]  ;;  %v134_v12 = vld [vmem:[#allocation8 + $0x1b8] sm:$0xff]  ;;  %v4814_v14 = vpack.c.bf16 %v125_v8, %v121_v6  ;;  %v127_v16 = vld [vmem:[#allocation8 + $0x180] sm:$0xff] }
  0x4d   :  { %4807 = vmatpush1.bf16.msra.mxu1 %v4806_v53  ;;  %4777 = vmatprep.subr.bf16.mxu0 %v4776_v54  ;;  %v4784_v15 = vpack.c.bf16 %v132_v10, %v128_v9  ;;  %v131_v17 = vld [vmem:[#allocation8 + $0x1a0] sm:$0xff]  ;;  %v129_v18 = vld [vmem:[#allocation8 + $0x190] sm:$0xff]  ;;  %v4816_v19 = vpack.c.bf16 %v134_v12, %v130_v11  ;;  %v136_v21 = vld [vmem:[#allocation8 + $0x1c8] sm:$0xff] }
  0x4e   :  { %4809 = vmatprep.subr.bf16.mxu1 %v4808_v58  ;;  %v133_v20 = vld [vmem:[#allocation8 + $0x1b0] sm:$0xff]  ;;  %v140_v22 = vld [vmem:[#allocation8 + $0x1e8] sm:$0xff]  ;;  %v138_v23 = vld [vmem:[#allocation8 + $0x1d8] sm:$0xff]  ;;  %v4786_v25 = vpack.c.bf16 %v131_v17, %v127_v16 }
  0x4f   :  { %v142_v24 = vld [vmem:[#allocation8 + $0x1f8] sm:$0xff]  ;;  %v4818_v26 = vpack.c.bf16 %v133_v20, %v129_v18  ;;  %v4788_v27 = vpack.c.bf16 %v140_v22, %v136_v21  ;;  %v135_v28 = vld [vmem:[#allocation8 + $0x1c0] sm:$0xff]  ;;  %v137_v30 = vld [vmem:[#allocation8 + $0x1d0] sm:$0xff] }
  0x50   :  { %4779 = vmatpush1.bf16.msra.mxu0 %v4778_v0  ;;  %v139_v29 = vld [vmem:[#allocation8 + $0x1e0] sm:$0xff]  ;;  %v4820_v31 = vpack.c.bf16 %v142_v24, %v138_v23  ;;  %v141_v32 = vld [vmem:[#allocation8 + $0x1f0] sm:$0xff]  ;;  %v428_v33 = vld [vmem:[#allocation10 + $0x8] sm:$0xff] }
  0x51   :  { %4811 = vmatpush1.bf16.msra.mxu1 %v4810_v2  ;;  %4781 = vmatprep.subr.bf16.mxu0 %v4780_v3  ;;  %v432_v34 = vld [vmem:[#allocation10 + $0x28] sm:$0xff]  ;;  %v430_v35 = vld [vmem:[#allocation10 + $0x18] sm:$0xff]  ;;  %v4790_v37 = vpack.c.bf16 %v139_v29, %v135_v28  ;;  %v4822_v38 = vpack.c.bf16 %v141_v32, %v137_v30  ;;  %v427_v40 = vld [vmem:[#allocation10] sm:$0xff] }
  0x52   :  { %4813 = vmatprep.subr.bf16.mxu1 %v4812_v7  ;;  %v434_v36 = vld [vmem:[#allocation10 + $0x38] sm:$0xff]  ;;  %v6531_v39 = vpack.c.bf16 %v432_v34, %v428_v33  ;;  %v431_v41 = vld [vmem:[#allocation10 + $0x20] sm:$0xff]  ;;  %v429_v43 = vld [vmem:[#allocation10 + $0x10] sm:$0xff] }
  0x53   :  { %v6533_v42 = vpack.c.bf16 %v434_v36, %v430_v35  ;;  %v433_v44 = vld [vmem:[#allocation10 + $0x30] sm:$0xff]  ;;  %v436_v45 = vld [vmem:[#allocation10 + $0x48] sm:$0xff]  ;;  %v71_v47 = vld [vmem:[#allocation5] sm:$0xff]  ;;  %v6535_v48 = vpack.c.bf16 %v431_v41, %v427_v40 }
  0x54   :  { %4783 = vmatpush1.bf16.msra.mxu0 %v4782_v13  ;;  %v440_v46 = vld [vmem:[#allocation10 + $0x68] sm:$0xff]  ;;  %v438_v49 = vld [vmem:[#allocation10 + $0x58] sm:$0xff]  ;;  %v6538_v51 = vpack.c.bf16 %v433_v44, %v429_v43  ;;  %v435_v52 = vld [vmem:[#allocation10 + $0x40] sm:$0xff] }
  0x55   :  { %4815 = vmatpush1.bf16.msra.mxu1 %v4814_v14  ;;  %4785 = vmatprep.subr.bf16.mxu0 %v4784_v15  ;;  %v442_v50 = vld [vmem:[#allocation10 + $0x78] sm:$0xff]  ;;  %v439_v53 = vld [vmem:[#allocation10 + $0x60] sm:$0xff]  ;;  %v6541_v54 = vpack.c.bf16 %v440_v46, %v436_v45  ;;  %v437_v55 = vld [vmem:[#allocation10 + $0x50] sm:$0xff] }
  0x56   :  { %4817 = vmatprep.subr.bf16.mxu1 %v4816_v19  ;;  %v441_v56 = vld [vmem:[#allocation10 + $0x70] sm:$0xff]  ;;  %v6543_v57 = vpack.c.bf16 %v442_v50, %v438_v49  ;;  %v444_v58 = vld [vmem:[#allocation10 + $0x88] sm:$0xff]  ;;  %v6546_v61 = vpack.c.bf16 %v439_v53, %v435_v52  ;;  %v446_v62 = vld [vmem:[#allocation10 + $0x98] sm:$0xff] }
  0x57   :  { %v448_v59 = vld [vmem:[#allocation10 + $0xa8] sm:$0xff]  ;;  %v450_v63 = vld [vmem:[#allocation10 + $0xb8] sm:$0xff]  ;;  %v6550_v0 = vpack.c.bf16 %v441_v56, %v437_v55  ;;  %v443_v2 = vld [vmem:[#allocation10 + $0x80] sm:$0xff] }
  0x58   :  { %4787 = vmatpush1.bf16.msra.mxu0 %v4786_v25  ;;  %v72_v60 = vld [vmem:[#allocation5 + $0x8] sm:$0xff]  ;;  %v447_v3 = vld [vmem:[#allocation10 + $0xa0] sm:$0xff]  ;;  %v6554_v4 = vpack.c.bf16 %v448_v59, %v444_v58  ;;  %v445_v5 = vld [vmem:[#allocation10 + $0x90] sm:$0xff]  ;;  %v6557_v7 = vpack.c.bf16 %v450_v63, %v446_v62 }
  0x59   :  { %4819 = vmatpush1.bf16.msra.mxu1 %v4818_v26  ;;  %4789 = vmatprep.subr.bf16.mxu0 %v4788_v27  ;;  %v449_v6 = vld [vmem:[#allocation10 + $0xb0] sm:$0xff]  ;;  %v452_v8 = vld [vmem:[#allocation10 + $0xc8] sm:$0xff]  ;;  %v6560_v11 = vpack.c.bf16 %v447_v3, %v443_v2  ;;  %v454_v12 = vld [vmem:[#allocation10 + $0xd8] sm:$0xff] }
  0x5a   :  { %4821 = vmatprep.subr.bf16.mxu1 %v4820_v31  ;;  %v456_v9 = vld [vmem:[#allocation10 + $0xe8] sm:$0xff]  ;;  %v73_v10 = vld [vmem:[#allocation5 + $0x10] sm:$0xff]  ;;  %v458_v13 = vld [vmem:[#allocation10 + $0xf8] sm:$0xff]  ;;  %v6564_v14 = vpack.c.bf16 %v449_v6, %v445_v5 }
  0x5b   :  { %v451_v15 = vld [vmem:[#allocation10 + $0xc0] sm:$0xff]  ;;  %v6568_v17 = vpack.c.bf16 %v456_v9, %v452_v8  ;;  %v453_v18 = vld [vmem:[#allocation10 + $0xd0] sm:$0xff]  ;;  %v6571_v20 = vpack.c.bf16 %v458_v13, %v454_v12  ;;  %v460_v21 = vld [vmem:[#allocation10 + $0x108] sm:$0xff] }
  0x5c   :  { %4791 = vmatpush1.bf16.msra.mxu0 %v4790_v37  ;;  %v455_v16 = vld [vmem:[#allocation10 + $0xe0] sm:$0xff]  ;;  %v457_v19 = vld [vmem:[#allocation10 + $0xf0] sm:$0xff]  ;;  %v464_v22 = vld [vmem:[#allocation10 + $0x128] sm:$0xff] }
  0x5d   :  { %4823 = vmatpush1.bf16.msra.mxu1 %v4822_v38  ;;  %4825 = vmatprep.subr.bf16.mxu0 %v6531_v39  ;;  %v74_v23 = vld [vmem:[#allocation5 + $0x18] sm:$0xff]  ;;  %v6574_v24 = vpack.c.bf16 %v455_v16, %v451_v15  ;;  %v6578_v27 = vpack.c.bf16 %v457_v19, %v453_v18  ;;  %v459_v28 = vld [vmem:[#allocation10 + $0x100] sm:$0xff]  ;;  %v6582_v30 = vpack.c.bf16 %v464_v22, %v460_v21  ;;  %v461_v31 = vld [vmem:[#allocation10 + $0x110] sm:$0xff] }
  0x5e   :  { %4857 = vmatprep.subr.bf16.mxu1 %v6533_v42  ;;  %v462_v25 = vld [vmem:[#allocation10 + $0x118] sm:$0xff]  ;;  %v463_v29 = vld [vmem:[#allocation10 + $0x120] sm:$0xff]  ;;  %v465_v32 = vld [vmem:[#allocation10 + $0x130] sm:$0xff] }
  0x5f   :  { %230 = vmatmul.mubr.f32.vlgmr.msra.gmra.mrb[0].mxu0 %v71_v47  ;;  %v466_v26 = vld [vmem:[#allocation10 + $0x138] sm:$0xff]  ;;  %v468_v34 = vld [vmem:[#allocation10 + $0x148] sm:$0xff]  ;;  %v75_v36 = vld [vmem:[#allocation5 + $0x20] sm:$0xff]  ;;  %v6588_v37 = vpack.c.bf16 %v463_v29, %v459_v28  ;;  %v6592_v41 = vpack.c.bf16 %v465_v32, %v461_v31  ;;  %v145_v29 = vlaneseq }
  0x60   :  { %343 = vmatmul.mubr.f32.vlgmr.msra.gmra.mrb[0].mxu1 %v71_v47  ;;  %4827 = vmatpush1.bf16.msra.mxu0 %v6535_v48  ;;  %v6585_v33 = vpack.c.bf16 %v466_v26, %v462_v25  ;;  %v472_v35 = vld [vmem:[#allocation10 + $0x168] sm:$0xff]  ;;  %v470_v38 = vld [vmem:[#allocation10 + $0x158] sm:$0xff]  ;;  %v467_v43 = vld [vmem:[#allocation10 + $0x140] sm:$0xff] }
  0x61   :  { %4859 = vmatpush1.bf16.msra.mxu1 %v6538_v51  ;;  %235 = vmatprep.mubr.f32.mxu0 %v6433_v1  ;;  %v474_v40 = vld [vmem:[#allocation10 + $0x178] sm:$0xff]  ;;  %v471_v44 = vld [vmem:[#allocation10 + $0x160] sm:$0xff]  ;;  %v6596_v45 = vpack.c.bf16 %v472_v35, %v468_v34  ;;  %v469_v46 = vld [vmem:[#allocation10 + $0x150] sm:$0xff]  ;;  %v6681_v31 = vshrl.u32 %v145_v29, 7 }
  0x62   :  { %348 = vmatprep.mubr.f32.mxu1 %v6433_v1  ;;  %4829 = vmatprep.subr.bf16.mxu0 %v6541_v54  ;;  %v473_v47 = vld [vmem:[#allocation10 + $0x170] sm:$0xff]  ;;  %v6599_v49 = vpack.c.bf16 %v474_v40, %v470_v38  ;;  %v476_v50 = vld [vmem:[#allocation10 + $0x188] sm:$0xff]  ;;  %v6602_v55 = vpack.c.bf16 %v471_v44, %v467_v43  ;;  %v478_v56 = vld [vmem:[#allocation10 + $0x198] sm:$0xff] }
  0x63   :  { %236 = vmatmul.mubr.f32.gmra.mrb[2].mxu0 %v72_v60  ;;  %4861 = vmatprep.subr.bf16.mxu1 %v6543_v57  ;;  %v480_v52 = vld [vmem:[#allocation10 + $0x1a8] sm:$0xff]  ;;  %v482_v58 = vld [vmem:[#allocation10 + $0x1b8] sm:$0xff]  ;;  %v6606_v59 = vpack.c.bf16 %v473_v47, %v469_v46  ;;  %v479_v62 = vld [vmem:[#allocation10 + $0x1a0] sm:$0xff]  ;;  %v147_v32 = vsub.s32 0, %v6681_v31  ;;  %v151_v35 = vsub.s32 1, %v6681_v31  ;;  %v159_v38 = vsub.s32 3, %v6681_v31 }
  0x64   :  { %349 = vmatmul.mubr.f32.gmra.mrb[2].mxu1 %v72_v60  ;;  %4831 = vmatpush1.bf16.msra.mxu0 %v6546_v61  ;;  %v76_v53 = vld [vmem:[#allocation5 + $0x28] sm:$0xff]  ;;  %v475_v60 = vld [vmem:[#allocation10 + $0x180] sm:$0xff]  ;;  %v6610_v63 = vpack.c.bf16 %v480_v52, %v476_v50  ;;  %v477_v2 = vld [vmem:[#allocation10 + $0x190] sm:$0xff]  ;;  %v6613_v5 = vpack.c.bf16 %v482_v58, %v478_v56  ;;  %v155_v56 = vsub.s32 2, %v6681_v31 }
  0x65   :  { %4863 = vmatpush1.bf16.msra.mxu1 %v6550_v0  ;;  %241 = vmatprep.mubr.f32.mxu0 %v6433_v1  ;;  %v481_v3 = vld [vmem:[#allocation10 + $0x1b0] sm:$0xff]  ;;  %v484_v6 = vld [vmem:[#allocation10 + $0x1c8] sm:$0xff]  ;;  %v486_v12 = vld [vmem:[#allocation10 + $0x1d8] sm:$0xff] }
  0x66   :  { %354 = vmatprep.mubr.f32.mxu1 %v6433_v1  ;;  %4833 = vmatprep.subr.bf16.mxu0 %v6554_v4  ;;  %v488_v8 = vld [vmem:[#allocation10 + $0x1e8] sm:$0xff]  ;;  %v77_v9 = vld [vmem:[#allocation5 + $0x30] sm:$0xff]  ;;  %v490_v13 = vld [vmem:[#allocation10 + $0x1f8] sm:$0xff]  ;;  %v6620_v15 = vpack.c.bf16 %v481_v3, %v477_v2 }
  0x67   :  { %242 = vmatmul.mubr.f32.gmra.mrb[4].mxu0 %v73_v10  ;;  %4865 = vmatprep.subr.bf16.mxu1 %v6557_v7  ;;  %v483_v16 = vld [vmem:[#allocation10 + $0x1c0] sm:$0xff]  ;;  %v6624_v19 = vpack.c.bf16 %v488_v8, %v484_v6  ;;  %v485_v21 = vld [vmem:[#allocation10 + $0x1d0] sm:$0xff]  ;;  %v78_v25 = vld [vmem:[#allocation5 + $0x38] sm:$0xff] }
  0x68   :  { %355 = vmatmul.mubr.f32.gmra.mrb[4].mxu1 %v73_v10  ;;  %4835 = vmatpush1.bf16.msra.mxu0 %v6560_v11  ;;  %v6616_v10 = vpack.c.bf16 %v479_v62, %v475_v60  ;;  %v487_v18 = vld [vmem:[#allocation10 + $0x1e0] sm:$0xff]  ;;  %v489_v22 = vld [vmem:[#allocation10 + $0x1f0] sm:$0xff] }
  0x69   :  { %4867 = vmatpush1.bf16.msra.mxu1 %v6564_v14  ;;  %247 = vmatprep.mubr.f32.mxu0 %v6433_v1  ;;  %v6630_v26 = vpack.c.bf16 %v487_v18, %v483_v16  ;;  %v6634_v28 = vpack.c.bf16 %v489_v22, %v485_v21  ;;  %v143_v34 = vld [vmem:[%s7657_s3] sm:$0xf] }
  0x6a   :  { %360 = vmatprep.mubr.f32.mxu1 %v6433_v1  ;;  %4837 = vmatprep.subr.bf16.mxu0 %v6568_v17  ;;  %v6707_v60 = vrot.slane %v143_v34, %v155_v56 }
  0x6b   :  { %248 = vmatmul.mubr.f32.gmra.mrb[6].mxu0 %v74_v23  ;;  %4869 = vmatprep.subr.bf16.mxu1 %v6571_v20 }
  0x6c   :  { %361 = vmatmul.mubr.f32.gmra.mrb[6].mxu1 %v74_v23  ;;  %4839 = vmatpush1.bf16.msra.mxu0 %v6574_v24  ;;  %v6627_v23 = vpack.c.bf16 %v490_v13, %v486_v12 }
  0x6d   :  { %4871 = vmatpush1.bf16.msra.mxu1 %v6578_v27  ;;  %253 = vmatprep.mubr.f32.mxu0 %v6433_v1 }
  0x6e   :  { %366 = vmatprep.mubr.f32.mxu1 %v6433_v1  ;;  %4841 = vmatprep.subr.bf16.mxu0 %v6582_v30 }
  0x6f   :  { %254 = vmatmul.mubr.f32.gmra.mrb[8].mxu0 %v75_v36  ;;  %4873 = vmatprep.subr.bf16.mxu1 %v6585_v33 }
  0x70   :  { %367 = vmatmul.mubr.f32.gmra.mrb[8].mxu1 %v75_v36  ;;  %4843 = vmatpush1.bf16.msra.mxu0 %v6588_v37  ;;  %v6690_v36 = vrot.slane %v143_v34, %v147_v32 }
  0x71   :  { %4875 = vmatpush1.bf16.msra.mxu1 %v6592_v41  ;;  %259 = vmatprep.mubr.f32.mxu0 %v6433_v1 }
  0x72   :  { %372 = vmatprep.mubr.f32.mxu1 %v6433_v1  ;;  %4845 = vmatprep.subr.bf16.mxu0 %v6596_v45 }
  0x73   :  { %260 = vmatmul.mubr.f32.gmra.mrb[10].mxu0 %v76_v53  ;;  %4877 = vmatprep.subr.bf16.mxu1 %v6599_v49 }
  0x74   :  { %373 = vmatmul.mubr.f32.gmra.mrb[10].mxu1 %v76_v53  ;;  %4847 = vmatpush1.bf16.msra.mxu0 %v6602_v55  ;;  %v6701_v53 = vrot.slane %v143_v34, %v159_v38 }
  0x75   :  { %4879 = vmatpush1.bf16.msra.mxu1 %v6606_v59  ;;  %265 = vmatprep.mubr.f32.mxu0 %v6433_v1 }
  0x76   :  { %378 = vmatprep.mubr.f32.mxu1 %v6433_v1  ;;  %4849 = vmatprep.subr.bf16.mxu0 %v6610_v63 }
  0x77   :  { %266 = vmatmul.mubr.f32.gmra.mrb[12].mxu0 %v77_v9  ;;  %4881 = vmatprep.subr.bf16.mxu1 %v6613_v5 }
  0x78   :  { %379 = vmatmul.mubr.f32.gmra.mrb[12].mxu1 %v77_v9  ;;  %4851 = vmatpush1.bf16.msra.mxu0 %v6616_v10 }
  0x79   :  { %4883 = vmatpush1.bf16.msra.mxu1 %v6620_v15  ;;  %271 = vmatprep.mubr.f32.mxu0 %v6433_v1 }
  0x7a   :  { %384 = vmatprep.mubr.f32.mxu1 %v6433_v1  ;;  %4853 = vmatprep.subr.bf16.mxu0 %v6624_v19 }
  0x7b   :  { %272 = vmatmul.mubr.f32.gmra.mrb[14].mxu0 %v78_v25  ;;  %4885 = vmatprep.subr.bf16.mxu1 %v6627_v23 }
  0x7c   :  { %385 = vmatmul.mubr.f32.gmra.mrb[14].mxu1 %v78_v25  ;;  %4855 = vmatpush1.bf16.msra.mxu0 %v6630_v26 }
  0x7d   :  { %4887 = vmatpush1.bf16.msra.mxu1 %v6634_v28  ;;  %555 = vmatprep.mubr.f32.mxu0 %v6433_v1 }
  0x7e   :  { %626 = vmatprep.mubr.f32.mxu1 %v6433_v1  ;;  %4889 = vmatprep.subr.bf16.mxu0 %v6531_v39 }
  0x7f   :  { %556 = vmatmul.mubr.f32.vlgmr.msra.gmra.mrb[0].mxu0 %v6433_v1  ;;  %4921 = vmatprep.subr.bf16.mxu1 %v6533_v42 }
  0x80   :  { %627 = vmatmul.mubr.f32.vlgmr.msra.gmra.mrb[0].mxu1 %v6433_v1  ;;  %4891 = vmatpush1.bf16.msra.mxu0 %v6535_v48 }
  0x81   :  { %4923 = vmatpush1.bf16.msra.mxu1 %v6538_v51  ;;  %4893 = vmatprep.subr.bf16.mxu0 %v6541_v54 }
  0x82   :  { %4925 = vmatprep.subr.bf16.mxu1 %v6543_v57  ;;  %794 = vmatprep.mubr.f32.mxu0 %v6433_v1 }
  0x83   :  { %865 = vmatprep.mubr.f32.mxu1 %v6433_v1 }
  0x84   :  { %4895 = vmatpush1.bf16.msra.mxu0 %v6546_v61 }
  0x85   :  { %4927 = vmatpush1.bf16.msra.mxu1 %v6550_v0  ;;  %4897 = vmatprep.subr.bf16.mxu0 %v6554_v4 }
  0x86   :  { %4929 = vmatprep.subr.bf16.mxu1 %v6557_v7 }
  0x88   :  { %4899 = vmatpush1.bf16.msra.mxu0 %v6560_v11 }
  0x89   :  { %4931 = vmatpush1.bf16.msra.mxu1 %v6564_v14  ;;  %4901 = vmatprep.subr.bf16.mxu0 %v6568_v17 }
  0x8a   :  { %4933 = vmatprep.subr.bf16.mxu1 %v6571_v20 }
  0x8c   :  { %4903 = vmatpush1.bf16.msra.mxu0 %v6574_v24 }
  0x8d   :  { %4935 = vmatpush1.bf16.msra.mxu1 %v6578_v27  ;;  %4905 = vmatprep.subr.bf16.mxu0 %v6582_v30 }
  0x8e   :  { %4937 = vmatprep.subr.bf16.mxu1 %v6585_v33 }
  0x90   :  { %4907 = vmatpush1.bf16.msra.mxu0 %v6588_v37 }
  0x91   :  { %4939 = vmatpush1.bf16.msra.mxu1 %v6592_v41  ;;  %4909 = vmatprep.subr.bf16.mxu0 %v6596_v45 }
  0x92   :  { %4941 = vmatprep.subr.bf16.mxu1 %v6599_v49 }
  0x94   :  { %4911 = vmatpush1.bf16.msra.mxu0 %v6602_v55 }
  0x95   :  { %4943 = vmatpush1.bf16.msra.mxu1 %v6606_v59  ;;  %4913 = vmatprep.subr.bf16.mxu0 %v6610_v63 }
  0x96   :  { %4945 = vmatprep.subr.bf16.mxu1 %v6613_v5 }
  0x98   :  { %4915 = vmatpush1.bf16.msra.mxu0 %v6616_v10 }
  0x99   :  { %4947 = vmatpush1.bf16.msra.mxu1 %v6620_v15  ;;  %4917 = vmatprep.subr.bf16.mxu0 %v6624_v19 }
  0x9a   :  { %4949 = vmatprep.subr.bf16.mxu1 %v6627_v23 }
  0x9c   :  { %4919 = vmatpush1.bf16.msra.mxu0 %v6630_v26 }
  0x9d   :  { %4951 = vmatpush1.bf16.msra.mxu1 %v6634_v28  ;;  %4953 = vmatprep.subr.bf16.mxu0 %v6531_v39  ;;  %v6694_v39 = vrot.slane %v143_v34, %v151_v35 }
  0x9e   :  { %4985 = vmatprep.subr.bf16.mxu1 %v6533_v42 }
 0x152   :  { %v557_v42 = vpop.f32.mrb[0].mxu0 }
 0x153   :  { %v5912_v40 = vadd.f32 %v557_v42, %v6690_v36  ;;  %v628_v43 = vpop.f32.mrb[0].mxu1  ;;  %v559_v44 = vpop.f32.mrb[1].mxu0 }
 0x154   :  { %v5913_v46 = vadd.f32 %v559_v44, %v6694_v39  ;;  %v630_v47 = vpop.f32.mrb[1].mxu1  ;;  %v5928_v2 = vadd.f32 %v628_v43, %v6707_v60 }
 0x155   :  { %v4709_v50 = vmul.f32 -1.442695, %v5912_v40  ;;  %v5929_v58 = vadd.f32 %v630_v47, %v6701_v53 }
 0x156   :  { %v4710_v52 = vmul.f32 -1.442695, %v5913_v46 }
 0x157   :  { %6050 = vpow2.f32 %v4709_v50  ;;  %v4711_v62 = vmul.f32 -1.442695, %v5929_v58 }
 0x158   :  { %6052 = vpow2.f32 %v4710_v52 }
 0x159   :  { %6054 = vpow2.f32 %v4711_v62 }
 0x15a   :  { %6056 = vtanh.f32 %v5928_v2 }
 0x161   :  { %v6051_v3 = vpop.eup %6050 }
 0x162   :  { %v6053_v6 = vpop.eup %6052  ;;  %v640_v8 = vadd.f32 1.0, %v6051_v3 }
 0x163   :  { %v646_v9 = vadd.f32 1.0, %v6053_v6  ;;  %v6055_v12 = vpop.eup %6054 }
 0x164   :  { %6058 = vrcp.f32 %v640_v8  ;;  %v6057_v13 = vpop.eup %6056  ;;  %v653_v22 = vadd.f32 1.0, %v6055_v12 }
 0x165   :  { %6060 = vrcp.f32 %v646_v9 }
 0x166   :  { %6062 = vrcp.f32 %v653_v22 }
 0x16e   :  { %v6059_v16 = vpop.eup %6058 }
 0x16f   :  { %v6061_v18 = vpop.eup %6060  ;;  %v657_v21 = vmul.f32 %v6059_v16, %v6057_v13 }
 0x170   :  { %v656_v25 = vmul.f32 0.0, %v6061_v18  ;;  %v6063_v34 = vpop.eup %6062 }
 0x172   :  { %v6710_v29 = vadd.f32 %v657_v21, %v656_v25 }
 0x174   :  { %6064 = vtanh.f32 %v6710_v29 }
 0x17e   :  { %v6065_v42 = vpop.eup %6064 }
 0x17f   :  { %v6713_v40 = vmul.f32 %v6065_v42, %v6063_v34  ;;  %v1145_v34 = vld [vmem:[#allocation10 + $0x8] sm:$0xff] }
 0x180   :  { %v1149_v42 = vld [vmem:[#allocation10 + $0x28] sm:$0xff] }
 0x181   :  { %795 = vmatmul.mubr.f32.vlgmr.msra.gmra.mrb[2].mxu0 %v6713_v40  ;;  %866 = vmatmul.mubr.f32.vlgmr.msra.gmra.mrb[2].mxu1 %v6713_v40 }
 0x182   :  { %4955 = vmatpush1.bf16.msra.mxu0 %v6535_v48  ;;  %4987 = vmatpush1.bf16.msra.mxu1 %v6538_v51 }
 0x183   :  { %4957 = vmatprep.subr.bf16.mxu0 %v6541_v54  ;;  %4989 = vmatprep.subr.bf16.mxu1 %v6543_v57 }
 0x184   :  { %1033 = vmatprep.mubr.f32.mxu0 %v6433_v1  ;;  %1104 = vmatprep.mubr.f32.mxu1 %v6433_v1 }
 0x186   :  { %4959 = vmatpush1.bf16.msra.mxu0 %v6546_v61  ;;  %4991 = vmatpush1.bf16.msra.mxu1 %v6550_v0 }
 0x187   :  { %4961 = vmatprep.subr.bf16.mxu0 %v6554_v4  ;;  %4993 = vmatprep.subr.bf16.mxu1 %v6557_v7 }
 0x18a   :  { %4963 = vmatpush1.bf16.msra.mxu0 %v6560_v11  ;;  %4995 = vmatpush1.bf16.msra.mxu1 %v6564_v14 }
 0x18b   :  { %4965 = vmatprep.subr.bf16.mxu0 %v6568_v17  ;;  %4997 = vmatprep.subr.bf16.mxu1 %v6571_v20 }
 0x18e   :  { %4967 = vmatpush1.bf16.msra.mxu0 %v6574_v24  ;;  %4999 = vmatpush1.bf16.msra.mxu1 %v6578_v27 }
 0x18f   :  { %4969 = vmatprep.subr.bf16.mxu0 %v6582_v30  ;;  %5001 = vmatprep.subr.bf16.mxu1 %v6585_v33 }
 0x192   :  { %4971 = vmatpush1.bf16.msra.mxu0 %v6588_v37  ;;  %5003 = vmatpush1.bf16.msra.mxu1 %v6592_v41 }
 0x193   :  { %4973 = vmatprep.subr.bf16.mxu0 %v6596_v45  ;;  %5005 = vmatprep.subr.bf16.mxu1 %v6599_v49 }
 0x196   :  { %4975 = vmatpush1.bf16.msra.mxu0 %v6602_v55  ;;  %5007 = vmatpush1.bf16.msra.mxu1 %v6606_v59 }
 0x197   :  { %4977 = vmatprep.subr.bf16.mxu0 %v6610_v63  ;;  %5009 = vmatprep.subr.bf16.mxu1 %v6613_v5 }
 0x19a   :  { %4979 = vmatpush1.bf16.msra.mxu0 %v6616_v10  ;;  %5011 = vmatpush1.bf16.msra.mxu1 %v6620_v15 }
 0x19b   :  { %4981 = vmatprep.subr.bf16.mxu0 %v6624_v19  ;;  %5013 = vmatprep.subr.bf16.mxu1 %v6627_v23 }
 0x19e   :  { %4983 = vmatpush1.bf16.msra.mxu0 %v6630_v26  ;;  %5015 = vmatpush1.bf16.msra.mxu1 %v6634_v28 }
 0x254   :  { %v796_v48 = vpop.f32.mrb[2].mxu0  ;;  %v867_v51 = vpop.f32.mrb[2].mxu1 }
 0x255   :  { %v5914_v54 = vadd.f32 %v796_v48, %v6690_v36  ;;  %v798_v57 = vpop.f32.mrb[3].mxu0  ;;  %v869_v61 = vpop.f32.mrb[3].mxu1  ;;  %v5930_v50 = vadd.f32 %v867_v51, %v6707_v60  ;;  %v6763_v48 = vpack.c.bf16 %v1149_v42, %v1145_v34  ;;  %v1151_v51 = vld [vmem:[#allocation10 + $0x38] sm:$0xff] }
 0x256   :  { %v5915_v0 = vadd.f32 %v798_v57, %v6694_v39  ;;  %v5931_v46 = vadd.f32 %v869_v61, %v6701_v53  ;;  %v1148_v57 = vld [vmem:[#allocation10 + $0x20] sm:$0xff]  ;;  %v1402_v34 = vld [vmem:[#allocation10 + $0x98] sm:$0xff] }
 0x257   :  { %v4712_v43 = vmul.f32 -1.442695, %v5914_v54  ;;  %v1144_v54 = vld [vmem:[#allocation10] sm:$0xff]  ;;  %5017 = vmatprep.subr.bf16.mxu0 %v6763_v48 }
 0x258   :  { %v4713_v44 = vmul.f32 -1.442695, %v5915_v0  ;;  %v4714_v47 = vmul.f32 -1.442695, %v5931_v46  ;;  %v6767_v0 = vpack.c.bf16 %v1148_v57, %v1144_v54  ;;  %v1403_v54 = vld [vmem:[#allocation10 + $0xa0] sm:$0xff] }
 0x259   :  { %6066 = vpow2.f32 %v4712_v43  ;;  %v1146_v43 = vld [vmem:[#allocation10 + $0x10] sm:$0xff] }
 0x25a   :  { %6068 = vpow2.f32 %v4713_v44  ;;  %v1150_v44 = vld [vmem:[#allocation10 + $0x30] sm:$0xff] }
 0x25b   :  { %6070 = vpow2.f32 %v4714_v47  ;;  %v6770_v46 = vpack.c.bf16 %v1150_v44, %v1146_v43  ;;  %v1153_v47 = vld [vmem:[#allocation10 + $0x48] sm:$0xff]  ;;  %v1401_v44 = vld [vmem:[#allocation10 + $0x90] sm:$0xff] }
 0x25c   :  { %6072 = vtanh.f32 %v5930_v50  ;;  %v1157_v50 = vld [vmem:[#allocation10 + $0x68] sm:$0xff] }
 0x263   :  { %v6067_v52 = vpop.eup %6066 }
 0x264   :  { %v6069_v58 = vpop.eup %6068  ;;  %v879_v62 = vadd.f32 1.0, %v6067_v52  ;;  %v1155_v52 = vld [vmem:[#allocation10 + $0x58] sm:$0xff] }
 0x265   :  { %v885_v2 = vadd.f32 1.0, %v6069_v58  ;;  %v6071_v3 = vpop.eup %6070  ;;  %v6775_v58 = vpack.c.bf16 %v1157_v50, %v1153_v47  ;;  %v1405_v47 = vld [vmem:[#allocation10 + $0xb0] sm:$0xff] }
 0x266   :  { %6074 = vrcp.f32 %v879_v62  ;;  %v6073_v6 = vpop.eup %6072  ;;  %v892_v13 = vadd.f32 1.0, %v6071_v3  ;;  %v1159_v62 = vld [vmem:[#allocation10 + $0x78] sm:$0xff]  ;;  %v1156_v3 = vld [vmem:[#allocation10 + $0x60] sm:$0xff]  ;;  %v6840_v50 = vpack.c.bf16 %v1405_v47, %v1401_v44  ;;  %v1436_v47 = vld [vmem:[#allocation10 + $0x1a8] sm:$0xff] }
 0x267   :  { %6076 = vrcp.f32 %v885_v2  ;;  %v1152_v2 = vld [vmem:[#allocation10 + $0x40] sm:$0xff] }
 0x268   :  { %6078 = vrcp.f32 %v892_v13 }
 0x270   :  { %v6075_v8 = vpop.eup %6074 }
 0x271   :  { %v6077_v9 = vpop.eup %6076  ;;  %v896_v12 = vmul.f32 %v6075_v8, %v6073_v6  ;;  %v6777_v6 = vpack.c.bf16 %v1159_v62, %v1155_v52  ;;  %v6779_v8 = vpack.c.bf16 %v1156_v3, %v1152_v2  ;;  %v1408_v52 = vld [vmem:[#allocation10 + $0xc8] sm:$0xff]  ;;  %v1410_v2 = vld [vmem:[#allocation10 + $0xd8] sm:$0xff] }
 0x272   :  { %v895_v16 = vmul.f32 %v6077_v9, %v6710_v29  ;;  %v6079_v21 = vpop.eup %6078  ;;  %v1147_v29 = vld [vmem:[#allocation10 + $0x18] sm:$0xff]  ;;  %v1154_v9 = vld [vmem:[#allocation10 + $0x50] sm:$0xff]  ;;  %v1412_v62 = vld [vmem:[#allocation10 + $0xe8] sm:$0xff] }
 0x273   :  { %v6765_v61 = vpack.c.bf16 %v1151_v51, %v1147_v29  ;;  %v1406_v29 = vld [vmem:[#allocation10 + $0xb8] sm:$0xff]  ;;  %v1399_v51 = vld [vmem:[#allocation10 + $0x80] sm:$0xff]  ;;  %v6845_v3 = vpack.c.bf16 %v1412_v62, %v1408_v52 }
 0x274   :  { %v6754_v18 = vadd.f32 %v896_v12, %v895_v16  ;;  %v1158_v12 = vld [vmem:[#allocation10 + $0x70] sm:$0xff]  ;;  %v6835_v57 = vpack.c.bf16 %v1406_v29, %v1402_v34  ;;  %v6837_v43 = vpack.c.bf16 %v1403_v54, %v1399_v51  ;;  %v1432_v54 = vld [vmem:[#allocation10 + $0x188] sm:$0xff]  ;;  %v1434_v52 = vld [vmem:[#allocation10 + $0x198] sm:$0xff] }
 0x275   :  { %5049 = vmatprep.subr.bf16.mxu1 %v6765_v61  ;;  %v6782_v13 = vpack.c.bf16 %v1158_v12, %v1154_v9  ;;  %v1414_v9 = vld [vmem:[#allocation10 + $0xf8] sm:$0xff]  ;;  %v1407_v12 = vld [vmem:[#allocation10 + $0xc0] sm:$0xff]  ;;  %v1425_v29 = vld [vmem:[#allocation10 + $0x150] sm:$0xff] }
 0x276   :  { %6080 = vtanh.f32 %v6754_v18  ;;  %v1429_v51 = vld [vmem:[#allocation10 + $0x170] sm:$0xff]  ;;  %v1438_v62 = vld [vmem:[#allocation10 + $0x1b8] sm:$0xff] }
 0x277   :  { %v6876_v44 = vpack.c.bf16 %v1429_v51, %v1425_v29 }
 0x280   :  { %v6081_v22 = vpop.eup %6080 }
 0x281   :  { %v6757_v25 = vmul.f32 %v6081_v22, %v6079_v21  ;;  %v1404_v22 = vld [vmem:[#allocation10 + $0xa8] sm:$0xff] }
 0x283   :  { %1034 = vmatmul.mubr.f32.vlgmr.msra.gmra.mrb[4].mxu0 %v6757_v25  ;;  %1105 = vmatmul.mubr.f32.vlgmr.msra.gmra.mrb[4].mxu1 %v6757_v25 }
 0x284   :  { %1272 = vmatprep.mubr.f32.mxu0 %v6433_v1  ;;  %1343 = vmatprep.mubr.f32.mxu1 %v6433_v1 }
 0x285   :  { %5019 = vmatpush1.bf16.msra.mxu0 %v6767_v0  ;;  %5051 = vmatpush1.bf16.msra.mxu1 %v6770_v46 }
 0x286   :  { %5021 = vmatprep.subr.bf16.mxu0 %v6775_v58  ;;  %5053 = vmatprep.subr.bf16.mxu1 %v6777_v6 }
 0x289   :  { %5023 = vmatpush1.bf16.msra.mxu0 %v6779_v8  ;;  %5055 = vmatpush1.bf16.msra.mxu1 %v6782_v13 }
 0x28a   :  { %5025 = vmatprep.subr.bf16.mxu0 %v6554_v4  ;;  %5057 = vmatprep.subr.bf16.mxu1 %v6557_v7 }
 0x28d   :  { %5027 = vmatpush1.bf16.msra.mxu0 %v6560_v11  ;;  %5059 = vmatpush1.bf16.msra.mxu1 %v6564_v14 }
 0x28e   :  { %5029 = vmatprep.subr.bf16.mxu0 %v6568_v17  ;;  %5061 = vmatprep.subr.bf16.mxu1 %v6571_v20 }
 0x291   :  { %5031 = vmatpush1.bf16.msra.mxu0 %v6574_v24  ;;  %5063 = vmatpush1.bf16.msra.mxu1 %v6578_v27 }
 0x292   :  { %5033 = vmatprep.subr.bf16.mxu0 %v6582_v30  ;;  %5065 = vmatprep.subr.bf16.mxu1 %v6585_v33 }
 0x295   :  { %5035 = vmatpush1.bf16.msra.mxu0 %v6588_v37  ;;  %5067 = vmatpush1.bf16.msra.mxu1 %v6592_v41 }
 0x296   :  { %5037 = vmatprep.subr.bf16.mxu0 %v6596_v45  ;;  %5069 = vmatprep.subr.bf16.mxu1 %v6599_v49 }
 0x299   :  { %5039 = vmatpush1.bf16.msra.mxu0 %v6602_v55  ;;  %5071 = vmatpush1.bf16.msra.mxu1 %v6606_v59 }
 0x29a   :  { %5041 = vmatprep.subr.bf16.mxu0 %v6610_v63  ;;  %5073 = vmatprep.subr.bf16.mxu1 %v6613_v5 }
 0x29d   :  { %5043 = vmatpush1.bf16.msra.mxu0 %v6616_v10  ;;  %5075 = vmatpush1.bf16.msra.mxu1 %v6620_v15 }
 0x29e   :  { %5045 = vmatprep.subr.bf16.mxu0 %v6624_v19  ;;  %5077 = vmatprep.subr.bf16.mxu1 %v6627_v23 }
 0x2a1   :  { %5047 = vmatpush1.bf16.msra.mxu0 %v6630_v26  ;;  %5079 = vmatpush1.bf16.msra.mxu1 %v6634_v28 }
 0x2a2   :  { %5081 = vmatprep.subr.bf16.mxu0 %v6763_v48  ;;  %5113 = vmatprep.subr.bf16.mxu1 %v6765_v61 }
 0x356   :  { %v1035_v4 = vpop.f32.mrb[4].mxu0  ;;  %v1106_v7 = vpop.f32.mrb[4].mxu1 }
 0x357   :  { %v5916_v11 = vadd.f32 %v1035_v4, %v6690_v36  ;;  %v1037_v14 = vpop.f32.mrb[5].mxu0  ;;  %v1108_v17 = vpop.f32.mrb[5].mxu1  ;;  %v5932_v37 = vadd.f32 %v1106_v7, %v6707_v60  ;;  %v1411_v4 = vld [vmem:[#allocation10 + $0xe0] sm:$0xff]  ;;  %v6847_v7 = vpack.c.bf16 %v1414_v9, %v1410_v2  ;;  %v6879_v2 = vpack.c.bf16 %v1436_v47, %v1432_v54 }
 0x358   :  { %v5917_v20 = vadd.f32 %v1037_v14, %v6694_v39  ;;  %v5933_v30 = vadd.f32 %v1108_v17, %v6701_v53  ;;  %v1409_v14 = vld [vmem:[#allocation10 + $0xd0] sm:$0xff]  ;;  %v6881_v9 = vpack.c.bf16 %v1438_v62, %v1434_v52 }
 0x359   :  { %v4715_v24 = vmul.f32 -1.442695, %v5916_v11  ;;  %v6849_v11 = vpack.c.bf16 %v1411_v4, %v1407_v12  ;;  %v1413_v17 = vld [vmem:[#allocation10 + $0xf0] sm:$0xff]  ;;  %v1431_v12 = vld [vmem:[#allocation10 + $0x180] sm:$0xff] }
 0x35a   :  { %v4716_v27 = vmul.f32 -1.442695, %v5917_v20  ;;  %v4717_v33 = vmul.f32 -1.442695, %v5933_v30  ;;  %v6852_v20 = vpack.c.bf16 %v1413_v17, %v1409_v14  ;;  %v1418_v30 = vld [vmem:[#allocation10 + $0x118] sm:$0xff]  ;;  %v1435_v4 = vld [vmem:[#allocation10 + $0x1a0] sm:$0xff] }
 0x35b   :  { %6082 = vpow2.f32 %v4715_v24  ;;  %v1416_v24 = vld [vmem:[#allocation10 + $0x108] sm:$0xff]  ;;  %v1433_v14 = vld [vmem:[#allocation10 + $0x190] sm:$0xff]  ;;  %v6884_v17 = vpack.c.bf16 %v1435_v4, %v1431_v12 }
 0x35c   :  { %6084 = vpow2.f32 %v4716_v27  ;;  %v1420_v27 = vld [vmem:[#allocation10 + $0x128] sm:$0xff] }
 0x35d   :  { %6086 = vpow2.f32 %v4717_v33  ;;  %v6857_v33 = vpack.c.bf16 %v1420_v27, %v1416_v24  ;;  %v1437_v24 = vld [vmem:[#allocation10 + $0x1b0] sm:$0xff]  ;;  %v1440_v27 = vld [vmem:[#allocation10 + $0x1c8] sm:$0xff] }
 0x35e   :  { %6088 = vtanh.f32 %v5932_v37  ;;  %v1422_v37 = vld [vmem:[#allocation10 + $0x138] sm:$0xff] }
 0x365   :  { %v6083_v41 = vpop.eup %6082 }
 0x366   :  { %v6085_v45 = vpop.eup %6084  ;;  %v1118_v49 = vadd.f32 1.0, %v6083_v41  ;;  %v1415_v41 = vld [vmem:[#allocation10 + $0x100] sm:$0xff] }
 0x367   :  { %v1124_v55 = vadd.f32 1.0, %v6085_v45  ;;  %v6087_v59 = vpop.eup %6086  ;;  %v1419_v45 = vld [vmem:[#allocation10 + $0x120] sm:$0xff] }
 0x368   :  { %6090 = vrcp.f32 %v1118_v49  ;;  %v6089_v63 = vpop.eup %6088  ;;  %v1131_v19 = vadd.f32 1.0, %v6087_v59  ;;  %v6859_v49 = vpack.c.bf16 %v1422_v37, %v1418_v30  ;;  %v1417_v59 = vld [vmem:[#allocation10 + $0x110] sm:$0xff]  ;;  %v1444_v30 = vld [vmem:[#allocation10 + $0x1e8] sm:$0xff]  ;;  %v6888_v37 = vpack.c.bf16 %v1437_v24, %v1433_v14 }
 0x369   :  { %6092 = vrcp.f32 %v1124_v55  ;;  %v6861_v55 = vpack.c.bf16 %v1419_v45, %v1415_v41  ;;  %v6890_v41 = vpack.c.bf16 %v1444_v30, %v1440_v27  ;;  %v1442_v45 = vld [vmem:[#allocation10 + $0x1d8] sm:$0xff] }
 0x36a   :  { %6094 = vrcp.f32 %v1131_v19  ;;  %v1426_v19 = vld [vmem:[#allocation10 + $0x158] sm:$0xff] }
 0x372   :  { %v6091_v5 = vpop.eup %6090 }
 0x373   :  { %v6093_v10 = vpop.eup %6092  ;;  %v1135_v15 = vmul.f32 %v6091_v5, %v6089_v63  ;;  %v1421_v63 = vld [vmem:[#allocation10 + $0x130] sm:$0xff] }
 0x374   :  { %v1134_v23 = vmul.f32 %v6093_v10, %v6754_v18  ;;  %v6095_v28 = vpop.eup %6094  ;;  %v1400_v18 = vld [vmem:[#allocation10 + $0x88] sm:$0xff]  ;;  %v6864_v5 = vpack.c.bf16 %v1421_v63, %v1417_v59  ;;  %v1446_v59 = vld [vmem:[#allocation10 + $0x1f8] sm:$0xff]  ;;  %v1439_v63 = vld [vmem:[#allocation10 + $0x1c0] sm:$0xff] }
 0x375   :  { %v6833_v42 = vpack.c.bf16 %v1404_v22, %v1400_v18  ;;  %v1424_v10 = vld [vmem:[#allocation10 + $0x148] sm:$0xff]  ;;  %v1427_v18 = vld [vmem:[#allocation10 + $0x160] sm:$0xff] }
 0x376   :  { %v6818_v26 = vadd.f32 %v1135_v15, %v1134_v23  ;;  %v1428_v15 = vld [vmem:[#allocation10 + $0x168] sm:$0xff] }
 0x377   :  { %v6868_v23 = vpack.c.bf16 %v1428_v15, %v1424_v10  ;;  %v6893_v10 = vpack.c.bf16 %v1446_v59, %v1442_v45  ;;  %v1443_v15 = vld [vmem:[#allocation10 + $0x1e0] sm:$0xff] }
 0x378   :  { %6096 = vtanh.f32 %v6818_v26 }
 0x382   :  { %v6097_v16 = vpop.eup %6096 }
 0x383   :  { %v6821_v21 = vmul.f32 %v6097_v16, %v6095_v28  ;;  %v1430_v28 = vld [vmem:[#allocation10 + $0x178] sm:$0xff]  ;;  %v1423_v16 = vld [vmem:[#allocation10 + $0x140] sm:$0xff] }
 0x384   :  { %v6871_v22 = vpack.c.bf16 %v1430_v28, %v1426_v19  ;;  %v6873_v34 = vpack.c.bf16 %v1427_v18, %v1423_v16  ;;  %v1441_v19 = vld [vmem:[#allocation10 + $0x1d0] sm:$0xff]  ;;  %v6896_v16 = vpack.c.bf16 %v1443_v15, %v1439_v63 }
 0x385   :  { %1273 = vmatmul.mubr.f32.vlgmr.msra.gmra.mrb[6].mxu0 %v6821_v21  ;;  %1344 = vmatmul.mubr.f32.vlgmr.msra.gmra.mrb[6].mxu1 %v6821_v21  ;;  %v1445_v28 = vld [vmem:[#allocation10 + $0x1f0] sm:$0xff] }
 0x386   :  { %5083 = vmatpush1.bf16.msra.mxu0 %v6767_v0  ;;  %5115 = vmatpush1.bf16.msra.mxu1 %v6770_v46  ;;  %v6900_v18 = vpack.c.bf16 %v1445_v28, %v1441_v19 }
 0x387   :  { %5085 = vmatprep.subr.bf16.mxu0 %v6775_v58  ;;  %5117 = vmatprep.subr.bf16.mxu1 %v6777_v6 }
 0x388   :  { %1511 = vmatprep.mubr.f32.mxu0 %v6433_v1  ;;  %1582 = vmatprep.mubr.f32.mxu1 %v6433_v1 }
 0x38a   :  { %5087 = vmatpush1.bf16.msra.mxu0 %v6779_v8  ;;  %5119 = vmatpush1.bf16.msra.mxu1 %v6782_v13 }
 0x38b   :  { %5089 = vmatprep.subr.bf16.mxu0 %v6833_v42  ;;  %5121 = vmatprep.subr.bf16.mxu1 %v6835_v57 }
 0x38e   :  { %5091 = vmatpush1.bf16.msra.mxu0 %v6837_v43  ;;  %5123 = vmatpush1.bf16.msra.mxu1 %v6840_v50 }
 0x38f   :  { %5093 = vmatprep.subr.bf16.mxu0 %v6845_v3  ;;  %5125 = vmatprep.subr.bf16.mxu1 %v6847_v7 }
 0x392   :  { %5095 = vmatpush1.bf16.msra.mxu0 %v6849_v11  ;;  %5127 = vmatpush1.bf16.msra.mxu1 %v6852_v20 }
 0x393   :  { %5097 = vmatprep.subr.bf16.mxu0 %v6857_v33  ;;  %5129 = vmatprep.subr.bf16.mxu1 %v6859_v49 }
 0x396   :  { %5099 = vmatpush1.bf16.msra.mxu0 %v6861_v55  ;;  %5131 = vmatpush1.bf16.msra.mxu1 %v6864_v5 }
 0x397   :  { %5101 = vmatprep.subr.bf16.mxu0 %v6868_v23  ;;  %5133 = vmatprep.subr.bf16.mxu1 %v6871_v22 }
 0x39a   :  { %5103 = vmatpush1.bf16.msra.mxu0 %v6873_v34  ;;  %5135 = vmatpush1.bf16.msra.mxu1 %v6876_v44 }
 0x39b   :  { %5105 = vmatprep.subr.bf16.mxu0 %v6879_v2  ;;  %5137 = vmatprep.subr.bf16.mxu1 %v6881_v9 }
 0x39e   :  { %5107 = vmatpush1.bf16.msra.mxu0 %v6884_v17  ;;  %5139 = vmatpush1.bf16.msra.mxu1 %v6888_v37 }
 0x39f   :  { %5109 = vmatprep.subr.bf16.mxu0 %v6890_v41  ;;  %5141 = vmatprep.subr.bf16.mxu1 %v6893_v10 }
 0x3a2   :  { %5111 = vmatpush1.bf16.msra.mxu0 %v6896_v16  ;;  %5143 = vmatpush1.bf16.msra.mxu1 %v6900_v18 }
 0x3a3   :  { %5145 = vmatprep.subr.bf16.mxu0 %v6763_v48  ;;  %5177 = vmatprep.subr.bf16.mxu1 %v6765_v61 }
 0x458   :  { %v1274_v29 = vpop.f32.mrb[6].mxu0  ;;  %v1345_v51 = vpop.f32.mrb[6].mxu1 }
 0x459   :  { %v5918_v54 = vadd.f32 %v1274_v29, %v6690_v36  ;;  %v1276_v47 = vpop.f32.mrb[7].mxu0  ;;  %v1347_v52 = vpop.f32.mrb[7].mxu1  ;;  %v5934_v27 = vadd.f32 %v1345_v51, %v6707_v60 }
 0x45a   :  { %v5919_v62 = vadd.f32 %v1276_v47, %v6694_v39  ;;  %v5935_v14 = vadd.f32 %v1347_v52, %v6701_v53 }
 0x45b   :  { %v4718_v12 = vmul.f32 -1.442695, %v5918_v54 }
 0x45c   :  { %v4719_v4 = vmul.f32 -1.442695, %v5919_v62  ;;  %v4720_v24 = vmul.f32 -1.442695, %v5935_v14 }
 0x45d   :  { %6098 = vpow2.f32 %v4718_v12 }
 0x45e   :  { %6100 = vpow2.f32 %v4719_v4 }
 0x45f   :  { %6102 = vpow2.f32 %v4720_v24 }
 0x460   :  { %6104 = vtanh.f32 %v5934_v27 }
 0x467   :  { %v6099_v30 = vpop.eup %6098 }
 0x468   :  { %v6101_v45 = vpop.eup %6100  ;;  %v1357_v59 = vadd.f32 1.0, %v6099_v30 }
 0x469   :  { %v1363_v63 = vadd.f32 1.0, %v6101_v45  ;;  %v6103_v15 = vpop.eup %6102 }
 0x46a   :  { %6106 = vrcp.f32 %v1357_v59  ;;  %v6105_v19 = vpop.eup %6104  ;;  %v1370_v47 = vadd.f32 1.0, %v6103_v15 }
 0x46b   :  { %6108 = vrcp.f32 %v1363_v63 }
 0x46c   :  { %6110 = vrcp.f32 %v1370_v47 }
 0x474   :  { %v6107_v28 = vpop.eup %6106 }
 0x475   :  { %v6109_v29 = vpop.eup %6108  ;;  %v1374_v54 = vmul.f32 %v6107_v28, %v6105_v19 }
 0x476   :  { %v1373_v62 = vmul.f32 %v6109_v29, %v6818_v26  ;;  %v6111_v51 = vpop.eup %6110 }
 0x478   :  { %v6912_v52 = vadd.f32 %v1374_v54, %v1373_v62 }
 0x47a   :  { %6112 = vtanh.f32 %v6912_v52 }
 0x484   :  { %v6113_v12 = vpop.eup %6112 }
 0x485   :  { %v6915_v4 = vmul.f32 %v6113_v12, %v6111_v51 }
 0x487   :  { %1512 = vmatmul.mubr.f32.vlgmr.msra.gmra.mrb[8].mxu0 %v6915_v4  ;;  %1583 = vmatmul.mubr.f32.vlgmr.msra.gmra.mrb[8].mxu1 %v6915_v4 }
 0x488   :  { %5147 = vmatpush1.bf16.msra.mxu0 %v6767_v0  ;;  %5179 = vmatpush1.bf16.msra.mxu1 %v6770_v46 }
 0x489   :  { %5149 = vmatprep.subr.bf16.mxu0 %v6775_v58  ;;  %5181 = vmatprep.subr.bf16.mxu1 %v6777_v6 }
 0x48a   :  { %1750 = vmatprep.mubr.f32.mxu0 %v6433_v1  ;;  %1821 = vmatprep.mubr.f32.mxu1 %v6433_v1 }
 0x48c   :  { %5151 = vmatpush1.bf16.msra.mxu0 %v6779_v8  ;;  %5183 = vmatpush1.bf16.msra.mxu1 %v6782_v13 }
 0x48d   :  { %5153 = vmatprep.subr.bf16.mxu0 %v6833_v42  ;;  %5185 = vmatprep.subr.bf16.mxu1 %v6835_v57 }
 0x490   :  { %5155 = vmatpush1.bf16.msra.mxu0 %v6837_v43  ;;  %5187 = vmatpush1.bf16.msra.mxu1 %v6840_v50 }
 0x491   :  { %5157 = vmatprep.subr.bf16.mxu0 %v6845_v3  ;;  %5189 = vmatprep.subr.bf16.mxu1 %v6847_v7 }
 0x494   :  { %5159 = vmatpush1.bf16.msra.mxu0 %v6849_v11  ;;  %5191 = vmatpush1.bf16.msra.mxu1 %v6852_v20 }
 0x495   :  { %5161 = vmatprep.subr.bf16.mxu0 %v6857_v33  ;;  %5193 = vmatprep.subr.bf16.mxu1 %v6859_v49 }
 0x498   :  { %5163 = vmatpush1.bf16.msra.mxu0 %v6861_v55  ;;  %5195 = vmatpush1.bf16.msra.mxu1 %v6864_v5 }
 0x499   :  { %5165 = vmatprep.subr.bf16.mxu0 %v6868_v23  ;;  %5197 = vmatprep.subr.bf16.mxu1 %v6871_v22 }
 0x49c   :  { %5167 = vmatpush1.bf16.msra.mxu0 %v6873_v34  ;;  %5199 = vmatpush1.bf16.msra.mxu1 %v6876_v44 }
 0x49d   :  { %5169 = vmatprep.subr.bf16.mxu0 %v6879_v2  ;;  %5201 = vmatprep.subr.bf16.mxu1 %v6881_v9 }
 0x4a0   :  { %5171 = vmatpush1.bf16.msra.mxu0 %v6884_v17  ;;  %5203 = vmatpush1.bf16.msra.mxu1 %v6888_v37 }
 0x4a1   :  { %5173 = vmatprep.subr.bf16.mxu0 %v6890_v41  ;;  %5205 = vmatprep.subr.bf16.mxu1 %v6893_v10 }
 0x4a4   :  { %5175 = vmatpush1.bf16.msra.mxu0 %v6896_v16  ;;  %5207 = vmatpush1.bf16.msra.mxu1 %v6900_v18 }
 0x4a5   :  { %5209 = vmatprep.subr.bf16.mxu0 %v6763_v48  ;;  %5241 = vmatprep.subr.bf16.mxu1 %v6765_v61 }
 0x55a   :  { %v1513_v26 = vpop.f32.mrb[8].mxu0  ;;  %v1584_v14 = vpop.f32.mrb[8].mxu1 }
 0x55b   :  { %v5920_v24 = vadd.f32 %v1513_v26, %v6690_v36  ;;  %v1515_v27 = vpop.f32.mrb[9].mxu0  ;;  %v1586_v30 = vpop.f32.mrb[9].mxu1  ;;  %v5936_v28 = vadd.f32 %v1584_v14, %v6707_v60 }
 0x55c   :  { %v5921_v45 = vadd.f32 %v1515_v27, %v6694_v39  ;;  %v5937_v15 = vadd.f32 %v1586_v30, %v6701_v53 }
 0x55d   :  { %v4721_v59 = vmul.f32 -1.442695, %v5920_v24 }
 0x55e   :  { %v4722_v63 = vmul.f32 -1.442695, %v5921_v45  ;;  %v4723_v19 = vmul.f32 -1.442695, %v5937_v15 }
 0x55f   :  { %6114 = vpow2.f32 %v4721_v59 }
 0x560   :  { %6116 = vpow2.f32 %v4722_v63 }
 0x561   :  { %6118 = vpow2.f32 %v4723_v19 }
 0x562   :  { %6120 = vtanh.f32 %v5936_v28 }
 0x569   :  { %v6115_v48 = vpop.eup %6114 }
 0x56a   :  { %v6117_v29 = vpop.eup %6116  ;;  %v1596_v61 = vadd.f32 1.0, %v6115_v48 }
 0x56b   :  { %v1602_v54 = vadd.f32 1.0, %v6117_v29  ;;  %v6119_v47 = vpop.eup %6118 }
 0x56c   :  { %6122 = vrcp.f32 %v1596_v61  ;;  %v6121_v62 = vpop.eup %6120  ;;  %v1609_v24 = vadd.f32 1.0, %v6119_v47 }
 0x56d   :  { %6124 = vrcp.f32 %v1602_v54 }
 0x56e   :  { %6126 = vrcp.f32 %v1609_v24 }
 0x576   :  { %v6123_v51 = vpop.eup %6122 }
 0x577   :  { %v6125_v12 = vpop.eup %6124  ;;  %v1613_v26 = vmul.f32 %v6123_v51, %v6121_v62 }
 0x578   :  { %v1612_v27 = vmul.f32 %v6125_v12, %v6912_v52  ;;  %v6127_v14 = vpop.eup %6126 }
 0x57a   :  { %v6958_v30 = vadd.f32 %v1613_v26, %v1612_v27 }
 0x57c   :  { %6128 = vtanh.f32 %v6958_v30 }
 0x586   :  { %v6129_v45 = vpop.eup %6128 }
 0x587   :  { %v6961_v59 = vmul.f32 %v6129_v45, %v6127_v14 }
 0x589   :  { %1751 = vmatmul.mubr.f32.vlgmr.msra.gmra.mrb[10].mxu0 %v6961_v59  ;;  %1822 = vmatmul.mubr.f32.vlgmr.msra.gmra.mrb[10].mxu1 %v6961_v59 }
 0x58a   :  { %5211 = vmatpush1.bf16.msra.mxu0 %v6767_v0  ;;  %5243 = vmatpush1.bf16.msra.mxu1 %v6770_v46 }
 0x58b   :  { %5213 = vmatprep.subr.bf16.mxu0 %v6775_v58  ;;  %5245 = vmatprep.subr.bf16.mxu1 %v6777_v6 }
 0x58c   :  { %1989 = vmatprep.mubr.f32.mxu0 %v6433_v1  ;;  %2060 = vmatprep.mubr.f32.mxu1 %v6433_v1 }
 0x58e   :  { %5215 = vmatpush1.bf16.msra.mxu0 %v6779_v8  ;;  %5247 = vmatpush1.bf16.msra.mxu1 %v6782_v13 }
 0x58f   :  { %5217 = vmatprep.subr.bf16.mxu0 %v6833_v42  ;;  %5249 = vmatprep.subr.bf16.mxu1 %v6835_v57 }
 0x592   :  { %5219 = vmatpush1.bf16.msra.mxu0 %v6837_v43  ;;  %5251 = vmatpush1.bf16.msra.mxu1 %v6840_v50 }
 0x593   :  { %5221 = vmatprep.subr.bf16.mxu0 %v6845_v3  ;;  %5253 = vmatprep.subr.bf16.mxu1 %v6847_v7 }
 0x596   :  { %5223 = vmatpush1.bf16.msra.mxu0 %v6849_v11  ;;  %5255 = vmatpush1.bf16.msra.mxu1 %v6852_v20 }
 0x597   :  { %5225 = vmatprep.subr.bf16.mxu0 %v6857_v33  ;;  %5257 = vmatprep.subr.bf16.mxu1 %v6859_v49 }
 0x59a   :  { %5227 = vmatpush1.bf16.msra.mxu0 %v6861_v55  ;;  %5259 = vmatpush1.bf16.msra.mxu1 %v6864_v5 }
 0x59b   :  { %5229 = vmatprep.subr.bf16.mxu0 %v6868_v23  ;;  %5261 = vmatprep.subr.bf16.mxu1 %v6871_v22 }
 0x59e   :  { %5231 = vmatpush1.bf16.msra.mxu0 %v6873_v34  ;;  %5263 = vmatpush1.bf16.msra.mxu1 %v6876_v44 }
 0x59f   :  { %5233 = vmatprep.subr.bf16.mxu0 %v6879_v2  ;;  %5265 = vmatprep.subr.bf16.mxu1 %v6881_v9 }
 0x5a2   :  { %5235 = vmatpush1.bf16.msra.mxu0 %v6884_v17  ;;  %5267 = vmatpush1.bf16.msra.mxu1 %v6888_v37 }
 0x5a3   :  { %5237 = vmatprep.subr.bf16.mxu0 %v6890_v41  ;;  %5269 = vmatprep.subr.bf16.mxu1 %v6893_v10 }
 0x5a6   :  { %5239 = vmatpush1.bf16.msra.mxu0 %v6896_v16  ;;  %5271 = vmatpush1.bf16.msra.mxu1 %v6900_v18 }
 0x65c   :  { %v1752_v0 = vpop.f32.mrb[10].mxu0  ;;  %v1823_v46 = vpop.f32.mrb[10].mxu1 }
 0x65d   :  { %v5922_v58 = vadd.f32 %v1752_v0, %v6690_v36  ;;  %v1754_v6 = vpop.f32.mrb[11].mxu0  ;;  %v1825_v8 = vpop.f32.mrb[11].mxu1  ;;  %v5938_v28 = vadd.f32 %v1823_v46, %v6707_v60 }
 0x65e   :  { %v5923_v13 = vadd.f32 %v1754_v6, %v6694_v39  ;;  %v5939_v15 = vadd.f32 %v1825_v8, %v6701_v53  ;;  %v2105_v6 = vld [vmem:[#allocation10 + $0x28] sm:$0xff] }
 0x65f   :  { %v4724_v52 = vmul.f32 -1.442695, %v5922_v58  ;;  %v2101_v58 = vld [vmem:[#allocation10 + $0x8] sm:$0xff] }
 0x660   :  { %v4725_v63 = vmul.f32 -1.442695, %v5923_v13  ;;  %v4726_v19 = vmul.f32 -1.442695, %v5939_v15  ;;  %v5272_v8 = vpack.c.bf16 %v2105_v6, %v2101_v58  ;;  %v2107_v13 = vld [vmem:[#allocation10 + $0x38] sm:$0xff] }
 0x661   :  { %6130 = vpow2.f32 %v4724_v52  ;;  %v2100_v52 = vld [vmem:[#allocation10] sm:$0xff] }
 0x662   :  { %6132 = vpow2.f32 %v4725_v63  ;;  %v2104_v63 = vld [vmem:[#allocation10 + $0x20] sm:$0xff]  ;;  %5273 = vmatprep.subr.bf16.mxu0 %v5272_v8 }
 0x663   :  { %6134 = vpow2.f32 %v4726_v19  ;;  %v5274_v19 = vpack.c.bf16 %v2104_v63, %v2100_v52  ;;  %v2346_v63 = vld [vmem:[#allocation8 + $0x200] sm:$0xff] }
 0x664   :  { %6136 = vtanh.f32 %v5938_v28  ;;  %v2102_v28 = vld [vmem:[#allocation10 + $0x10] sm:$0xff] }
 0x66b   :  { %v6131_v48 = vpop.eup %6130 }
 0x66c   :  { %v6133_v29 = vpop.eup %6132  ;;  %v1835_v61 = vadd.f32 1.0, %v6131_v48  ;;  %v2106_v48 = vld [vmem:[#allocation10 + $0x30] sm:$0xff] }
 0x66d   :  { %v1841_v54 = vadd.f32 1.0, %v6133_v29  ;;  %v6135_v47 = vpop.eup %6134  ;;  %v5306_v29 = vpack.c.bf16 %v2106_v48, %v2102_v28  ;;  %v2352_v28 = vld [vmem:[#allocation8 + $0x230] sm:$0xff]  ;;  %v2355_v48 = vld [vmem:[#allocation8 + $0x248] sm:$0xff] }
 0x66e   :  { %6138 = vrcp.f32 %v1835_v61  ;;  %v6137_v62 = vpop.eup %6136  ;;  %v1848_v24 = vadd.f32 1.0, %v6135_v47  ;;  %v2109_v61 = vld [vmem:[#allocation10 + $0x48] sm:$0xff]  ;;  %v2111_v47 = vld [vmem:[#allocation10 + $0x58] sm:$0xff] }
 0x66f   :  { %6140 = vrcp.f32 %v1841_v54  ;;  %v2113_v54 = vld [vmem:[#allocation10 + $0x68] sm:$0xff] }
 0x670   :  { %6142 = vrcp.f32 %v1848_v24 }
 0x678   :  { %v6139_v51 = vpop.eup %6138 }
 0x679   :  { %v6141_v12 = vpop.eup %6140  ;;  %v1852_v26 = vmul.f32 %v6139_v51, %v6137_v62  ;;  %v5276_v62 = vpack.c.bf16 %v2113_v54, %v2109_v61  ;;  %v2115_v51 = vld [vmem:[#allocation10 + $0x78] sm:$0xff] }
 0x67a   :  { %v1851_v27 = vmul.f32 %v6141_v12, %v6958_v30  ;;  %v6143_v45 = vpop.eup %6142  ;;  %v2103_v30 = vld [vmem:[#allocation10 + $0x18] sm:$0xff]  ;;  %v2108_v12 = vld [vmem:[#allocation10 + $0x40] sm:$0xff]  ;;  %v5308_v24 = vpack.c.bf16 %v2115_v51, %v2111_v47 }
 0x67b   :  { %v5304_v15 = vpack.c.bf16 %v2107_v13, %v2103_v30  ;;  %v2357_v61 = vld [vmem:[#allocation8 + $0x258] sm:$0xff] }
 0x67c   :  { %v7002_v14 = vadd.f32 %v1852_v26, %v1851_v27  ;;  %v2112_v26 = vld [vmem:[#allocation10 + $0x60] sm:$0xff]  ;;  %v2361_v54 = vld [vmem:[#allocation8 + $0x278] sm:$0xff] }
 0x67d   :  { %5305 = vmatprep.subr.bf16.mxu1 %v5304_v15  ;;  %v5278_v27 = vpack.c.bf16 %v2112_v26, %v2108_v12  ;;  %v2350_v15 = vld [vmem:[#allocation8 + $0x220] sm:$0xff] }
 0x67e   :  { %6144 = vtanh.f32 %v7002_v14  ;;  %v5338_v51 = vpack.c.bf16 %v2350_v15, %v2346_v63  ;;  %v2354_v26 = vld [vmem:[#allocation8 + $0x240] sm:$0xff] }
 0x688   :  { %v6145_v0 = vpop.eup %6144 }
 0x689   :  { %v7005_v46 = vmul.f32 %v6145_v0, %v6143_v45  ;;  %v2110_v45 = vld [vmem:[#allocation10 + $0x50] sm:$0xff] }
 0x68a   :  { %v2114_v0 = vld [vmem:[#allocation10 + $0x70] sm:$0xff] }
 0x68b   :  { %1990 = vmatmul.mubr.f32.vlgmr.msra.gmra.mrb[12].mxu0 %v7005_v46  ;;  %2061 = vmatmul.mubr.f32.vlgmr.msra.gmra.mrb[12].mxu1 %v7005_v46  ;;  %v5310_v58 = vpack.c.bf16 %v2114_v0, %v2110_v45  ;;  %v5372_v45 = vpack.c.bf16 %v2361_v54, %v2357_v61  ;;  %v2356_v0 = vld [vmem:[#allocation8 + $0x250] sm:$0xff] }
 0x68c   :  { %2228 = vmatprep.mubr.f32.mxu0 %v6433_v1  ;;  %2299 = vmatprep.mubr.f32.mxu1 %v6433_v1  ;;  %v2380_v61 = vld [vmem:[#allocation8 + $0x310] sm:$0xff] }
 0x68d   :  { %5275 = vmatpush1.bf16.msra.mxu0 %v5274_v19  ;;  %5307 = vmatpush1.bf16.msra.mxu1 %v5306_v29  ;;  %v2348_v19 = vld [vmem:[#allocation8 + $0x210] sm:$0xff]  ;;  %v2359_v29 = vld [vmem:[#allocation8 + $0x268] sm:$0xff] }
 0x68e   :  { %5277 = vmatprep.subr.bf16.mxu0 %v5276_v62  ;;  %5309 = vmatprep.subr.bf16.mxu1 %v5308_v24  ;;  %v5370_v12 = vpack.c.bf16 %v2352_v28, %v2348_v19  ;;  %v2358_v24 = vld [vmem:[#allocation8 + $0x260] sm:$0xff]  ;;  %v2384_v54 = vld [vmem:[#allocation8 + $0x330] sm:$0xff] }
 0x68f   :  { %v2378_v19 = vld [vmem:[#allocation8 + $0x300] sm:$0xff] }
 0x690   :  { %v2382_v28 = vld [vmem:[#allocation8 + $0x320] sm:$0xff] }
 0x691   :  { %5279 = vmatpush1.bf16.msra.mxu0 %v5278_v27  ;;  %5311 = vmatpush1.bf16.msra.mxu1 %v5310_v58  ;;  %v5340_v27 = vpack.c.bf16 %v2359_v29, %v2355_v48  ;;  %v2360_v58 = vld [vmem:[#allocation8 + $0x270] sm:$0xff] }
 0x692   :  { %5281 = vmatprep.subr.bf16.mxu0 %v6833_v42  ;;  %5313 = vmatprep.subr.bf16.mxu1 %v6835_v57  ;;  %v2347_v42 = vld [vmem:[#allocation8 + $0x208] sm:$0xff] }
 0x693   :  { %v2351_v57 = vld [vmem:[#allocation8 + $0x228] sm:$0xff] }
 0x695   :  { %5283 = vmatpush1.bf16.msra.mxu0 %v6837_v43  ;;  %5315 = vmatpush1.bf16.msra.mxu1 %v6840_v50  ;;  %v2349_v43 = vld [vmem:[#allocation8 + $0x218] sm:$0xff] }
 0x696   :  { %5285 = vmatprep.subr.bf16.mxu0 %v6845_v3  ;;  %5317 = vmatprep.subr.bf16.mxu1 %v6847_v7  ;;  %v2353_v50 = vld [vmem:[#allocation8 + $0x238] sm:$0xff]  ;;  %v5336_v3 = vpack.c.bf16 %v2351_v57, %v2347_v42  ;;  %v2363_v42 = vld [vmem:[#allocation8 + $0x288] sm:$0xff] }
 0x697   :  { %v5368_v7 = vpack.c.bf16 %v2353_v50, %v2349_v43  ;;  %v2367_v57 = vld [vmem:[#allocation8 + $0x2a8] sm:$0xff]  ;;  %v2365_v43 = vld [vmem:[#allocation8 + $0x298] sm:$0xff] }
 0x698   :  { %v2369_v50 = vld [vmem:[#allocation8 + $0x2b8] sm:$0xff] }
 0x699   :  { %5287 = vmatpush1.bf16.msra.mxu0 %v6849_v11  ;;  %5319 = vmatpush1.bf16.msra.mxu1 %v6852_v20 }
 0x69a   :  { %5289 = vmatprep.subr.bf16.mxu0 %v6857_v33  ;;  %5321 = vmatprep.subr.bf16.mxu1 %v6859_v49 }
 0x69d   :  { %5291 = vmatpush1.bf16.msra.mxu0 %v6861_v55  ;;  %5323 = vmatpush1.bf16.msra.mxu1 %v6864_v5 }
 0x69e   :  { %5293 = vmatprep.subr.bf16.mxu0 %v6868_v23  ;;  %5325 = vmatprep.subr.bf16.mxu1 %v6871_v22 }
 0x6a1   :  { %5295 = vmatpush1.bf16.msra.mxu0 %v6873_v34  ;;  %5327 = vmatpush1.bf16.msra.mxu1 %v6876_v44 }
 0x6a2   :  { %5297 = vmatprep.subr.bf16.mxu0 %v6879_v2  ;;  %5329 = vmatprep.subr.bf16.mxu1 %v6881_v9 }
 0x6a5   :  { %5299 = vmatpush1.bf16.msra.mxu0 %v6884_v17  ;;  %5331 = vmatpush1.bf16.msra.mxu1 %v6888_v37 }
 0x6a6   :  { %5301 = vmatprep.subr.bf16.mxu0 %v6890_v41  ;;  %5333 = vmatprep.subr.bf16.mxu1 %v6893_v10 }
 0x6a9   :  { %5303 = vmatpush1.bf16.msra.mxu0 %v6896_v16  ;;  %5335 = vmatpush1.bf16.msra.mxu1 %v6900_v18 }
 0x6aa   :  { %5337 = vmatprep.subr.bf16.mxu0 %v5336_v3  ;;  %5369 = vmatprep.subr.bf16.mxu1 %v5368_v7  ;;  %v5342_v3 = vpack.c.bf16 %v2358_v24, %v2354_v26  ;;  %v5374_v7 = vpack.c.bf16 %v2360_v58, %v2356_v0  ;;  %v5354_v26 = vpack.c.bf16 %v2382_v28, %v2378_v19  ;;  %v2698_v28 = vld [vmem:[#allocation10 + $0x210] sm:$0xff] }
 0x6ab   :  { %v5386_v24 = vpack.c.bf16 %v2384_v54, %v2380_v61  ;;  %v2709_v61 = vld [vmem:[#allocation10 + $0x268] sm:$0xff]  ;;  %v2707_v54 = vld [vmem:[#allocation10 + $0x258] sm:$0xff] }
 0x75e   :  { %v1991_v11 = vpop.f32.mrb[12].mxu0  ;;  %v2062_v20 = vpop.f32.mrb[12].mxu1 }
 0x75f   :  { %v5924_v33 = vadd.f32 %v1991_v11, %v6690_v36  ;;  %v1993_v49 = vpop.f32.mrb[13].mxu0  ;;  %v2064_v55 = vpop.f32.mrb[13].mxu1  ;;  %v5940_v2 = vadd.f32 %v2062_v20, %v6707_v60  ;;  %v2362_v11 = vld [vmem:[#allocation8 + $0x280] sm:$0xff] }
 0x760   :  { %v5925_v5 = vadd.f32 %v1993_v49, %v6694_v39  ;;  %v5941_v34 = vadd.f32 %v2064_v55, %v6701_v53  ;;  %v2366_v20 = vld [vmem:[#allocation8 + $0x2a0] sm:$0xff]  ;;  %v5376_v49 = vpack.c.bf16 %v2369_v50, %v2365_v43  ;;  %v2364_v55 = vld [vmem:[#allocation8 + $0x290] sm:$0xff]  ;;  %v2395_v43 = vld [vmem:[#allocation8 + $0x388] sm:$0xff] }
 0x761   :  { %v4727_v23 = vmul.f32 -1.442695, %v5924_v33  ;;  %v5344_v33 = vpack.c.bf16 %v2367_v57, %v2363_v42  ;;  %v2388_v42 = vld [vmem:[#allocation8 + $0x350] sm:$0xff]  ;;  %v2399_v50 = vld [vmem:[#allocation8 + $0x3a8] sm:$0xff] }
 0x762   :  { %v4728_v22 = vmul.f32 -1.442695, %v5925_v5  ;;  %v4729_v44 = vmul.f32 -1.442695, %v5941_v34  ;;  %v2368_v5 = vld [vmem:[#allocation8 + $0x2b0] sm:$0xff]  ;;  %v2373_v34 = vld [vmem:[#allocation8 + $0x2d8] sm:$0xff] }
 0x763   :  { %6146 = vpow2.f32 %v4727_v23  ;;  %v2371_v23 = vld [vmem:[#allocation8 + $0x2c8] sm:$0xff]  ;;  %v2392_v57 = vld [vmem:[#allocation8 + $0x370] sm:$0xff] }
 0x764   :  { %6148 = vpow2.f32 %v4728_v22  ;;  %v2375_v22 = vld [vmem:[#allocation8 + $0x2e8] sm:$0xff] }
 0x765   :  { %6150 = vpow2.f32 %v4729_v44  ;;  %v2377_v44 = vld [vmem:[#allocation8 + $0x2f8] sm:$0xff] }
 0x766   :  { %6152 = vtanh.f32 %v5940_v2  ;;  %v5346_v2 = vpack.c.bf16 %v2366_v20, %v2362_v11  ;;  %v5390_v20 = vpack.c.bf16 %v2392_v57, %v2388_v42  ;;  %v2717_v42 = vld [vmem:[#allocation10 + $0x2a8] sm:$0xff]  ;;  %v2715_v57 = vld [vmem:[#allocation10 + $0x298] sm:$0xff] }
 0x76d   :  { %v6147_v9 = vpop.eup %6146 }
 0x76e   :  { %v6149_v17 = vpop.eup %6148  ;;  %v2074_v37 = vadd.f32 1.0, %v6147_v9  ;;  %v5378_v9 = vpack.c.bf16 %v2368_v5, %v2364_v55  ;;  %v5360_v55 = vpack.c.bf16 %v2399_v50, %v2395_v43  ;;  %v2719_v50 = vld [vmem:[#allocation10 + $0x2b8] sm:$0xff] }
 0x76f   :  { %v2080_v41 = vadd.f32 1.0, %v6149_v17  ;;  %v6151_v10 = vpop.eup %6150  ;;  %v2370_v17 = vld [vmem:[#allocation8 + $0x2c0] sm:$0xff] }
 0x770   :  { %6154 = vrcp.f32 %v2074_v37  ;;  %v6153_v16 = vpop.eup %6152  ;;  %v2087_v8 = vadd.f32 1.0, %v6151_v10  ;;  %v2374_v37 = vld [vmem:[#allocation8 + $0x2e0] sm:$0xff]  ;;  %v5380_v10 = vpack.c.bf16 %v2377_v44, %v2373_v34  ;;  %v2403_v34 = vld [vmem:[#allocation8 + $0x3c8] sm:$0xff] }
 0x771   :  { %6156 = vrcp.f32 %v2080_v41  ;;  %v5348_v41 = vpack.c.bf16 %v2375_v22, %v2371_v23  ;;  %v5350_v63 = vpack.c.bf16 %v2374_v37, %v2370_v17  ;;  %v2396_v23 = vld [vmem:[#allocation8 + $0x390] sm:$0xff]  ;;  %v2407_v44 = vld [vmem:[#allocation8 + $0x3e8] sm:$0xff] }
 0x772   :  { %6158 = vrcp.f32 %v2087_v8  ;;  %v2381_v8 = vld [vmem:[#allocation8 + $0x318] sm:$0xff]  ;;  %v2400_v22 = vld [vmem:[#allocation8 + $0x3b0] sm:$0xff] }
 0x773   :  { %v5394_v37 = vpack.c.bf16 %v2400_v22, %v2396_v23  ;;  %v2725_v23 = vld [vmem:[#allocation10 + $0x2e8] sm:$0xff]  ;;  %v2723_v22 = vld [vmem:[#allocation10 + $0x2d8] sm:$0xff] }
 0x77a   :  { %v6155_v18 = vpop.eup %6154 }
 0x77b   :  { %v6157_v6 = vpop.eup %6156  ;;  %v2091_v30 = vmul.f32 %v6155_v18, %v6153_v16  ;;  %v2372_v16 = vld [vmem:[#allocation8 + $0x2d0] sm:$0xff] }
 0x77c   :  { %v2090_v13 = vmul.f32 %v6157_v6, %v7002_v14  ;;  %v6159_v47 = vpop.eup %6158  ;;  %v2376_v18 = vld [vmem:[#allocation8 + $0x2f0] sm:$0xff]  ;;  %v2379_v6 = vld [vmem:[#allocation8 + $0x308] sm:$0xff] }
 0x77d   :  { %v5382_v15 = vpack.c.bf16 %v2376_v18, %v2372_v16  ;;  %v2406_v18 = vld [vmem:[#allocation8 + $0x3e0] sm:$0xff] }
 0x77e   :  { %v7040_v52 = vadd.f32 %v2091_v30, %v2090_v13  ;;  %v2383_v30 = vld [vmem:[#allocation8 + $0x328] sm:$0xff]  ;;  %v2385_v13 = vld [vmem:[#allocation8 + $0x338] sm:$0xff] }
 0x77f   :  { %v5352_v48 = vpack.c.bf16 %v2383_v30, %v2379_v6  ;;  %v5384_v29 = vpack.c.bf16 %v2385_v13, %v2381_v8  ;;  %v2404_v6 = vld [vmem:[#allocation8 + $0x3d0] sm:$0xff] }
 0x780   :  { %6160 = vtanh.f32 %v7040_v52  ;;  %v2408_v30 = vld [vmem:[#allocation8 + $0x3f0] sm:$0xff] }
 0x781   :  { %v5398_v13 = vpack.c.bf16 %v2408_v30, %v2404_v6  ;;  %v2733_v6 = vld [vmem:[#allocation10 + $0x328] sm:$0xff]  ;;  %v2731_v30 = vld [vmem:[#allocation10 + $0x318] sm:$0xff] }
 0x78a   :  { %v6161_v62 = vpop.eup %6160 }
 0x78b   :  { %v7043_v14 = vmul.f32 %v6161_v62, %v6159_v47  ;;  %v2387_v47 = vld [vmem:[#allocation8 + $0x348] sm:$0xff] }
 0x78c   :  { %v2391_v62 = vld [vmem:[#allocation8 + $0x368] sm:$0xff] }
 0x78d   :  { %2229 = vmatmul.mubr.f32.vlgmr.msra.gmra.mrb[14].mxu0 %v7043_v14  ;;  %2300 = vmatmul.mubr.f32.vlgmr.msra.gmra.mrb[14].mxu1 %v7043_v14  ;;  %v5356_v0 = vpack.c.bf16 %v2391_v62, %v2387_v47  ;;  %v2711_v62 = vld [vmem:[#allocation10 + $0x278] sm:$0xff] }
 0x78e   :  { %5339 = vmatpush1.bf16.msra.mxu0 %v5338_v51  ;;  %5371 = vmatpush1.bf16.msra.mxu1 %v5370_v12  ;;  %v2389_v51 = vld [vmem:[#allocation8 + $0x358] sm:$0xff] }
 0x78f   :  { %5341 = vmatprep.subr.bf16.mxu0 %v5340_v27  ;;  %5373 = vmatprep.subr.bf16.mxu1 %v5372_v45  ;;  %v2393_v12 = vld [vmem:[#allocation8 + $0x378] sm:$0xff]  ;;  %v2386_v27 = vld [vmem:[#allocation8 + $0x340] sm:$0xff] }
 0x790   :  { %2497 = vmatprep.mubr.f32.mxu0 %v6433_v1  ;;  %2610 = vmatprep.mubr.f32.mxu1 %v6433_v1  ;;  %v2390_v45 = vld [vmem:[#allocation8 + $0x360] sm:$0xff]  ;;  %v5388_v58 = vpack.c.bf16 %v2393_v12, %v2389_v51 }
 0x791   :  { %v5358_v11 = vpack.c.bf16 %v2390_v45, %v2386_v27  ;;  %v2704_v51 = vld [vmem:[#allocation10 + $0x240] sm:$0xff]  ;;  %v2706_v27 = vld [vmem:[#allocation10 + $0x250] sm:$0xff] }
 0x792   :  { %5343 = vmatpush1.bf16.msra.mxu0 %v5342_v3  ;;  %5375 = vmatpush1.bf16.msra.mxu1 %v5374_v7  ;;  %v2397_v3 = vld [vmem:[#allocation8 + $0x398] sm:$0xff]  ;;  %v2708_v12 = vld [vmem:[#allocation10 + $0x260] sm:$0xff]  ;;  %v2710_v45 = vld [vmem:[#allocation10 + $0x270] sm:$0xff] }
 0x793   :  { %5345 = vmatprep.subr.bf16.mxu0 %v5344_v33  ;;  %5377 = vmatprep.subr.bf16.mxu1 %v5376_v49  ;;  %v2401_v7 = vld [vmem:[#allocation8 + $0x3b8] sm:$0xff]  ;;  %v2394_v33 = vld [vmem:[#allocation8 + $0x380] sm:$0xff] }
 0x794   :  { %v2398_v49 = vld [vmem:[#allocation8 + $0x3a0] sm:$0xff]  ;;  %v5392_v5 = vpack.c.bf16 %v2401_v7, %v2397_v3 }
 0x795   :  { %v5362_v17 = vpack.c.bf16 %v2398_v49, %v2394_v33  ;;  %v2712_v3 = vld [vmem:[#allocation10 + $0x280] sm:$0xff]  ;;  %v2714_v33 = vld [vmem:[#allocation10 + $0x290] sm:$0xff] }
 0x796   :  { %5347 = vmatpush1.bf16.msra.mxu0 %v5346_v2  ;;  %5379 = vmatpush1.bf16.msra.mxu1 %v5378_v9  ;;  %v2405_v2 = vld [vmem:[#allocation8 + $0x3d8] sm:$0xff]  ;;  %v2716_v7 = vld [vmem:[#allocation10 + $0x2a0] sm:$0xff]  ;;  %v2718_v49 = vld [vmem:[#allocation10 + $0x2b0] sm:$0xff] }
 0x797   :  { %5349 = vmatprep.subr.bf16.mxu0 %v5348_v41  ;;  %5381 = vmatprep.subr.bf16.mxu1 %v5380_v10  ;;  %v2409_v9 = vld [vmem:[#allocation8 + $0x3f8] sm:$0xff]  ;;  %v2402_v41 = vld [vmem:[#allocation8 + $0x3c0] sm:$0xff]  ;;  %v5364_v10 = vpack.c.bf16 %v2407_v44, %v2403_v34 }
 0x798   :  { %v5396_v16 = vpack.c.bf16 %v2409_v9, %v2405_v2  ;;  %v5366_v8 = vpack.c.bf16 %v2406_v18, %v2402_v41  ;;  %v2727_v44 = vld [vmem:[#allocation10 + $0x2f8] sm:$0xff]  ;;  %v2720_v2 = vld [vmem:[#allocation10 + $0x2c0] sm:$0xff]  ;;  %v2722_v41 = vld [vmem:[#allocation10 + $0x2d0] sm:$0xff] }
 0x799   :  { %v2724_v9 = vld [vmem:[#allocation10 + $0x2e0] sm:$0xff] }
 0x79a   :  { %5351 = vmatpush1.bf16.msra.mxu0 %v5350_v63  ;;  %5383 = vmatpush1.bf16.msra.mxu1 %v5382_v15  ;;  %v2696_v63 = vld [vmem:[#allocation10 + $0x200] sm:$0xff] }
 0x79b   :  { %5353 = vmatprep.subr.bf16.mxu0 %v5352_v48  ;;  %5385 = vmatprep.subr.bf16.mxu1 %v5384_v29  ;;  %v2702_v48 = vld [vmem:[#allocation10 + $0x230] sm:$0xff]  ;;  %v2705_v29 = vld [vmem:[#allocation10 + $0x248] sm:$0xff] }
 0x79c   :  { %v7089_v47 = vpack.c.bf16 %v2709_v61, %v2705_v29 }
 0x79e   :  { %5355 = vmatpush1.bf16.msra.mxu0 %v5354_v26  ;;  %5387 = vmatpush1.bf16.msra.mxu1 %v5386_v24  ;;  %v7091_v26 = vpack.c.bf16 %v2711_v62, %v2707_v54  ;;  %v7093_v24 = vpack.c.bf16 %v2708_v12, %v2704_v51  ;;  %v2739_v54 = vld [vmem:[#allocation10 + $0x358] sm:$0xff]  ;;  %v2736_v51 = vld [vmem:[#allocation10 + $0x340] sm:$0xff] }
 0x79f   :  { %5357 = vmatprep.subr.bf16.mxu0 %v5356_v0  ;;  %5389 = vmatprep.subr.bf16.mxu1 %v5388_v58  ;;  %v7096_v0 = vpack.c.bf16 %v2710_v45, %v2706_v27  ;;  %v2713_v58 = vld [vmem:[#allocation10 + $0x288] sm:$0xff]  ;;  %v2743_v62 = vld [vmem:[#allocation10 + $0x378] sm:$0xff]  ;;  %v2740_v27 = vld [vmem:[#allocation10 + $0x360] sm:$0xff] }
 0x7a0   :  { %v7101_v43 = vpack.c.bf16 %v2717_v42, %v2713_v58  ;;  %v7137_v12 = vpack.c.bf16 %v2743_v62, %v2739_v54  ;;  %v2738_v45 = vld [vmem:[#allocation10 + $0x350] sm:$0xff]  ;;  %v7140_v42 = vpack.c.bf16 %v2740_v27, %v2736_v51 }
 0x7a1   :  { %v2742_v58 = vld [vmem:[#allocation10 + $0x370] sm:$0xff] }
 0x7a2   :  { %5359 = vmatpush1.bf16.msra.mxu0 %v5358_v11  ;;  %5391 = vmatpush1.bf16.msra.mxu1 %v5390_v20  ;;  %v7103_v11 = vpack.c.bf16 %v2719_v50, %v2715_v57  ;;  %v7105_v20 = vpack.c.bf16 %v2716_v7, %v2712_v3  ;;  %v2745_v57 = vld [vmem:[#allocation10 + $0x388] sm:$0xff]  ;;  %v2747_v3 = vld [vmem:[#allocation10 + $0x398] sm:$0xff]  ;;  %v7144_v7 = vpack.c.bf16 %v2742_v58, %v2738_v45 }
 0x7a3   :  { %5361 = vmatprep.subr.bf16.mxu0 %v5360_v55  ;;  %5393 = vmatprep.subr.bf16.mxu1 %v5392_v5  ;;  %v7108_v55 = vpack.c.bf16 %v2718_v49, %v2714_v33  ;;  %v2721_v5 = vld [vmem:[#allocation10 + $0x2c8] sm:$0xff]  ;;  %v2751_v49 = vld [vmem:[#allocation10 + $0x3b8] sm:$0xff] }
 0x7a4   :  { %v7113_v34 = vpack.c.bf16 %v2725_v23, %v2721_v5  ;;  %v2749_v50 = vld [vmem:[#allocation10 + $0x3a8] sm:$0xff]  ;;  %v2744_v5 = vld [vmem:[#allocation10 + $0x380] sm:$0xff] }
 0x7a5   :  { %v7146_v33 = vpack.c.bf16 %v2749_v50, %v2745_v57  ;;  %v2748_v23 = vld [vmem:[#allocation10 + $0x3a0] sm:$0xff] }
 0x7a6   :  { %5363 = vmatpush1.bf16.msra.mxu0 %v5362_v17  ;;  %5395 = vmatpush1.bf16.msra.mxu1 %v5394_v37  ;;  %v7115_v17 = vpack.c.bf16 %v2727_v44, %v2723_v22  ;;  %v7117_v37 = vpack.c.bf16 %v2724_v9, %v2720_v2  ;;  %v7149_v22 = vpack.c.bf16 %v2751_v49, %v2747_v3  ;;  %v2746_v44 = vld [vmem:[#allocation10 + $0x390] sm:$0xff] }
 0x7a7   :  { %5365 = vmatprep.subr.bf16.mxu0 %v5364_v10  ;;  %5397 = vmatprep.subr.bf16.mxu1 %v5396_v16  ;;  %v2726_v10 = vld [vmem:[#allocation10 + $0x2f0] sm:$0xff]  ;;  %v2729_v16 = vld [vmem:[#allocation10 + $0x308] sm:$0xff]  ;;  %v7152_v9 = vpack.c.bf16 %v2748_v23, %v2744_v5 }
 0x7a8   :  { %v7120_v18 = vpack.c.bf16 %v2726_v10, %v2722_v41  ;;  %v2750_v2 = vld [vmem:[#allocation10 + $0x3b0] sm:$0xff]  ;;  %v2753_v10 = vld [vmem:[#allocation10 + $0x3c8] sm:$0xff] }
 0x7a9   :  { %v7156_v41 = vpack.c.bf16 %v2750_v2, %v2746_v44 }
 0x7aa   :  { %5367 = vmatpush1.bf16.msra.mxu0 %v5366_v8  ;;  %5399 = vmatpush1.bf16.msra.mxu1 %v5398_v13  ;;  %v2735_v8 = vld [vmem:[#allocation10 + $0x338] sm:$0xff]  ;;  %v7124_v13 = vpack.c.bf16 %v2733_v6, %v2729_v16  ;;  %v2757_v16 = vld [vmem:[#allocation10 + $0x3e8] sm:$0xff] }
 0x7ab   :  { %v2755_v6 = vld [vmem:[#allocation10 + $0x3d8] sm:$0xff] }
 0x7ad   :  { %2498 = vmatmul.mubr.f32.vlgmr.msra.gmra.mrb[16].mxu0 %v6713_v40  ;;  %2611 = vmatmul.mubr.f32.vlgmr.msra.gmra.mrb[16].mxu1 %v6713_v40  ;;  %v2697_v40 = vld [vmem:[#allocation10 + $0x208] sm:$0xff] }
 0x7ae   :  { %2503 = vmatprep.mubr.f32.mxu0 %v6433_v1  ;;  %2616 = vmatprep.mubr.f32.mxu1 %v6433_v1 }
 0x7b1   :  { %2504 = vmatmul.mubr.f32.gmra.mrb[18].mxu0 %v6757_v25  ;;  %2617 = vmatmul.mubr.f32.gmra.mrb[18].mxu1 %v6757_v25  ;;  %v2701_v25 = vld [vmem:[#allocation10 + $0x228] sm:$0xff] }
 0x7b2   :  { %2509 = vmatprep.mubr.f32.mxu0 %v6433_v1  ;;  %2622 = vmatprep.mubr.f32.mxu1 %v6433_v1 }
 0x7b5   :  { %2510 = vmatmul.mubr.f32.gmra.mrb[20].mxu0 %v6821_v21  ;;  %2623 = vmatmul.mubr.f32.gmra.mrb[20].mxu1 %v6821_v21  ;;  %v2699_v21 = vld [vmem:[#allocation10 + $0x218] sm:$0xff] }
 0x7b6   :  { %2515 = vmatprep.mubr.f32.mxu0 %v6433_v1  ;;  %2628 = vmatprep.mubr.f32.mxu1 %v6433_v1 }
 0x7b9   :  { %2516 = vmatmul.mubr.f32.gmra.mrb[22].mxu0 %v6915_v4  ;;  %2629 = vmatmul.mubr.f32.gmra.mrb[22].mxu1 %v6915_v4  ;;  %v7077_v4 = vpack.c.bf16 %v2701_v25, %v2697_v40  ;;  %v7126_v40 = vpack.c.bf16 %v2735_v8, %v2731_v30  ;;  %v2728_v25 = vld [vmem:[#allocation10 + $0x300] sm:$0xff]  ;;  %v7161_v30 = vpack.c.bf16 %v2757_v16, %v2753_v10  ;;  %v2759_v8 = vld [vmem:[#allocation10 + $0x3f8] sm:$0xff] }
 0x7ba   :  { %2521 = vmatprep.mubr.f32.mxu0 %v6433_v1  ;;  %2634 = vmatprep.mubr.f32.mxu1 %v6433_v1 }
 0x7bb   :  { %5401 = vmatprep.subr.bf16.mxu0 %v7077_v4 }
 0x7bd   :  { %2522 = vmatmul.mubr.f32.gmra.mrb[24].mxu0 %v6961_v59  ;;  %2635 = vmatmul.mubr.f32.gmra.mrb[24].mxu1 %v6961_v59  ;;  %v2703_v59 = vld [vmem:[#allocation10 + $0x238] sm:$0xff] }
 0x7be   :  { %2527 = vmatprep.mubr.f32.mxu0 %v6433_v1  ;;  %2640 = vmatprep.mubr.f32.mxu1 %v6433_v1  ;;  %v7079_v15 = vpack.c.bf16 %v2703_v59, %v2699_v21  ;;  %v2732_v21 = vld [vmem:[#allocation10 + $0x320] sm:$0xff]  ;;  %v2730_v59 = vld [vmem:[#allocation10 + $0x310] sm:$0xff] }
 0x7c0   :  { %5433 = vmatprep.subr.bf16.mxu1 %v7079_v15 }
 0x7c1   :  { %2528 = vmatmul.mubr.f32.gmra.mrb[26].mxu0 %v7005_v46  ;;  %2641 = vmatmul.mubr.f32.gmra.mrb[26].mxu1 %v7005_v46  ;;  %v2700_v46 = vld [vmem:[#allocation10 + $0x220] sm:$0xff] }
 0x7c2   :  { %2533 = vmatprep.mubr.f32.mxu0 %v6433_v1  ;;  %2646 = vmatprep.mubr.f32.mxu1 %v6433_v1  ;;  %v7081_v19 = vpack.c.bf16 %v2700_v46, %v2696_v63  ;;  %v7129_v63 = vpack.c.bf16 %v2732_v21, %v2728_v25  ;;  %v2734_v46 = vld [vmem:[#allocation10 + $0x330] sm:$0xff]  ;;  %v2752_v25 = vld [vmem:[#allocation10 + $0x3c0] sm:$0xff] }
 0x7c3   :  { %v7133_v29 = vpack.c.bf16 %v2734_v46, %v2730_v59  ;;  %v2756_v21 = vld [vmem:[#allocation10 + $0x3e0] sm:$0xff]  ;;  %v7163_v59 = vpack.c.bf16 %v2759_v8, %v2755_v6 }
 0x7c4   :  { %5403 = vmatpush1.bf16.msra.mxu0 %v7081_v19  ;;  %v7165_v46 = vpack.c.bf16 %v2756_v21, %v2752_v25 }
 0x7c5   :  { %2534 = vmatmul.mubr.f32.gmra.mrb[28].mxu0 %v7043_v14  ;;  %2647 = vmatmul.mubr.f32.gmra.mrb[28].mxu1 %v7043_v14  ;;  %v7084_v14 = vpack.c.bf16 %v2702_v48, %v2698_v28  ;;  %v2737_v28 = vld [vmem:[#allocation10 + $0x348] sm:$0xff] }
 0x7c6   :  { %2539 = vmatprep.mubr.f32.mxu0 %v6433_v1  ;;  %2652 = vmatprep.mubr.f32.mxu1 %v6433_v1  ;;  %v2741_v48 = vld [vmem:[#allocation10 + $0x368] sm:$0xff] }
 0x7c7   :  { %5435 = vmatpush1.bf16.msra.mxu1 %v7084_v14  ;;  %5405 = vmatprep.subr.bf16.mxu0 %v7089_v47  ;;  %v7135_v61 = vpack.c.bf16 %v2741_v48, %v2737_v28  ;;  %v2754_v28 = vld [vmem:[#allocation10 + $0x3d0] sm:$0xff] }
 0x7c8   :  { %5437 = vmatprep.subr.bf16.mxu1 %v7091_v26  ;;  %5407 = vmatpush1.bf16.msra.mxu0 %v7093_v24  ;;  %v2758_v48 = vld [vmem:[#allocation10 + $0x3f0] sm:$0xff] }
 0x7c9   :  { %5409 = vmatprep.subr.bf16.mxu0 %v7101_v43  ;;  %v7168_v54 = vpack.c.bf16 %v2758_v48, %v2754_v28 }
 0x7cb   :  { %5439 = vmatpush1.bf16.msra.mxu1 %v7096_v0 }
 0x7cc   :  { %5441 = vmatprep.subr.bf16.mxu1 %v7103_v11  ;;  %5411 = vmatpush1.bf16.msra.mxu0 %v7105_v20 }
 0x7cd   :  { %5413 = vmatprep.subr.bf16.mxu0 %v7113_v34 }
 0x7cf   :  { %5443 = vmatpush1.bf16.msra.mxu1 %v7108_v55 }
 0x7d0   :  { %5445 = vmatprep.subr.bf16.mxu1 %v7115_v17  ;;  %5415 = vmatpush1.bf16.msra.mxu0 %v7117_v37 }
 0x7d1   :  { %5417 = vmatprep.subr.bf16.mxu0 %v7124_v13 }
 0x7d3   :  { %5447 = vmatpush1.bf16.msra.mxu1 %v7120_v18 }
 0x7d4   :  { %5449 = vmatprep.subr.bf16.mxu1 %v7126_v40  ;;  %5419 = vmatpush1.bf16.msra.mxu0 %v7129_v63 }
 0x7d5   :  { %5421 = vmatprep.subr.bf16.mxu0 %v7135_v61 }
 0x7d7   :  { %5451 = vmatpush1.bf16.msra.mxu1 %v7133_v29 }
 0x7d8   :  { %5453 = vmatprep.subr.bf16.mxu1 %v7137_v12  ;;  %5423 = vmatpush1.bf16.msra.mxu0 %v7140_v42 }
 0x7d9   :  { %5425 = vmatprep.subr.bf16.mxu0 %v7146_v33 }
 0x7db   :  { %5455 = vmatpush1.bf16.msra.mxu1 %v7144_v7 }
 0x7dc   :  { %5457 = vmatprep.subr.bf16.mxu1 %v7149_v22  ;;  %5427 = vmatpush1.bf16.msra.mxu0 %v7152_v9 }
 0x7dd   :  { %5429 = vmatprep.subr.bf16.mxu0 %v7161_v30 }
 0x7df   :  { %5459 = vmatpush1.bf16.msra.mxu1 %v7156_v41 }
 0x7e0   :  { %5461 = vmatprep.subr.bf16.mxu1 %v7163_v59  ;;  %5431 = vmatpush1.bf16.msra.mxu0 %v7165_v46 }
 0x7e1   :  { %5465 = vmatprep.subr.bf16.mxu0 %v7077_v4 }
 0x7e3   :  { %5463 = vmatpush1.bf16.msra.mxu1 %v7168_v54 }
 0x7e4   :  { %5497 = vmatprep.subr.bf16.mxu1 %v7079_v15 }
 0x860   :  { %v2230_v62 = vpop.f32.mrb[14].mxu0  ;;  %v2301_v51 = vpop.f32.mrb[14].mxu1 }
 0x861   :  { %v5926_v27 = vadd.f32 %v2230_v62, %v6690_v36  ;;  %v2232_v45 = vpop.f32.mrb[15].mxu0  ;;  %v2303_v58 = vpop.f32.mrb[15].mxu1  ;;  %v5942_v23 = vadd.f32 %v2301_v51, %v6707_v60 }
 0x862   :  { %v5927_v57 = vadd.f32 %v2232_v45, %v6694_v39  ;;  %v5943_v49 = vadd.f32 %v2303_v58, %v6701_v53 }
 0x863   :  { %v4730_v50 = vmul.f32 -1.442695, %v5926_v27 }
 0x864   :  { %v4731_v3 = vmul.f32 -1.442695, %v5927_v57  ;;  %v4732_v5 = vmul.f32 -1.442695, %v5943_v49 }
 0x865   :  { %6162 = vpow2.f32 %v4730_v50 }
 0x866   :  { %6164 = vpow2.f32 %v4731_v3 }
 0x867   :  { %6166 = vpow2.f32 %v4732_v5 }
 0x868   :  { %6168 = vtanh.f32 %v5942_v23 }
 0x86f   :  { %v6163_v44 = vpop.eup %6162 }
 0x870   :  { %v6165_v2 = vpop.eup %6164  ;;  %v2313_v10 = vadd.f32 1.0, %v6163_v44 }
 0x871   :  { %v2319_v16 = vadd.f32 1.0, %v6165_v2  ;;  %v6167_v36 = vpop.eup %6166 }
 0x872   :  { %6170 = vrcp.f32 %v2313_v10  ;;  %v6169_v6 = vpop.eup %6168  ;;  %v2326_v21 = vadd.f32 1.0, %v6167_v36 }
 0x873   :  { %6172 = vrcp.f32 %v2319_v16 }
 0x874   :  { %6174 = vrcp.f32 %v2326_v21 }
 0x87c   :  { %v6171_v39 = vpop.eup %6170 }
 0x87d   :  { %v6173_v8 = vpop.eup %6172  ;;  %v2330_v25 = vmul.f32 %v6171_v39, %v6169_v6 }
 0x87e   :  { %v2329_v28 = vmul.f32 %v6173_v8, %v7040_v52  ;;  %v6175_v60 = vpop.eup %6174  ;;  %v4733_v52 = vld [vmem:[%s7657_s3 + $0x4] sm:$0xf] }
 0x87f   :  { %v7223_v51 = vrot.slane %v4733_v52, %v147_v32  ;;  %v7227_v27 = vrot.slane %v4733_v52, %v151_v35  ;;  %v7233_v44 = vrot.slane %v4733_v52, %v159_v38  ;;  %v7238_v35 = vrot.slane %v4733_v52, %v155_v56 }
 0x880   :  { %v2331_v53 = vadd.f32 %v2330_v25, %v2329_v28 }
 0x882   :  { %6176 = vtanh.f32 %v2331_v53  ;;  %2336 = vst [vmem:[#allocation12] sm:$0xff] %v2331_v53 }
 0x88c   :  { %v6177_v48 = vpop.eup %6176 }
 0x88d   :  { %v2333_v62 = vmul.f32 %v6177_v48, %v6175_v60 }
 0x88f   :  { %2540 = vmatmul.mubr.f32.gmra.mrb[30].mxu0 %v2333_v62  ;;  %2335 = vst [vmem:[#allocation11] sm:$0xff] %v2333_v62  ;;  %2653 = vmatmul.mubr.f32.gmra.mrb[30].mxu1 %v2333_v62  ;;  %v7247_v62 = vld [vmem:[%s7658_s4] ss:$0 sm:$0xff] }
 0x890   :  { %2824 = vmatprep.mubr.f32.mxu0 %v6433_v1  ;;  %2895 = vmatprep.mubr.f32.mxu1 %v6433_v1 }
 0x893   :  { %2825 = vmatmul.mubr.f32.vlgmr.msra.gmra.mrb[16].mxu0 %v6433_v1  ;;  %2896 = vmatmul.mubr.f32.vlgmr.msra.gmra.mrb[16].mxu1 %v6433_v1 }
 0x894   :  { %5467 = vmatpush1.bf16.msra.mxu0 %v7081_v19  ;;  %5499 = vmatpush1.bf16.msra.mxu1 %v7084_v14 }
 0x895   :  { %5469 = vmatprep.subr.bf16.mxu0 %v7089_v47  ;;  %5501 = vmatprep.subr.bf16.mxu1 %v7091_v26 }
 0x896   :  { %3063 = vmatprep.mubr.f32.mxu0 %v6433_v1  ;;  %3134 = vmatprep.mubr.f32.mxu1 %v6433_v1 }
 0x898   :  { %5471 = vmatpush1.bf16.msra.mxu0 %v7093_v24  ;;  %5503 = vmatpush1.bf16.msra.mxu1 %v7096_v0 }
 0x899   :  { %5473 = vmatprep.subr.bf16.mxu0 %v7101_v43  ;;  %5505 = vmatprep.subr.bf16.mxu1 %v7103_v11 }
 0x89c   :  { %5475 = vmatpush1.bf16.msra.mxu0 %v7105_v20  ;;  %5507 = vmatpush1.bf16.msra.mxu1 %v7108_v55 }
 0x89d   :  { %5477 = vmatprep.subr.bf16.mxu0 %v7113_v34  ;;  %5509 = vmatprep.subr.bf16.mxu1 %v7115_v17 }
 0x8a0   :  { %5479 = vmatpush1.bf16.msra.mxu0 %v7117_v37  ;;  %5511 = vmatpush1.bf16.msra.mxu1 %v7120_v18 }
 0x8a1   :  { %5481 = vmatprep.subr.bf16.mxu0 %v7124_v13  ;;  %5513 = vmatprep.subr.bf16.mxu1 %v7126_v40 }
 0x8a4   :  { %5483 = vmatpush1.bf16.msra.mxu0 %v7129_v63  ;;  %5515 = vmatpush1.bf16.msra.mxu1 %v7133_v29 }
 0x8a5   :  { %5485 = vmatprep.subr.bf16.mxu0 %v7135_v61  ;;  %5517 = vmatprep.subr.bf16.mxu1 %v7137_v12 }
 0x8a8   :  { %5487 = vmatpush1.bf16.msra.mxu0 %v7140_v42  ;;  %5519 = vmatpush1.bf16.msra.mxu1 %v7144_v7 }
 0x8a9   :  { %5489 = vmatprep.subr.bf16.mxu0 %v7146_v33  ;;  %5521 = vmatprep.subr.bf16.mxu1 %v7149_v22 }
 0x8ac   :  { %5491 = vmatpush1.bf16.msra.mxu0 %v7152_v9  ;;  %5523 = vmatpush1.bf16.msra.mxu1 %v7156_v41 }
 0x8ad   :  { %5493 = vmatprep.subr.bf16.mxu0 %v7161_v30  ;;  %5525 = vmatprep.subr.bf16.mxu1 %v7163_v59 }
 0x8b0   :  { %5495 = vmatpush1.bf16.msra.mxu0 %v7165_v46  ;;  %5527 = vmatpush1.bf16.msra.mxu1 %v7168_v54 }
 0x8b1   :  { %5529 = vmatprep.subr.bf16.mxu0 %v7077_v4  ;;  %5561 = vmatprep.subr.bf16.mxu1 %v7079_v15 }
 0x966   :  { %v2826_v45 = vpop.f32.mrb[16].mxu0  ;;  %v2897_v58 = vpop.f32.mrb[16].mxu1 }
 0x967   :  { %v5944_v57 = vadd.f32 %v2826_v45, %v7223_v51  ;;  %v2828_v50 = vpop.f32.mrb[17].mxu0  ;;  %v2899_v3 = vpop.f32.mrb[17].mxu1  ;;  %v5960_v10 = vadd.f32 %v2897_v58, %v7238_v35  ;;  %v7284_v58 = vld [vmem:[#allocation4] ss:$0 sm:$0xff] }
 0x968   :  { %v5945_v49 = vadd.f32 %v2828_v50, %v7227_v27  ;;  %v5961_v32 = vadd.f32 %v2899_v3, %v7233_v44 }
 0x969   :  { %v4734_v5 = vmul.f32 -1.442695, %v5944_v57 }
 0x96a   :  { %v4735_v23 = vmul.f32 -1.442695, %v5945_v49  ;;  %v4736_v2 = vmul.f32 -1.442695, %v5961_v32 }
 0x96b   :  { %6178 = vpow2.f32 %v4734_v5 }
 0x96c   :  { %6180 = vpow2.f32 %v4735_v23 }
 0x96d   :  { %6182 = vpow2.f32 %v4736_v2 }
 0x96e   :  { %6184 = vtanh.f32 %v5960_v10 }
 0x975   :  { %v6179_v16 = vpop.eup %6178 }
 0x976   :  { %v6181_v36 = vpop.eup %6180  ;;  %v2909_v6 = vadd.f32 1.0, %v6179_v16 }
 0x977   :  { %v2915_v39 = vadd.f32 1.0, %v6181_v36  ;;  %v6183_v38 = vpop.eup %6182 }
 0x978   :  { %6186 = vrcp.f32 %v2909_v6  ;;  %v6185_v8 = vpop.eup %6184  ;;  %v2922_v53 = vadd.f32 1.0, %v6183_v38 }
 0x979   :  { %6188 = vrcp.f32 %v2915_v39 }
 0x97a   :  { %6190 = vrcp.f32 %v2922_v53 }
 0x982   :  { %v6187_v25 = vpop.eup %6186 }
 0x983   :  { %v6189_v21 = vpop.eup %6188  ;;  %v2926_v28 = vmul.f32 %v6187_v25, %v6185_v8 }
 0x984   :  { %v2925_v31 = vmul.f32 0.0, %v6189_v21  ;;  %v6191_v60 = vpop.eup %6190 }
 0x986   :  { %v7241_v56 = vadd.f32 %v2926_v28, %v2925_v31 }
 0x988   :  { %6192 = vtanh.f32 %v7241_v56 }
 0x992   :  { %v6193_v48 = vpop.eup %6192 }
 0x993   :  { %v2929_v52 = vmul.f32 %v6193_v48, %v6191_v60 }
 0x995   :  { %3064 = vmatmul.mubr.f32.vlgmr.msra.gmra.mrb[18].mxu0 %v2929_v52  ;;  %3135 = vmatmul.mubr.f32.vlgmr.msra.gmra.mrb[18].mxu1 %v2929_v52  ;;  %v4623_v45 = vmul.f32 %v7247_v62, %v2929_v52 }
 0x996   :  { %5531 = vmatpush1.bf16.msra.mxu0 %v7081_v19  ;;  %5563 = vmatpush1.bf16.msra.mxu1 %v7084_v14 }
 0x997   :  { %4631 = vadd.xlane.f32.xlu0 %v4623_v45  ;;  %5533 = vmatprep.subr.bf16.mxu0 %v7089_v47 }
 0x998   :  { %5565 = vmatprep.subr.bf16.mxu1 %v7091_v26  ;;  %3302 = vmatprep.mubr.f32.mxu0 %v6433_v1 }
 0x999   :  { %3373 = vmatprep.mubr.f32.mxu1 %v6433_v1 }
 0x99a   :  { %5535 = vmatpush1.bf16.msra.mxu0 %v7093_v24  ;;  %5567 = vmatpush1.bf16.msra.mxu1 %v7096_v0 }
 0x99b   :  { %5537 = vmatprep.subr.bf16.mxu0 %v7101_v43  ;;  %5569 = vmatprep.subr.bf16.mxu1 %v7103_v11 }
 0x99e   :  { %5539 = vmatpush1.bf16.msra.mxu0 %v7105_v20  ;;  %5571 = vmatpush1.bf16.msra.mxu1 %v7108_v55 }
 0x99f   :  { %5541 = vmatprep.subr.bf16.mxu0 %v7113_v34  ;;  %5573 = vmatprep.subr.bf16.mxu1 %v7115_v17 }
 0x9a2   :  { %5543 = vmatpush1.bf16.msra.mxu0 %v7117_v37  ;;  %5575 = vmatpush1.bf16.msra.mxu1 %v7120_v18 }
 0x9a3   :  { %5545 = vmatprep.subr.bf16.mxu0 %v7124_v13  ;;  %5577 = vmatprep.subr.bf16.mxu1 %v7126_v40 }
 0x9a6   :  { %5547 = vmatpush1.bf16.msra.mxu0 %v7129_v63  ;;  %5579 = vmatpush1.bf16.msra.mxu1 %v7133_v29 }
 0x9a7   :  { %5549 = vmatprep.subr.bf16.mxu0 %v7135_v61  ;;  %5581 = vmatprep.subr.bf16.mxu1 %v7137_v12 }
 0x9aa   :  { %5551 = vmatpush1.bf16.msra.mxu0 %v7140_v42  ;;  %5583 = vmatpush1.bf16.msra.mxu1 %v7144_v7 }
 0x9ab   :  { %5553 = vmatprep.subr.bf16.mxu0 %v7146_v33  ;;  %5585 = vmatprep.subr.bf16.mxu1 %v7149_v22 }
 0x9ae   :  { %5555 = vmatpush1.bf16.msra.mxu0 %v7152_v9  ;;  %5587 = vmatpush1.bf16.msra.mxu1 %v7156_v41 }
 0x9af   :  { %5557 = vmatprep.subr.bf16.mxu0 %v7161_v30  ;;  %5589 = vmatprep.subr.bf16.mxu1 %v7163_v59 }
 0x9b2   :  { %5559 = vmatpush1.bf16.msra.mxu0 %v7165_v46  ;;  %5591 = vmatpush1.bf16.msra.mxu1 %v7168_v54 }
 0x9b3   :  { %5593 = vmatprep.subr.bf16.mxu0 %v7077_v4  ;;  %5625 = vmatprep.subr.bf16.mxu1 %v7079_v15 }
 0xa24   :  { %v4632_v57 = vpop.xlane.xlu0 %4631 }
 0xa25   :  { %v4654_v50 = vadd.f32 %v7284_v58, %v4632_v57 }
 0xa27   :  { %4663 = vst.msk [vmem:[%s7660_s6] sm:$0xff] %vm4662_vm0, %v4654_v50 }
 0xa68   :  { %v3065_v3 = vpop.f32.mrb[18].mxu0  ;;  %v3136_v49 = vpop.f32.mrb[18].mxu1 }
 0xa69   :  { %v5946_v5 = vadd.f32 %v3065_v3, %v7223_v51  ;;  %v3067_v23 = vpop.f32.mrb[19].mxu0  ;;  %v3138_v32 = vpop.f32.mrb[19].mxu1  ;;  %v5962_v36 = vadd.f32 %v3136_v49, %v7238_v35  ;;  %v3655_v49 = vld [vmem:[#allocation10 + $0x218] sm:$0xff] }
 0xa6a   :  { %v5947_v4 = vadd.f32 %v3067_v23, %v7227_v27  ;;  %v5963_v10 = vadd.f32 %v3138_v32, %v7233_v44  ;;  %v3659_v23 = vld [vmem:[#allocation10 + $0x238] sm:$0xff]  ;;  %v3652_v32 = vld [vmem:[#allocation10 + $0x200] sm:$0xff] }
 0xa6b   :  { %v4737_v15 = vmul.f32 -1.442695, %v5946_v5 }
 0xa6c   :  { %v4738_v2 = vmul.f32 -1.442695, %v5947_v4  ;;  %v4739_v16 = vmul.f32 -1.442695, %v5963_v10  ;;  %v3656_v4 = vld [vmem:[#allocation10 + $0x220] sm:$0xff]  ;;  %v3654_v10 = vld [vmem:[#allocation10 + $0x210] sm:$0xff] }
 0xa6d   :  { %6194 = vpow2.f32 %v4737_v15  ;;  %v7350_v15 = vpack.c.bf16 %v3659_v23, %v3655_v49  ;;  %v3690_v49 = vld [vmem:[#allocation10 + $0x330] sm:$0xff] }
 0xa6e   :  { %6196 = vpow2.f32 %v4738_v2  ;;  %v7352_v2 = vpack.c.bf16 %v3656_v4, %v3652_v32  ;;  %v3693_v32 = vld [vmem:[#allocation10 + $0x348] sm:$0xff] }
 0xa6f   :  { %6198 = vpow2.f32 %v4739_v16  ;;  %v3658_v16 = vld [vmem:[#allocation10 + $0x230] sm:$0xff]  ;;  %v3697_v4 = vld [vmem:[#allocation10 + $0x368] sm:$0xff] }
 0xa70   :  { %6200 = vtanh.f32 %v5962_v36  ;;  %v7355_v36 = vpack.c.bf16 %v3658_v16, %v3654_v10  ;;  %v3695_v10 = vld [vmem:[#allocation10 + $0x358] sm:$0xff]  ;;  %v7407_v16 = vpack.c.bf16 %v3697_v4, %v3693_v32 }
 0xa77   :  { %v6195_v6 = vpop.eup %6194 }
 0xa78   :  { %v6197_v39 = vpop.eup %6196  ;;  %v3148_v38 = vadd.f32 1.0, %v6195_v6  ;;  %v3661_v6 = vld [vmem:[#allocation10 + $0x248] sm:$0xff] }
 0xa79   :  { %v3154_v8 = vadd.f32 1.0, %v6197_v39  ;;  %v6199_v25 = vpop.eup %6198  ;;  %v3665_v39 = vld [vmem:[#allocation10 + $0x268] sm:$0xff] }
 0xa7a   :  { %6202 = vrcp.f32 %v3148_v38  ;;  %v6201_v21 = vpop.eup %6200  ;;  %v3161_v60 = vadd.f32 1.0, %v6199_v25  ;;  %v3663_v38 = vld [vmem:[#allocation10 + $0x258] sm:$0xff] }
 0xa7b   :  { %6204 = vrcp.f32 %v3154_v8  ;;  %v7360_v8 = vpack.c.bf16 %v3665_v39, %v3661_v6  ;;  %v3667_v25 = vld [vmem:[#allocation10 + $0x278] sm:$0xff]  ;;  %v3692_v39 = vld [vmem:[#allocation10 + $0x340] sm:$0xff] }
 0xa7c   :  { %6206 = vrcp.f32 %v3161_v60  ;;  %v3662_v60 = vld [vmem:[#allocation10 + $0x250] sm:$0xff]  ;;  %v3699_v6 = vld [vmem:[#allocation10 + $0x378] sm:$0xff] }
 0xa84   :  { %v6203_v28 = vpop.eup %6202 }
 0xa85   :  { %v6205_v53 = vpop.eup %6204  ;;  %v3165_v31 = vmul.f32 %v6203_v28, %v6201_v21  ;;  %v3660_v21 = vld [vmem:[#allocation10 + $0x240] sm:$0xff] }
 0xa86   :  { %v3164_v48 = vmul.f32 %v6205_v53, %v7241_v56  ;;  %v6207_v45 = vpop.eup %6206  ;;  %v3657_v56 = vld [vmem:[#allocation10 + $0x228] sm:$0xff]  ;;  %v3664_v28 = vld [vmem:[#allocation10 + $0x260] sm:$0xff]  ;;  %v7362_v53 = vpack.c.bf16 %v3667_v25, %v3663_v38  ;;  %v7410_v25 = vpack.c.bf16 %v3699_v6, %v3695_v10 }
 0xa87   :  { %v3696_v38 = vld [vmem:[#allocation10 + $0x360] sm:$0xff] }
 0xa88   :  { %v7296_v52 = vadd.f32 %v3165_v31, %v3164_v48  ;;  %v7364_v31 = vpack.c.bf16 %v3664_v28, %v3660_v21  ;;  %v3666_v48 = vld [vmem:[#allocation10 + $0x270] sm:$0xff]  ;;  %v7412_v21 = vpack.c.bf16 %v3696_v38, %v3692_v39 }
 0xa89   :  { %v3694_v28 = vld [vmem:[#allocation10 + $0x350] sm:$0xff] }
 0xa8a   :  { %6208 = vtanh.f32 %v7296_v52 }
 0xa94   :  { %v6209_v57 = vpop.eup %6208 }
 0xa95   :  { %v3168_v50 = vmul.f32 %v6209_v57, %v6207_v45  ;;  %v3669_v45 = vld [vmem:[#allocation10 + $0x288] sm:$0xff] }
 0xa96   :  { %v3673_v57 = vld [vmem:[#allocation10 + $0x2a8] sm:$0xff] }
 0xa97   :  { %3303 = vmatmul.mubr.f32.vlgmr.msra.gmra.mrb[20].mxu0 %v3168_v50  ;;  %3374 = vmatmul.mubr.f32.vlgmr.msra.gmra.mrb[20].mxu1 %v3168_v50  ;;  %v4624_v3 = vmul.f32 %v7247_v62, %v3168_v50  ;;  %v3671_v50 = vld [vmem:[#allocation10 + $0x298] sm:$0xff] }
 0xa98   :  { %5595 = vmatpush1.bf16.msra.mxu0 %v7081_v19  ;;  %5627 = vmatpush1.bf16.msra.mxu1 %v7084_v14 }
 0xa99   :  { %4633 = vadd.xlane.f32.xlu0 %v4624_v3  ;;  %5597 = vmatprep.subr.bf16.mxu0 %v7089_v47  ;;  %v7372_v3 = vpack.c.bf16 %v3673_v57, %v3669_v45  ;;  %v3705_v57 = vld [vmem:[#allocation10 + $0x3a8] sm:$0xff] }
 0xa9a   :  { %5629 = vmatprep.subr.bf16.mxu1 %v7091_v26  ;;  %3541 = vmatprep.mubr.f32.mxu0 %v6433_v1 }
 0xa9b   :  { %3612 = vmatprep.mubr.f32.mxu1 %v6433_v1 }
 0xa9c   :  { %5599 = vmatpush1.bf16.msra.mxu0 %v7093_v24  ;;  %5631 = vmatpush1.bf16.msra.mxu1 %v7096_v0 }
 0xa9d   :  { %5601 = vmatprep.subr.bf16.mxu0 %v7101_v43  ;;  %5633 = vmatprep.subr.bf16.mxu1 %v7103_v11 }
 0xaa0   :  { %5603 = vmatpush1.bf16.msra.mxu0 %v7105_v20  ;;  %5635 = vmatpush1.bf16.msra.mxu1 %v7108_v55 }
 0xaa1   :  { %5605 = vmatprep.subr.bf16.mxu0 %v7113_v34  ;;  %5637 = vmatprep.subr.bf16.mxu1 %v7115_v17 }
 0xaa4   :  { %5607 = vmatpush1.bf16.msra.mxu0 %v7117_v37  ;;  %5639 = vmatpush1.bf16.msra.mxu1 %v7120_v18 }
 0xaa5   :  { %5609 = vmatprep.subr.bf16.mxu0 %v7124_v13  ;;  %5641 = vmatprep.subr.bf16.mxu1 %v7126_v40 }
 0xaa8   :  { %5611 = vmatpush1.bf16.msra.mxu0 %v7129_v63  ;;  %5643 = vmatpush1.bf16.msra.mxu1 %v7133_v29 }
 0xaa9   :  { %5613 = vmatprep.subr.bf16.mxu0 %v7135_v61  ;;  %5645 = vmatprep.subr.bf16.mxu1 %v7137_v12 }
 0xaac   :  { %5615 = vmatpush1.bf16.msra.mxu0 %v7140_v42  ;;  %5647 = vmatpush1.bf16.msra.mxu1 %v7144_v7 }
 0xaad   :  { %5617 = vmatprep.subr.bf16.mxu0 %v7146_v33  ;;  %5649 = vmatprep.subr.bf16.mxu1 %v7149_v22 }
 0xab0   :  { %5619 = vmatpush1.bf16.msra.mxu0 %v7152_v9  ;;  %5651 = vmatpush1.bf16.msra.mxu1 %v7156_v41 }
 0xab1   :  { %5621 = vmatprep.subr.bf16.mxu0 %v7161_v30  ;;  %5653 = vmatprep.subr.bf16.mxu1 %v7163_v59 }
 0xab4   :  { %5623 = vmatpush1.bf16.msra.mxu0 %v7165_v46  ;;  %5655 = vmatpush1.bf16.msra.mxu1 %v7168_v54  ;;  %v3653_v54 = vld [vmem:[#allocation10 + $0x208] sm:$0xff] }
 0xab5   :  { %v7348_v5 = vpack.c.bf16 %v3657_v56, %v3653_v54  ;;  %5689 = vmatprep.subr.bf16.mxu1 %v7350_v15  ;;  %v3686_v56 = vld [vmem:[#allocation10 + $0x310] sm:$0xff] }
 0xab6   :  { %v7403_v23 = vpack.c.bf16 %v3690_v49, %v3686_v56 }
 0xab7   :  { %5657 = vmatprep.subr.bf16.mxu0 %v7348_v5 }
 0xb26   :  { %v4634_v19 = vpop.xlane.xlu0 %4633 }
 0xb27   :  { %v4655_v14 = vadd.f32 %v7284_v58, %v4634_v19  ;;  %v3675_v19 = vld [vmem:[#allocation10 + $0x2b8] sm:$0xff] }
 0xb29   :  { %4664 = vst.msk [vmem:[%s7660_s6 + $0x8] sm:$0xff] %vm4662_vm0, %v4655_v14  ;;  %v3668_v14 = vld [vmem:[#allocation10 + $0x280] sm:$0xff] }
 0xb6a   :  { %v3304_v47 = vpop.f32.mrb[20].mxu0  ;;  %v3375_v26 = vpop.f32.mrb[20].mxu1 }
 0xb6b   :  { %v5948_v24 = vadd.f32 %v3304_v47, %v7223_v51  ;;  %v3306_v0 = vpop.f32.mrb[21].mxu0  ;;  %v3377_v43 = vpop.f32.mrb[21].mxu1  ;;  %v5964_v37 = vadd.f32 %v3375_v26, %v7238_v35  ;;  %v3672_v47 = vld [vmem:[#allocation10 + $0x2a0] sm:$0xff]  ;;  %v7374_v26 = vpack.c.bf16 %v3675_v19, %v3671_v50  ;;  %v3703_v50 = vld [vmem:[#allocation10 + $0x398] sm:$0xff] }
 0xb6c   :  { %v5949_v11 = vadd.f32 %v3306_v0, %v7227_v27  ;;  %v5965_v34 = vadd.f32 %v3377_v43, %v7233_v44  ;;  %v3670_v0 = vld [vmem:[#allocation10 + $0x290] sm:$0xff]  ;;  %v3707_v19 = vld [vmem:[#allocation10 + $0x3b8] sm:$0xff] }
 0xb6d   :  { %v4740_v20 = vmul.f32 -1.442695, %v5948_v24  ;;  %v7376_v24 = vpack.c.bf16 %v3672_v47, %v3668_v14  ;;  %v3674_v43 = vld [vmem:[#allocation10 + $0x2b0] sm:$0xff]  ;;  %v7420_v47 = vpack.c.bf16 %v3707_v19, %v3703_v50 }
 0xb6e   :  { %v4741_v55 = vmul.f32 -1.442695, %v5949_v11  ;;  %v4742_v17 = vmul.f32 -1.442695, %v5965_v34  ;;  %v7379_v11 = vpack.c.bf16 %v3674_v43, %v3670_v0  ;;  %v3679_v34 = vld [vmem:[#allocation10 + $0x2d8] sm:$0xff]  ;;  %v3700_v0 = vld [vmem:[#allocation10 + $0x380] sm:$0xff] }
 0xb6f   :  { %6210 = vpow2.f32 %v4740_v20  ;;  %v3677_v20 = vld [vmem:[#allocation10 + $0x2c8] sm:$0xff]  ;;  %v3704_v43 = vld [vmem:[#allocation10 + $0x3a0] sm:$0xff] }
 0xb70   :  { %6212 = vpow2.f32 %v4741_v55  ;;  %v3681_v55 = vld [vmem:[#allocation10 + $0x2e8] sm:$0xff] }
 0xb71   :  { %6214 = vpow2.f32 %v4742_v17  ;;  %v7384_v17 = vpack.c.bf16 %v3681_v55, %v3677_v20  ;;  %v3702_v20 = vld [vmem:[#allocation10 + $0x390] sm:$0xff]  ;;  %v7423_v55 = vpack.c.bf16 %v3704_v43, %v3700_v0 }
 0xb72   :  { %6216 = vtanh.f32 %v5964_v37  ;;  %v3683_v37 = vld [vmem:[#allocation10 + $0x2f8] sm:$0xff] }
 0xb79   :  { %v6211_v18 = vpop.eup %6210 }
 0xb7a   :  { %v6213_v13 = vpop.eup %6212  ;;  %v3387_v40 = vadd.f32 1.0, %v6211_v18  ;;  %v3676_v18 = vld [vmem:[#allocation10 + $0x2c0] sm:$0xff] }
 0xb7b   :  { %v3393_v63 = vadd.f32 1.0, %v6213_v13  ;;  %v6215_v29 = vpop.eup %6214  ;;  %v3680_v13 = vld [vmem:[#allocation10 + $0x2e0] sm:$0xff] }
 0xb7c   :  { %6218 = vrcp.f32 %v3387_v40  ;;  %v6217_v61 = vpop.eup %6216  ;;  %v3400_v33 = vadd.f32 1.0, %v6215_v29  ;;  %v7386_v40 = vpack.c.bf16 %v3683_v37, %v3679_v34  ;;  %v3678_v29 = vld [vmem:[#allocation10 + $0x2d0] sm:$0xff]  ;;  %v3709_v37 = vld [vmem:[#allocation10 + $0x3c8] sm:$0xff] }
 0xb7d   :  { %6220 = vrcp.f32 %v3393_v63  ;;  %v7388_v63 = vpack.c.bf16 %v3680_v13, %v3676_v18  ;;  %v3706_v34 = vld [vmem:[#allocation10 + $0x3b0] sm:$0xff]  ;;  %v3713_v18 = vld [vmem:[#allocation10 + $0x3e8] sm:$0xff] }
 0xb7e   :  { %6222 = vrcp.f32 %v3400_v33  ;;  %v3687_v33 = vld [vmem:[#allocation10 + $0x318] sm:$0xff]  ;;  %v7427_v13 = vpack.c.bf16 %v3706_v34, %v3702_v20 }
 0xb86   :  { %v6219_v12 = vpop.eup %6218 }
 0xb87   :  { %v6221_v42 = vpop.eup %6220  ;;  %v3404_v7 = vmul.f32 %v6219_v12, %v6217_v61  ;;  %v3682_v61 = vld [vmem:[#allocation10 + $0x2f0] sm:$0xff] }
 0xb88   :  { %v3403_v22 = vmul.f32 %v6221_v42, %v7296_v52  ;;  %v6223_v41 = vpop.eup %6222  ;;  %v7367_v52 = vpack.c.bf16 %v3666_v48, %v3662_v60  ;;  %v7391_v12 = vpack.c.bf16 %v3682_v61, %v3678_v29  ;;  %v3685_v42 = vld [vmem:[#allocation10 + $0x308] sm:$0xff]  ;;  %v3698_v60 = vld [vmem:[#allocation10 + $0x370] sm:$0xff]  ;;  %v7429_v29 = vpack.c.bf16 %v3713_v18, %v3709_v37  ;;  %v3711_v61 = vld [vmem:[#allocation10 + $0x3d8] sm:$0xff] }
 0xb89   :  { %v3701_v48 = vld [vmem:[#allocation10 + $0x388] sm:$0xff]  ;;  %v7415_v45 = vpack.c.bf16 %v3698_v60, %v3694_v28 }
 0xb8a   :  { %v7342_v9 = vadd.f32 %v3404_v7, %v3403_v22  ;;  %v3689_v7 = vld [vmem:[#allocation10 + $0x328] sm:$0xff]  ;;  %v7418_v14 = vpack.c.bf16 %v3705_v57, %v3701_v48 }
 0xb8b   :  { %v7396_v22 = vpack.c.bf16 %v3689_v7, %v3685_v42  ;;  %v3715_v42 = vld [vmem:[#allocation10 + $0x3f8] sm:$0xff]  ;;  %v3708_v7 = vld [vmem:[#allocation10 + $0x3c0] sm:$0xff] }
 0xb8c   :  { %6224 = vtanh.f32 %v7342_v9 }
 0xb96   :  { %v6225_v30 = vpop.eup %6224 }
 0xb97   :  { %v3407_v59 = vmul.f32 %v6225_v30, %v6223_v41  ;;  %v3691_v41 = vld [vmem:[#allocation10 + $0x338] sm:$0xff]  ;;  %v3684_v30 = vld [vmem:[#allocation10 + $0x300] sm:$0xff] }
 0xb99   :  { %3542 = vmatmul.mubr.f32.vlgmr.msra.gmra.mrb[22].mxu0 %v3407_v59  ;;  %3613 = vmatmul.mubr.f32.vlgmr.msra.gmra.mrb[22].mxu1 %v3407_v59  ;;  %v4625_v46 = vmul.f32 %v7247_v62, %v3407_v59  ;;  %v3688_v59 = vld [vmem:[#allocation10 + $0x320] sm:$0xff] }
 0xb9a   :  { %3780 = vmatprep.mubr.f32.mxu0 %v6433_v1  ;;  %3851 = vmatprep.mubr.f32.mxu1 %v6433_v1  ;;  %v7400_v54 = vpack.c.bf16 %v3688_v59, %v3684_v30  ;;  %v3710_v30 = vld [vmem:[#allocation10 + $0x3d0] sm:$0xff] }
 0xb9b   :  { %4635 = vadd.xlane.f32.xlu1 %v4625_v46  ;;  %5659 = vmatpush1.bf16.msra.mxu0 %v7352_v2  ;;  %v7398_v46 = vpack.c.bf16 %v3691_v41, %v3687_v33  ;;  %v7432_v33 = vpack.c.bf16 %v3715_v42, %v3711_v61  ;;  %v3712_v41 = vld [vmem:[#allocation10 + $0x3e0] sm:$0xff]  ;;  %v3714_v59 = vld [vmem:[#allocation10 + $0x3f0] sm:$0xff] }
 0xb9c   :  { %5691 = vmatpush1.bf16.msra.mxu1 %v7355_v36  ;;  %5661 = vmatprep.subr.bf16.mxu0 %v7360_v8  ;;  %v7435_v56 = vpack.c.bf16 %v3712_v41, %v3708_v7  ;;  %v7439_v49 = vpack.c.bf16 %v3714_v59, %v3710_v30 }
 0xb9d   :  { %5693 = vmatprep.subr.bf16.mxu1 %v7362_v53 }
 0xb9f   :  { %5663 = vmatpush1.bf16.msra.mxu0 %v7364_v31 }
 0xba0   :  { %5695 = vmatpush1.bf16.msra.mxu1 %v7367_v52  ;;  %5665 = vmatprep.subr.bf16.mxu0 %v7372_v3 }
 0xba1   :  { %5697 = vmatprep.subr.bf16.mxu1 %v7374_v26 }
 0xba3   :  { %5667 = vmatpush1.bf16.msra.mxu0 %v7376_v24 }
 0xba4   :  { %5699 = vmatpush1.bf16.msra.mxu1 %v7379_v11  ;;  %5669 = vmatprep.subr.bf16.mxu0 %v7384_v17 }
 0xba5   :  { %5701 = vmatprep.subr.bf16.mxu1 %v7386_v40 }
 0xba7   :  { %5671 = vmatpush1.bf16.msra.mxu0 %v7388_v63 }
 0xba8   :  { %5703 = vmatpush1.bf16.msra.mxu1 %v7391_v12  ;;  %5673 = vmatprep.subr.bf16.mxu0 %v7396_v22 }
 0xba9   :  { %5705 = vmatprep.subr.bf16.mxu1 %v7398_v46 }
 0xbab   :  { %5675 = vmatpush1.bf16.msra.mxu0 %v7400_v54 }
 0xbac   :  { %5707 = vmatpush1.bf16.msra.mxu1 %v7403_v23  ;;  %5677 = vmatprep.subr.bf16.mxu0 %v7407_v16 }
 0xbad   :  { %5709 = vmatprep.subr.bf16.mxu1 %v7410_v25 }
 0xbaf   :  { %5679 = vmatpush1.bf16.msra.mxu0 %v7412_v21 }
 0xbb0   :  { %5711 = vmatpush1.bf16.msra.mxu1 %v7415_v45  ;;  %5681 = vmatprep.subr.bf16.mxu0 %v7418_v14 }
 0xbb1   :  { %5713 = vmatprep.subr.bf16.mxu1 %v7420_v47 }
 0xbb3   :  { %5683 = vmatpush1.bf16.msra.mxu0 %v7423_v55 }
 0xbb4   :  { %5715 = vmatpush1.bf16.msra.mxu1 %v7427_v13  ;;  %5685 = vmatprep.subr.bf16.mxu0 %v7429_v29 }
 0xbb5   :  { %5717 = vmatprep.subr.bf16.mxu1 %v7432_v33 }
 0xbb7   :  { %5687 = vmatpush1.bf16.msra.mxu0 %v7435_v56 }
 0xbb8   :  { %5719 = vmatpush1.bf16.msra.mxu1 %v7439_v49  ;;  %5721 = vmatprep.subr.bf16.mxu0 %v7348_v5 }
 0xbb9   :  { %5753 = vmatprep.subr.bf16.mxu1 %v7350_v15 }
 0xc28   :  { %v4636_v32 = vpop.xlane.xlu1 %4635 }
 0xc29   :  { %v4656_v4 = vadd.f32 %v7284_v58, %v4636_v32 }
 0xc2b   :  { %4665 = vst.msk [vmem:[%s7660_s6 + $0x10] sm:$0xff] %vm4662_vm0, %v4656_v4 }
 0xc6c   :  { %v3543_v10 = vpop.f32.mrb[22].mxu0  ;;  %v3614_v6 = vpop.f32.mrb[22].mxu1 }
 0xc6d   :  { %v5950_v39 = vadd.f32 %v3543_v10, %v7223_v51  ;;  %v3545_v38 = vpop.f32.mrb[23].mxu0  ;;  %v3616_v28 = vpop.f32.mrb[23].mxu1  ;;  %v5966_v0 = vadd.f32 %v3614_v6, %v7238_v35 }
 0xc6e   :  { %v5951_v60 = vadd.f32 %v3545_v38, %v7227_v27  ;;  %v5967_v50 = vadd.f32 %v3616_v28, %v7233_v44 }
 0xc6f   :  { %v4743_v48 = vmul.f32 -1.442695, %v5950_v39 }
 0xc70   :  { %v4744_v57 = vmul.f32 -1.442695, %v5951_v60  ;;  %v4745_v19 = vmul.f32 -1.442695, %v5967_v50 }
 0xc71   :  { %6226 = vpow2.f32 %v4743_v48 }
 0xc72   :  { %6228 = vpow2.f32 %v4744_v57 }
 0xc73   :  { %6230 = vpow2.f32 %v4745_v19 }
 0xc74   :  { %6232 = vtanh.f32 %v5966_v0 }
 0xc7b   :  { %v6227_v43 = vpop.eup %6226 }
 0xc7c   :  { %v6229_v20 = vpop.eup %6228  ;;  %v3626_v34 = vadd.f32 1.0, %v6227_v43 }
 0xc7d   :  { %v3632_v37 = vadd.f32 1.0, %v6229_v20  ;;  %v6231_v18 = vpop.eup %6230 }
 0xc7e   :  { %6234 = vrcp.f32 %v3626_v34  ;;  %v6233_v61 = vpop.eup %6232  ;;  %v3639_v30 = vadd.f32 1.0, %v6231_v18 }
 0xc7f   :  { %6236 = vrcp.f32 %v3632_v37 }
 0xc80   :  { %6238 = vrcp.f32 %v3639_v30 }
 0xc88   :  { %v6235_v42 = vpop.eup %6234 }
 0xc89   :  { %v6237_v7 = vpop.eup %6236  ;;  %v3643_v41 = vmul.f32 %v6235_v42, %v6233_v61 }
 0xc8a   :  { %v3642_v59 = vmul.f32 %v6237_v7, %v7342_v9  ;;  %v6239_v4 = vpop.eup %6238 }
 0xc8c   :  { %v7456_v32 = vadd.f32 %v3643_v41, %v3642_v59 }
 0xc8e   :  { %6240 = vtanh.f32 %v7456_v32 }
 0xc98   :  { %v6241_v10 = vpop.eup %6240 }
 0xc99   :  { %v3646_v6 = vmul.f32 %v6241_v10, %v6239_v4 }
 0xc9b   :  { %3781 = vmatmul.mubr.f32.vlgmr.msra.gmra.mrb[24].mxu0 %v3646_v6  ;;  %3852 = vmatmul.mubr.f32.vlgmr.msra.gmra.mrb[24].mxu1 %v3646_v6  ;;  %v4626_v39 = vmul.f32 %v7247_v62, %v3646_v6 }
 0xc9c   :  { %5723 = vmatpush1.bf16.msra.mxu0 %v7352_v2  ;;  %5755 = vmatpush1.bf16.msra.mxu1 %v7355_v36 }
 0xc9d   :  { %4637 = vadd.xlane.f32.xlu1 %v4626_v39  ;;  %5725 = vmatprep.subr.bf16.mxu0 %v7360_v8 }
 0xc9e   :  { %5757 = vmatprep.subr.bf16.mxu1 %v7362_v53  ;;  %4019 = vmatprep.mubr.f32.mxu0 %v6433_v1 }
 0xc9f   :  { %4090 = vmatprep.mubr.f32.mxu1 %v6433_v1 }
 0xca0   :  { %5727 = vmatpush1.bf16.msra.mxu0 %v7364_v31  ;;  %5759 = vmatpush1.bf16.msra.mxu1 %v7367_v52 }
 0xca1   :  { %5729 = vmatprep.subr.bf16.mxu0 %v7372_v3  ;;  %5761 = vmatprep.subr.bf16.mxu1 %v7374_v26 }
 0xca4   :  { %5731 = vmatpush1.bf16.msra.mxu0 %v7376_v24  ;;  %5763 = vmatpush1.bf16.msra.mxu1 %v7379_v11 }
 0xca5   :  { %5733 = vmatprep.subr.bf16.mxu0 %v7384_v17  ;;  %5765 = vmatprep.subr.bf16.mxu1 %v7386_v40 }
 0xca8   :  { %5735 = vmatpush1.bf16.msra.mxu0 %v7388_v63  ;;  %5767 = vmatpush1.bf16.msra.mxu1 %v7391_v12 }
 0xca9   :  { %5737 = vmatprep.subr.bf16.mxu0 %v7396_v22  ;;  %5769 = vmatprep.subr.bf16.mxu1 %v7398_v46 }
 0xcac   :  { %5739 = vmatpush1.bf16.msra.mxu0 %v7400_v54  ;;  %5771 = vmatpush1.bf16.msra.mxu1 %v7403_v23 }
 0xcad   :  { %5741 = vmatprep.subr.bf16.mxu0 %v7407_v16  ;;  %5773 = vmatprep.subr.bf16.mxu1 %v7410_v25 }
 0xcb0   :  { %5743 = vmatpush1.bf16.msra.mxu0 %v7412_v21  ;;  %5775 = vmatpush1.bf16.msra.mxu1 %v7415_v45 }
 0xcb1   :  { %5745 = vmatprep.subr.bf16.mxu0 %v7418_v14  ;;  %5777 = vmatprep.subr.bf16.mxu1 %v7420_v47 }
 0xcb4   :  { %5747 = vmatpush1.bf16.msra.mxu0 %v7423_v55  ;;  %5779 = vmatpush1.bf16.msra.mxu1 %v7427_v13 }
 0xcb5   :  { %5749 = vmatprep.subr.bf16.mxu0 %v7429_v29  ;;  %5781 = vmatprep.subr.bf16.mxu1 %v7432_v33 }
 0xcb8   :  { %5751 = vmatpush1.bf16.msra.mxu0 %v7435_v56  ;;  %5783 = vmatpush1.bf16.msra.mxu1 %v7439_v49 }
 0xcb9   :  { %5785 = vmatprep.subr.bf16.mxu0 %v7348_v5  ;;  %5817 = vmatprep.subr.bf16.mxu1 %v7350_v15 }
 0xd2a   :  { %v4638_v9 = vpop.xlane.xlu1 %4637 }
 0xd2b   :  { %v4657_v38 = vadd.f32 %v7284_v58, %v4638_v9 }
 0xd2d   :  { %4666 = vst.msk [vmem:[%s7660_s6 + $0x18] sm:$0xff] %vm4662_vm0, %v4657_v38 }
 0xd6e   :  { %v3782_v28 = vpop.f32.mrb[24].mxu0  ;;  %v3853_v60 = vpop.f32.mrb[24].mxu1 }
 0xd6f   :  { %v5952_v48 = vadd.f32 %v3782_v28, %v7223_v51  ;;  %v3784_v57 = vpop.f32.mrb[25].mxu0  ;;  %v3855_v50 = vpop.f32.mrb[25].mxu1  ;;  %v5968_v37 = vadd.f32 %v3853_v60, %v7238_v35 }
 0xd70   :  { %v5953_v19 = vadd.f32 %v3784_v57, %v7227_v27  ;;  %v5969_v20 = vadd.f32 %v3855_v50, %v7233_v44 }
 0xd71   :  { %v4746_v0 = vmul.f32 -1.442695, %v5952_v48 }
 0xd72   :  { %v4747_v43 = vmul.f32 -1.442695, %v5953_v19  ;;  %v4748_v34 = vmul.f32 -1.442695, %v5969_v20 }
 0xd73   :  { %6242 = vpow2.f32 %v4746_v0 }
 0xd74   :  { %6244 = vpow2.f32 %v4747_v43 }
 0xd75   :  { %6246 = vpow2.f32 %v4748_v34 }
 0xd76   :  { %6248 = vtanh.f32 %v5968_v37 }
 0xd7d   :  { %v6243_v18 = vpop.eup %6242 }
 0xd7e   :  { %v6245_v61 = vpop.eup %6244  ;;  %v3865_v42 = vadd.f32 1.0, %v6243_v18 }
 0xd7f   :  { %v3871_v7 = vadd.f32 1.0, %v6245_v61  ;;  %v6247_v41 = vpop.eup %6246 }
 0xd80   :  { %6250 = vrcp.f32 %v3865_v42  ;;  %v6249_v30 = vpop.eup %6248  ;;  %v3878_v6 = vadd.f32 1.0, %v6247_v41 }
 0xd81   :  { %6252 = vrcp.f32 %v3871_v7 }
 0xd82   :  { %6254 = vrcp.f32 %v3878_v6 }
 0xd8a   :  { %v6251_v59 = vpop.eup %6250 }
 0xd8b   :  { %v6253_v4 = vpop.eup %6252  ;;  %v3882_v10 = vmul.f32 %v6251_v59, %v6249_v30 }
 0xd8c   :  { %v3881_v39 = vmul.f32 %v6253_v4, %v7456_v32  ;;  %v6255_v38 = vpop.eup %6254 }
 0xd8e   :  { %v7504_v9 = vadd.f32 %v3882_v10, %v3881_v39 }
 0xd90   :  { %6256 = vtanh.f32 %v7504_v9 }
 0xd9a   :  { %v6257_v28 = vpop.eup %6256 }
 0xd9b   :  { %v3885_v60 = vmul.f32 %v6257_v28, %v6255_v38 }
 0xd9d   :  { %4020 = vmatmul.mubr.f32.vlgmr.msra.gmra.mrb[26].mxu0 %v3885_v60  ;;  %4091 = vmatmul.mubr.f32.vlgmr.msra.gmra.mrb[26].mxu1 %v3885_v60  ;;  %v4627_v48 = vmul.f32 %v7247_v62, %v3885_v60 }
 0xd9e   :  { %5787 = vmatpush1.bf16.msra.mxu0 %v7352_v2  ;;  %5819 = vmatpush1.bf16.msra.mxu1 %v7355_v36 }
 0xd9f   :  { %4639 = vadd.xlane.f32.xlu0 %v4627_v48  ;;  %5789 = vmatprep.subr.bf16.mxu0 %v7360_v8 }
 0xda0   :  { %5821 = vmatprep.subr.bf16.mxu1 %v7362_v53  ;;  %4258 = vmatprep.mubr.f32.mxu0 %v6433_v1 }
 0xda1   :  { %4329 = vmatprep.mubr.f32.mxu1 %v6433_v1 }
 0xda2   :  { %5791 = vmatpush1.bf16.msra.mxu0 %v7364_v31  ;;  %5823 = vmatpush1.bf16.msra.mxu1 %v7367_v52 }
 0xda3   :  { %5793 = vmatprep.subr.bf16.mxu0 %v7372_v3  ;;  %5825 = vmatprep.subr.bf16.mxu1 %v7374_v26 }
 0xda6   :  { %5795 = vmatpush1.bf16.msra.mxu0 %v7376_v24  ;;  %5827 = vmatpush1.bf16.msra.mxu1 %v7379_v11 }
 0xda7   :  { %5797 = vmatprep.subr.bf16.mxu0 %v7384_v17  ;;  %5829 = vmatprep.subr.bf16.mxu1 %v7386_v40 }
 0xdaa   :  { %5799 = vmatpush1.bf16.msra.mxu0 %v7388_v63  ;;  %5831 = vmatpush1.bf16.msra.mxu1 %v7391_v12 }
 0xdab   :  { %5801 = vmatprep.subr.bf16.mxu0 %v7396_v22  ;;  %5833 = vmatprep.subr.bf16.mxu1 %v7398_v46 }
 0xdae   :  { %5803 = vmatpush1.bf16.msra.mxu0 %v7400_v54  ;;  %5835 = vmatpush1.bf16.msra.mxu1 %v7403_v23 }
 0xdaf   :  { %5805 = vmatprep.subr.bf16.mxu0 %v7407_v16  ;;  %5837 = vmatprep.subr.bf16.mxu1 %v7410_v25 }
 0xdb2   :  { %5807 = vmatpush1.bf16.msra.mxu0 %v7412_v21  ;;  %5839 = vmatpush1.bf16.msra.mxu1 %v7415_v45 }
 0xdb3   :  { %5809 = vmatprep.subr.bf16.mxu0 %v7418_v14  ;;  %5841 = vmatprep.subr.bf16.mxu1 %v7420_v47 }
 0xdb6   :  { %5811 = vmatpush1.bf16.msra.mxu0 %v7423_v55  ;;  %5843 = vmatpush1.bf16.msra.mxu1 %v7427_v13 }
 0xdb7   :  { %5813 = vmatprep.subr.bf16.mxu0 %v7429_v29  ;;  %5845 = vmatprep.subr.bf16.mxu1 %v7432_v33 }
 0xdba   :  { %5815 = vmatpush1.bf16.msra.mxu0 %v7435_v56  ;;  %5847 = vmatpush1.bf16.msra.mxu1 %v7439_v49 }
 0xdbb   :  { %5849 = vmatprep.subr.bf16.mxu0 %v7348_v5  ;;  %5881 = vmatprep.subr.bf16.mxu1 %v7350_v15 }
 0xe2c   :  { %v4640_v32 = vpop.xlane.xlu0 %4639 }
 0xe2d   :  { %v4658_v57 = vadd.f32 %v7284_v58, %v4640_v32 }
 0xe2f   :  { %4667 = vst.msk [vmem:[%s7660_s6 + $0x20] sm:$0xff] %vm4662_vm0, %v4658_v57 }
 0xe70   :  { %v4021_v50 = vpop.f32.mrb[26].mxu0  ;;  %v4092_v19 = vpop.f32.mrb[26].mxu1 }
 0xe71   :  { %v5954_v0 = vadd.f32 %v4021_v50, %v7223_v51  ;;  %v4023_v43 = vpop.f32.mrb[27].mxu0  ;;  %v4094_v20 = vpop.f32.mrb[27].mxu1  ;;  %v5970_v61 = vadd.f32 %v4092_v19, %v7238_v35 }
 0xe72   :  { %v5955_v34 = vadd.f32 %v4023_v43, %v7227_v27  ;;  %v5971_v15 = vadd.f32 %v4094_v20, %v7233_v44 }
 0xe73   :  { %v4749_v37 = vmul.f32 -1.442695, %v5954_v0 }
 0xe74   :  { %v4750_v5 = vmul.f32 -1.442695, %v5955_v34  ;;  %v4751_v18 = vmul.f32 -1.442695, %v5971_v15 }
 0xe75   :  { %6258 = vpow2.f32 %v4749_v37 }
 0xe76   :  { %6260 = vpow2.f32 %v4750_v5 }
 0xe77   :  { %6262 = vpow2.f32 %v4751_v18 }
 0xe78   :  { %6264 = vtanh.f32 %v5970_v61 }
 0xe7f   :  { %v6259_v42 = vpop.eup %6258 }
 0xe80   :  { %v6261_v7 = vpop.eup %6260  ;;  %v4104_v41 = vadd.f32 1.0, %v6259_v42 }
 0xe81   :  { %v4110_v30 = vadd.f32 1.0, %v6261_v7  ;;  %v6263_v59 = vpop.eup %6262 }
 0xe82   :  { %6266 = vrcp.f32 %v4104_v41  ;;  %v6265_v4 = vpop.eup %6264  ;;  %v4117_v38 = vadd.f32 1.0, %v6263_v59 }
 0xe83   :  { %6268 = vrcp.f32 %v4110_v30 }
 0xe84   :  { %6270 = vrcp.f32 %v4117_v38 }
 0xe8c   :  { %v6267_v10 = vpop.eup %6266 }
 0xe8d   :  { %v6269_v6 = vpop.eup %6268  ;;  %v4121_v39 = vmul.f32 %v6267_v10, %v6265_v4 }
 0xe8e   :  { %v4120_v28 = vmul.f32 %v6269_v6, %v7504_v9  ;;  %v6271_v48 = vpop.eup %6270 }
 0xe90   :  { %v7552_v60 = vadd.f32 %v4121_v39, %v4120_v28 }
 0xe92   :  { %6272 = vtanh.f32 %v7552_v60 }
 0xe9c   :  { %v6273_v32 = vpop.eup %6272 }
 0xe9d   :  { %v4124_v57 = vmul.f32 %v6273_v32, %v6271_v48 }
 0xe9f   :  { %4259 = vmatmul.mubr.f32.vlgmr.msra.gmra.mrb[28].mxu0 %v4124_v57  ;;  %4330 = vmatmul.mubr.f32.vlgmr.msra.gmra.mrb[28].mxu1 %v4124_v57  ;;  %v4628_v50 = vmul.f32 %v7247_v62, %v4124_v57 }
 0xea0   :  { %5851 = vmatpush1.bf16.msra.mxu0 %v7352_v2  ;;  %5883 = vmatpush1.bf16.msra.mxu1 %v7355_v36 }
 0xea1   :  { %4641 = vadd.xlane.f32.xlu1 %v4628_v50  ;;  %5853 = vmatprep.subr.bf16.mxu0 %v7360_v8 }
 0xea2   :  { %5885 = vmatprep.subr.bf16.mxu1 %v7362_v53  ;;  %4497 = vmatprep.mubr.f32.mxu0 %v6433_v1 }
 0xea3   :  { %4568 = vmatprep.mubr.f32.mxu1 %v6433_v1 }
 0xea4   :  { %5855 = vmatpush1.bf16.msra.mxu0 %v7364_v31  ;;  %5887 = vmatpush1.bf16.msra.mxu1 %v7367_v52 }
 0xea5   :  { %5857 = vmatprep.subr.bf16.mxu0 %v7372_v3  ;;  %5889 = vmatprep.subr.bf16.mxu1 %v7374_v26 }
 0xea8   :  { %5859 = vmatpush1.bf16.msra.mxu0 %v7376_v24  ;;  %5891 = vmatpush1.bf16.msra.mxu1 %v7379_v11 }
 0xea9   :  { %5861 = vmatprep.subr.bf16.mxu0 %v7384_v17  ;;  %5893 = vmatprep.subr.bf16.mxu1 %v7386_v40 }
 0xeac   :  { %5863 = vmatpush1.bf16.msra.mxu0 %v7388_v63  ;;  %5895 = vmatpush1.bf16.msra.mxu1 %v7391_v12 }
 0xead   :  { %5865 = vmatprep.subr.bf16.mxu0 %v7396_v22  ;;  %5897 = vmatprep.subr.bf16.mxu1 %v7398_v46 }
 0xeb0   :  { %5867 = vmatpush1.bf16.msra.mxu0 %v7400_v54  ;;  %5899 = vmatpush1.bf16.msra.mxu1 %v7403_v23 }
 0xeb1   :  { %5869 = vmatprep.subr.bf16.mxu0 %v7407_v16  ;;  %5901 = vmatprep.subr.bf16.mxu1 %v7410_v25 }
 0xeb4   :  { %5871 = vmatpush1.bf16.msra.mxu0 %v7412_v21  ;;  %5903 = vmatpush1.bf16.msra.mxu1 %v7415_v45 }
 0xeb5   :  { %5873 = vmatprep.subr.bf16.mxu0 %v7418_v14  ;;  %5905 = vmatprep.subr.bf16.mxu1 %v7420_v47 }
 0xeb8   :  { %5875 = vmatpush1.bf16.msra.mxu0 %v7423_v55  ;;  %5907 = vmatpush1.bf16.msra.mxu1 %v7427_v13  ;;  %v6306_v13 = vld [vmem:[%s7658_s4] ss:$0 sm:$0xff]  ;;  %s6434_s4 = smov [#allocation11]  }
 0xeb9   :  { %5877 = vmatprep.subr.bf16.mxu0 %v7429_v29  ;;  %5909 = vmatprep.subr.bf16.mxu1 %v7432_v33  ;;  %s4678_s22 = sshll.u32 %s6434_s4, 4  ;;  %s4679_s22 = int_to_ptr.vmem [resolvable:$true] %s4678_s22 }
 0xeba   :  { %s6374_s2 = scalar_lea.vmem %s4679_s22, 256  ;;  %p6379_p11 = scmp.lt.s32.totalorder %s4679_s22, %s4679_s22 }
 0xebb   :  { %p6375_p10 = scmp.ne.s32.totalorder %s4679_s22, %s6374_s2  ;;  %p6380_p12 = scmp.lt.s32.totalorder %s6374_s2, %s6374_s2 }
 0xebc   :  { %5879 = vmatpush1.bf16.msra.mxu0 %v7435_v56  ;;  %5911 = vmatpush1.bf16.msra.mxu1 %v7439_v49  ;;  %v7601_v56 = vld [vmem:[#allocation4] ss:$0 sm:$0xff] }
 0xebd   :  { %p6381_p13 = por %p6380_p12, %p6379_p11 }
 0xebf   :  { %p6382_p0 = pnand %p6381_p13, %p6375_p10 }
 0xf2e   :  { %v4642_v1 = vpop.xlane.xlu1 %4641 }
 0xf2f   :  { %v4659_v62 = vadd.f32 %v7284_v58, %v4642_v1 }
 0xf31   :  { %4668 = vst.msk [vmem:[%s7660_s6 + $0x28] sm:$0xff] %vm4662_vm0, %v4659_v62 }
 0xf72   :  { %v4260_v2 = vpop.f32.mrb[28].mxu0  ;;  %v4331_v36 = vpop.f32.mrb[28].mxu1 }
 0xf73   :  { %v5956_v8 = vadd.f32 %v4260_v2, %v7223_v51  ;;  %v4262_v53 = vpop.f32.mrb[29].mxu0  ;;  %v4333_v31 = vpop.f32.mrb[29].mxu1  ;;  %v5972_v11 = vadd.f32 %v4331_v36, %v7238_v35 }
 0xf74   :  { %v5957_v52 = vadd.f32 %v4262_v53, %v7227_v27  ;;  %v5973_v24 = vadd.f32 %v4333_v31, %v7233_v44 }
 0xf75   :  { %v4752_v3 = vmul.f32 -1.442695, %v5956_v8 }
 0xf76   :  { %v4753_v26 = vmul.f32 -1.442695, %v5957_v52  ;;  %v4754_v58 = vmul.f32 -1.442695, %v5973_v24 }
 0xf77   :  { %6274 = vpow2.f32 %v4752_v3 }
 0xf78   :  { %6276 = vpow2.f32 %v4753_v26 }
 0xf79   :  { %6278 = vpow2.f32 %v4754_v58 }
 0xf7a   :  { %6280 = vtanh.f32 %v5972_v11 }
 0xf81   :  { %v6275_v17 = vpop.eup %6274 }
 0xf82   :  { %v6277_v40 = vpop.eup %6276  ;;  %v4343_v63 = vadd.f32 1.0, %v6275_v17 }
 0xf83   :  { %v4349_v12 = vadd.f32 1.0, %v6277_v40  ;;  %v6279_v22 = vpop.eup %6278 }
 0xf84   :  { %6282 = vrcp.f32 %v4343_v63  ;;  %v6281_v46 = vpop.eup %6280  ;;  %v4356_v25 = vadd.f32 1.0, %v6279_v22 }
 0xf85   :  { %6284 = vrcp.f32 %v4349_v12 }
 0xf86   :  { %6286 = vrcp.f32 %v4356_v25 }
 0xf8e   :  { %v6283_v54 = vpop.eup %6282 }
 0xf8f   :  { %v6285_v23 = vpop.eup %6284  ;;  %v4360_v16 = vmul.f32 %v6283_v54, %v6281_v46 }
 0xf90   :  { %v4359_v21 = vmul.f32 %v6285_v23, %v7552_v60  ;;  %v6287_v14 = vpop.eup %6286 }
 0xf92   :  { %v4361_v45 = vadd.f32 %v4360_v16, %v4359_v21 }
 0xf94   :  { %6288 = vtanh.f32 %v4361_v45 }
 0xf9e   :  { %v6289_v47 = vpop.eup %6288 }
 0xf9f   :  { %v4363_v55 = vmul.f32 %v6289_v47, %v6287_v14 }
 0xfa1   :  { %4498 = vmatmul.mubr.f32.vlgmr.msra.gmra.mrb[30].mxu0 %v4363_v55  ;;  %4569 = vmatmul.mubr.f32.vlgmr.msra.gmra.mrb[30].mxu1 %v4363_v55  ;;  %v4629_v29 = vmul.f32 %v6306_v13, %v4363_v55 }
 0xfa3   :  { %4643 = vadd.xlane.f32.xlu0 %v4629_v29 }
0x1030   :  { %v4644_v33 = vpop.xlane.xlu0 %4643 }
0x1031   :  { %v4660_v49 = vadd.f32 %v7601_v56, %v4644_v33 }
0x1033   :  { %4669 = vst.msk [vmem:[%s7660_s6 + $0x30] sm:$0xff] %vm4662_vm0, %v4660_v49 }
0x1074   :  { %v4499_v9 = vpop.f32.mrb[30].mxu0  ;;  %v4570_v19 = vpop.f32.mrb[30].mxu1 }
0x1075   :  { %v5958_v0 = vadd.f32 %v4499_v9, %v7223_v51  ;;  %v4501_v43 = vpop.f32.mrb[31].mxu0  ;;  %v4572_v20 = vpop.f32.mrb[31].mxu1  ;;  %v5974_v61 = vadd.f32 %v4570_v19, %v7238_v35 }
0x1076   :  { %v5959_v34 = vadd.f32 %v4501_v43, %v7227_v27  ;;  %v5975_v15 = vadd.f32 %v4572_v20, %v7233_v44 }
0x1077   :  { %v4755_v37 = vmul.f32 -1.442695, %v5958_v0 }
0x1078   :  { %v4756_v5 = vmul.f32 -1.442695, %v5959_v34  ;;  %v4757_v18 = vmul.f32 -1.442695, %v5975_v15 }
0x1079   :  { %6290 = vpow2.f32 %v4755_v37 }
0x107a   :  { %6292 = vpow2.f32 %v4756_v5 }
0x107b   :  { %6294 = vpow2.f32 %v4757_v18 }
0x107c   :  { %6296 = vtanh.f32 %v5974_v61 }
0x1083   :  { %v6291_v42 = vpop.eup %6290 }
0x1084   :  { %v6293_v7 = vpop.eup %6292  ;;  %v4582_v41 = vadd.f32 1.0, %v6291_v42 }
0x1085   :  { %v4588_v30 = vadd.f32 1.0, %v6293_v7  ;;  %v6295_v51 = vpop.eup %6294 }
0x1086   :  { %6298 = vrcp.f32 %v4582_v41  ;;  %v6297_v59 = vpop.eup %6296  ;;  %v4595_v6 = vadd.f32 1.0, %v6295_v51 }
0x1087   :  { %6300 = vrcp.f32 %v4588_v30 }
0x1088   :  { %6302 = vrcp.f32 %v4595_v6 }
0x1090   :  { %v6299_v27 = vpop.eup %6298 }
0x1091   :  { %v6301_v4 = vpop.eup %6300  ;;  %v4599_v10 = vmul.f32 %v6299_v27, %v6297_v59 }
0x1092   :  { %v4598_v39 = vmul.f32 %v6301_v4, %v4361_v45  ;;  %v6303_v44 = vpop.eup %6302 }
0x1094   :  { %v4600_v38 = vadd.f32 %v4599_v10, %v4598_v39 }
0x1096   :  { %6304 = vtanh.f32 %v4600_v38  ;;  %4607 = vst [vmem:[#allocation12 + $0x8] sm:$0xff] %v4600_v38 }
0x10a0   :  { %v6305_v35 = vpop.eup %6304 }
0x10a1   :  { %v4602_v28 = vmul.f32 %v6305_v35, %v6303_v44 }
0x10a3   :  { %v4630_v60 = vmul.f32 %v6306_v13, %v4602_v28  ;;  %4605 = vst [vmem:[#allocation11 + $0x8] sm:$0xff] %v4602_v28 }
0x10a5   :  { %4645 = vadd.xlane.f32.xlu1 %v4630_v60 }
0x10a6   :  { %6385 = shalt.err (!%p6382_p0)
}
0x10a7   :  { %s6386_s23 = scalar_lea.hbm %s7661_s7, 256 }
0x10a8   :  { %p6387_p1 = scmp.ne.s32.totalorder %s7661_s7, %s6386_s23  ;;  %p6390_p2 = scmp.lt.u32.totalorder %s6386_s23, %s7661_s7 }
0x10aa   :  { %p6392_p3 = pnand %p6390_p2, %p6387_p1 }
0x10ac   :  { %6395 = shalt.err (!%p6392_p3)
}
0x10ad   :  { %4684 = dma.vmem_to_hbm [thread:$0]  %s4679_s22, 256, %s7661_s7, [#allocation7], %s6430_s1, %s6430_s1, %s6431_s30  }
0x10ae   :  { %s6396_s29 = scalar_lea.vmem %s7612_s21, 256  ;;  %p6401_p5 = scmp.lt.s32.totalorder %s7612_s21, %s7612_s21 }
0x10af   :  { %p6397_p4 = scmp.ne.s32.totalorder %s7612_s21, %s6396_s29  ;;  %p6402_p6 = scmp.lt.s32.totalorder %s6396_s29, %s6396_s29 }
0x10b1   :  { %p6403_p7 = por %p6402_p6, %p6401_p5 }
0x10b3   :  { %p6404_p8 = pnand %p6403_p7, %p6397_p4 }
0x10b5   :  { %6407 = shalt.err (!%p6404_p8)
}
0x10b6   :  { %s6408_s11 = scalar_lea.hbm %s7662_s8, 256 }
0x10b7   :  { %p6409_p9 = scmp.ne.s32.totalorder %s7662_s8, %s6408_s11  ;;  %p6412_p10 = scmp.lt.u32.totalorder %s6408_s11, %s7662_s8 }
0x10b9   :  { %p6414_p11 = pnand %p6412_p10, %p6409_p9 }
0x10bb   :  { %6417 = shalt.err (!%p6414_p11)
}
0x10bc   :  { %4696 = dma.vmem_to_hbm [thread:$0]  %s7612_s21, 256, %s7662_s8, [#allocation13], %s6430_s1, %s6430_s1, %s6431_s30  }
0x1132   :  { %v4646_v48 = vpop.xlane.xlu1 %4645 }
0x1133   :  { %v4661_v32 = vadd.f32 %v7601_v56, %v4646_v48 }
0x1135   :  { %4670 = vst.msk [vmem:[%s7660_s6 + $0x38] sm:$0xff] %vm4662_vm0, %v4661_v32 }
0x1136   :  { %6422 = dma.done.wait [#allocation7], 256  }
0x1137   :  { %6423 = vsyncadd [#allocation7], 4294967040 }
0x1138   :  { %6424 = dma.done.wait [#allocation13], 256  }
0x1139   :  { %6425 = vsyncadd [#allocation13], 4294967040 }
0x113a   :  { %4705 = vsyncpa [#allocation6], 1 }
0x113b   :  { %4706 = vsyncpa [#allocation9], 1 }
0x113c   :  { %4707 = vsyncpa [#allocation7], 1 }
0x113d   :  { %4708 = vsyncpa [#allocation13], 1 }

</bundles_post_ra>
